<compile_context>
chip_gen: v7x
topology: tpu7x:2x2x1
jax: 0.10.0
libtpu: 0.0.40
codegen_flags: <defaults>
</compile_context>

<pallas_src>
import jax
import jax.numpy as jnp
import numpy as np
from jax import lax
from jax.experimental import pallas as pl
from jax.experimental.pallas import tpu as pltpu

INPUT_SIZE = 5
HIDDEN_SIZE = 64
NUM_LAYERS = 2      # hard-wired as two explicit cells in the kernel
OUTPUT_SIZE = 1

LANE = 128
SUBLANE = 8


def _round_up(v, m):
    return ((v + m - 1) // m) * m


def _lstm_fc_kernel(x_ref, wih0_ref, whh0_ref, b0_ref,
                    wih1_ref, whh1_ref, b1_ref, wfc_ref, bfc_ref,
                    out_ref, xproj_ref):
    """2-layer LSTM recurrence + Linear for one batch chunk.

    x_ref    : (T, B, F)   f32  time-major input chunk
    wih0     : (F, 4*HP)   bf16 layer-0 input weights (gate cols padded to HP)
    whh0     : (HP, 4*HP)  bf16 layer-0 hidden weights
    b0       : (1, 4*HP)   f32  layer-0 combined bias (b_ih + b_hh)
    wih1     : (HP, 4*HP)  bf16 layer-1 input weights
    whh1     : (HP, 4*HP)  bf16 layer-1 hidden weights
    b1       : (1, 4*HP)   f32  layer-1 combined bias
    wfc      : (HP, OP)    bf16 final Linear weight (rows/cols zero-padded)
    bfc      : (1, OP)     f32
    out_ref  : (B, OP)     f32  (lane-dense; real output is column 0)
    xproj_ref: (T, B, 4*HP) f32 VMEM scratch for the hoisted input projection
    """
    T, B, F = x_ref.shape
    HP = whh0_ref.shape[0]
    G = 4 * HP

    # ---- hoisted layer-0 input projection: one big MXU-friendly matmul ----
    # bf16 operands, f32 accumulation. For long T this should be time-tiled
    # (v7x VMEM is 64 MiB physical / 32 MiB scoped); fine at T = 8.
    xb = x_ref[...].astype(jnp.bfloat16).reshape(T * B, F)
    xproj_ref[...] = (
        jnp.dot(xb, wih0_ref[...], preferred_element_type=jnp.float32)
        + b0_ref[...]
    ).reshape(T, B, G)

    whh0 = whh0_ref[...]
    wih1 = wih1_ref[...]
    whh1 = whh1_ref[...]
    # Hoist the bias broadcast out of the time loop (JAX does not CSE it).
    b1 = jnp.broadcast_to(b1_ref[...], (B, G))

    def activate(gates, c):
        # HP == 128 -> every gate slice is a whole 128-lane vreg.
        i = jax.nn.sigmoid(gates[:, 0 * HP:1 * HP])
        f = jax.nn.sigmoid(gates[:, 1 * HP:2 * HP])
        g = jnp.tanh(gates[:, 2 * HP:3 * HP])
        o = jax.nn.sigmoid(gates[:, 3 * HP:4 * HP])
        c_new = f * c + i * g
        h_new = o * jnp.tanh(c_new)
        return h_new, c_new

    def body(t, carry):
        h0, c0, h1, c1 = carry
        # Both of these depend only on step t-1 state, so their MXU pushes can
        # overlap; only h0(t) @ Wih1 below sits on the serial h0 -> h1 chain.
        g0 = xproj_ref[t] + jnp.dot(h0.astype(jnp.bfloat16), whh0,
                                    preferred_element_type=jnp.float32)
        r1 = jnp.dot(h1.astype(jnp.bfloat16), whh1,
                     preferred_element_type=jnp.float32) + b1
        h0, c0 = activate(g0, c0)
        g1 = r1 + jnp.dot(h0.astype(jnp.bfloat16), wih1,
                          preferred_element_type=jnp.float32)
        h1, c1 = activate(g1, c1)
        return (h0, c0, h1, c1)

    z = jnp.zeros((B, HP), jnp.float32)
    # Fully unrolled (T static, small): exposes layer0(t+1) || layer1(t) overlap.
    # Switch to unroll=4 if T grows (carries already fill the register file).
    _, _, h1, _ = lax.fori_loop(0, T, body, (z, z, z, z), unroll=True)

    # fc(out[:, -1, :]) -> last-timestep hidden of the top layer.
    # OP = 128 keeps this store a full, unmasked vreg store.
    out_ref[...] = (jnp.dot(h1.astype(jnp.bfloat16), wfc_ref[...],
                            preferred_element_type=jnp.float32)
                    + bfc_ref[...])


def _prepare_kernel_params(p, hp, op):
    """Pad hidden 64->hp per gate, pad FC output 1->op, cast weights to bf16."""
    h = p["whh0"].shape[0]
    o = p["wfc"].shape[1]
    bf = jnp.bfloat16

    def pad_gate_cols(w):
        # (in, 4h) -> (in, 4*hp): pad each of the 4 gate blocks independently.
        blocks = [w[:, k * h:(k + 1) * h] for k in range(4)]
        return jnp.concatenate(
            [jnp.pad(blk, ((0, 0), (0, hp - h))) for blk in blocks], axis=1)

    def pad_rows(w):
        return jnp.pad(w, ((0, hp - h), (0, 0)))

    wih0 = pad_gate_cols(p["wih0"]).astype(bf)            # (F, 4hp)
    whh0 = pad_rows(pad_gate_cols(p["whh0"])).astype(bf)  # (hp, 4hp)
    b0 = pad_gate_cols(p["b0"])                           # (1, 4hp) f32
    wih1 = pad_rows(pad_gate_cols(p["wih1"])).astype(bf)  # (hp, 4hp)
    whh1 = pad_rows(pad_gate_cols(p["whh1"])).astype(bf)  # (hp, 4hp)
    b1 = pad_gate_cols(p["b1"])                           # (1, 4hp) f32
    wfc = jnp.pad(p["wfc"], ((0, hp - h), (0, op - o))).astype(bf)  # (hp, op)
    bfc = jnp.pad(p["bfc"], ((0, 0), (0, op - o)))        # (1, op) f32
    return dict(wih0=wih0, whh0=whh0, b0=b0, wih1=wih1, whh1=whh1, b1=b1,
                wfc=wfc, bfc=bfc)


def _pick_batch_block(b):
    """Batch chunk size.

    * <= 256 rows so one chunk fills (and never starves) the 256-row MXU on
      v6e/v7x while keeping the xproj scratch small.
    * at least 2 chunks whenever B >= 16 so dimension_semantics=("parallel",)
      can shard the grid across v7x's two TensorCores.  (On 1-TC chips extra
      chunks just serialize; tune the threshold if small-batch v5e/v6e latency
      matters.)
    """
    b8 = _round_up(max(b, 1), SUBLANE)
    if b8 < 16:
        return b8
    return min(256, _round_up((b8 + 1) // 2, SUBLANE))


def lstm_stock_forward(x, params):
    """x: (B, T, F) float32 (batch_first, like the PyTorch module). Returns (B, O)."""
    B, T, F = x.shape
    H = params["whh0"].shape[0]
    O = params["wfc"].shape[1]

    HP = _round_up(H, LANE)          # 64 -> 128 (lane-aligned gate slices)
    OP = _round_up(O, LANE)          # 1 -> 128 (lane-dense output store)
    G = 4 * HP
    B_blk = _pick_batch_block(B)
    B_pad = _round_up(B, B_blk)

    kp = _prepare_kernel_params(params, HP, OP)

    # Time-major + batch pad.  (At these sizes the transpose is negligible; for
    # large T*B feed the producer time-major instead of materializing it here.)
    x_tm = jnp.transpose(x, (1, 0, 2)).astype(jnp.float32)   # (T, B, F)
    if B_pad != B:
        x_tm = jnp.pad(x_tm, ((0, 0), (0, B_pad - B), (0, 0)))

    def full_spec(arr):
        # Grid-invariant operand (weights/biases): whole array every step.
        # (pipeline_mode=pl.Buffered(1) would drop their double-buffering; left
        # at the default to keep the lowering maximally portable.)
        nd = arr.ndim
        return pl.BlockSpec(arr.shape, lambda i, _nd=nd: (0,) * _nd)

    out = pl.pallas_call(
        _lstm_fc_kernel,
        out_shape=jax.ShapeDtypeStruct((B_pad, OP), jnp.float32),
        grid=(B_pad // B_blk,),
        in_specs=[
            pl.BlockSpec((T, B_blk, F), lambda i: (0, i, 0)),
            full_spec(kp["wih0"]),
            full_spec(kp["whh0"]),
            full_spec(kp["b0"]),
            full_spec(kp["wih1"]),
            full_spec(kp["whh1"]),
            full_spec(kp["b1"]),
            full_spec(kp["wfc"]),
            full_spec(kp["bfc"]),
        ],
        out_specs=pl.BlockSpec((B_blk, OP), lambda i: (i, 0)),
        scratch_shapes=[pltpu.VMEM((T, B_blk, G), jnp.float32)],
        compiler_params=pltpu.CompilerParams(
            dimension_semantics=("parallel",),
            vmem_limit_bytes=32 * 1024 * 1024),
    )(x_tm, kp["wih0"], kp["whh0"], kp["b0"],
      kp["wih1"], kp["whh1"], kp["b1"], kp["wfc"], kp["bfc"])
    return out[:B, :O]


def _init_params(key, input_size=INPUT_SIZE, hidden=HIDDEN_SIZE, out=OUTPUT_SIZE):
    """Deterministic synthetic parameters (shapes match nn.LSTM + nn.Linear)."""
    ks = jax.random.split(key, 8)
    s = 1.0 / np.sqrt(hidden)
    u = lambda k, shape: jax.random.uniform(k, shape, jnp.float32, -s, s)
    return {
        # layer 0: torch weight_ih_l0 is (4H, F) -> stored transposed (F, 4H)
        "wih0": u(ks[0], (input_size, 4 * hidden)),
        "whh0": u(ks[1], (hidden, 4 * hidden)),
        "b0":   u(ks[2], (1, 4 * hidden)),        # b_ih_l0 + b_hh_l0 combined
        # layer 1: torch weight_ih_l1 is (4H, H)
        "wih1": u(ks[3], (hidden, 4 * hidden)),
        "whh1": u(ks[4], (hidden, 4 * hidden)),
        "b1":   u(ks[5], (1, 4 * hidden)),
        # fc: torch weight is (O, H) -> stored transposed (H, O)
        "wfc":  u(ks[6], (hidden, out)),
        "bfc":  u(ks[7], (1, out)),
    }


def _reference_forward(x, p, matmul_dtype=jnp.float32):
    """Pure-JAX reference (PyTorch LSTM equations).

    matmul_dtype=jnp.bfloat16 mirrors the kernel's numerics (bf16 operands,
    f32 accumulation); jnp.float32 is the exact module reference.
    """
    B, T, F = x.shape
    H = p["whh0"].shape[0]

    def mm(a, w):
        return jnp.dot(a.astype(matmul_dtype), w.astype(matmul_dtype),
                       preferred_element_type=jnp.float32)

    def cell(x_t, h, c, wih, whh, b):
        g = mm(x_t, wih) + mm(h, whh) + b
        i = jax.nn.sigmoid(g[:, 0:H])
        f = jax.nn.sigmoid(g[:, H:2 * H])
        gg = jnp.tanh(g[:, 2 * H:3 * H])
        o = jax.nn.sigmoid(g[:, 3 * H:4 * H])
        c = f * c + i * gg
        return o * jnp.tanh(c), c

    h0 = c0 = h1 = c1 = jnp.zeros((B, H), jnp.float32)
    for t in range(T):
        h0, c0 = cell(x[:, t, :], h0, c0, p["wih0"], p["whh0"], p["b0"])
        h1, c1 = cell(h0, h1, c1, p["wih1"], p["whh1"], p["b1"])
    return mm(h1, p["wfc"]) + p["bfc"]


if __name__ == "__main__":
    key = jax.random.PRNGKey(0)
    k_x, k_p = jax.random.split(key)

    B, T = 2, 8
    x = jax.random.normal(k_x, (B, T, INPUT_SIZE), jnp.float32)
    params = _init_params(k_p)

    out = lstm_stock_forward(x, params)
    out = jax.block_until_ready(out)

    # Tight check against a reference with matched numerics (bf16 matmul
    # operands, f32 accumulation) ...
    ref_bf16 = _reference_forward(x, params, matmul_dtype=jnp.bfloat16)
    np.testing.assert_allclose(np.asarray(out), np.asarray(ref_bf16),
                               rtol=1e-3, atol=1e-3)
    # ... and a loose sanity check against the exact f32 module semantics.
    ref_f32 = _reference_forward(x, params, matmul_dtype=jnp.float32)
    np.testing.assert_allclose(np.asarray(out), np.asarray(ref_f32),
                               rtol=5e-2, atol=5e-2)

    print("KERNEL_OK")
</pallas_src>

<mosaic_0001>
module attributes {stable_mosaic.version = 11 : i64} {
  func.func @_lstm_fc_kernel(%arg0: i32, %arg1: memref<8x8x5xf32, #tpu.memory_space<vmem>>, %arg2: memref<5x512xbf16, #tpu.memory_space<vmem>>, %arg3: memref<128x512xbf16, #tpu.memory_space<vmem>>, %arg4: memref<1x512xf32, #tpu.memory_space<vmem>>, %arg5: memref<128x512xbf16, #tpu.memory_space<vmem>>, %arg6: memref<128x512xbf16, #tpu.memory_space<vmem>>, %arg7: memref<1x512xf32, #tpu.memory_space<vmem>>, %arg8: memref<128x128xbf16, #tpu.memory_space<vmem>>, %arg9: memref<1x128xf32, #tpu.memory_space<vmem>>, %arg10: memref<8x128xf32, #tpu.memory_space<vmem>>, %arg11: memref<8x8x512xf32, #tpu.memory_space<vmem>>) attributes {dimension_semantics = [#tpu.dimension_semantics<parallel>], iteration_bounds = array<i64: 1>, scalar_prefetch = 0 : i64, scratch_operands = 1 : i64, tpu.core_type = #tpu.core_type<tc>, window_params = [{transform_indices = @transform_0, window_bounds = array<i64: 8, 8, 5>}, {pipeline_mode = #tpu.pipeline_mode<synchronous>, transform_indices = @transform_1, window_bounds = array<i64: 5, 512>}, {pipeline_mode = #tpu.pipeline_mode<synchronous>, transform_indices = @transform_2, window_bounds = array<i64: 128, 512>}, {pipeline_mode = #tpu.pipeline_mode<synchronous>, transform_indices = @transform_3, window_bounds = array<i64: 1, 512>}, {pipeline_mode = #tpu.pipeline_mode<synchronous>, transform_indices = @transform_4, window_bounds = array<i64: 128, 512>}, {pipeline_mode = #tpu.pipeline_mode<synchronous>, transform_indices = @transform_5, window_bounds = array<i64: 128, 512>}, {pipeline_mode = #tpu.pipeline_mode<synchronous>, transform_indices = @transform_6, window_bounds = array<i64: 1, 512>}, {pipeline_mode = #tpu.pipeline_mode<synchronous>, transform_indices = @transform_7, window_bounds = array<i64: 128, 128>}, {pipeline_mode = #tpu.pipeline_mode<synchronous>, transform_indices = @transform_8, window_bounds = array<i64: 1, 128>}, {transform_indices = @transform_9, window_bounds = array<i64: 8, 128>}]} {
    %c0 = arith.constant 0 : index
    %c0_0 = arith.constant 0 : index
    %c0_1 = arith.constant 0 : index
    %0 = vector.load %arg1[%c0, %c0_0, %c0_1] : memref<8x8x5xf32, #tpu.memory_space<vmem>>, vector<8x8x5xf32>
    %1 = arith.truncf %0 : vector<8x8x5xf32> to vector<8x8x5xbf16>
    %2 = vector.shape_cast %1 : vector<8x8x5xbf16> to vector<64x5xbf16>
    %c0_2 = arith.constant 0 : index
    %c0_3 = arith.constant 0 : index
    %3 = vector.load %arg2[%c0_2, %c0_3] : memref<5x512xbf16, #tpu.memory_space<vmem>>, vector<5x512xbf16>
    %cst = arith.constant dense<0.000000e+00> : vector<64x512xf32>
    %4 = tpu.matmul %2, %3, %cst {dimension_numbers = #tpu.dot_dimension_numbers<[1], [0], [0], [1], [0, 0, 1, 1], [], []>} : vector<64x5xbf16>, vector<5x512xbf16>, vector<64x512xf32> -> vector<64x512xf32>
    %c0_4 = arith.constant 0 : index
    %c0_5 = arith.constant 0 : index
    %5 = vector.load %arg4[%c0_4, %c0_5] : memref<1x512xf32, #tpu.memory_space<vmem>>, vector<1x512xf32>
    %6 = vector.broadcast %5 : vector<1x512xf32> to vector<64x512xf32>
    %7 = arith.addf %4, %6 : vector<64x512xf32>
    %8 = vector.shape_cast %7 : vector<64x512xf32> to vector<8x8x512xf32>
    %c0_6 = arith.constant 0 : index
    %c0_7 = arith.constant 0 : index
    %c0_8 = arith.constant 0 : index
    %9 = vector.load %arg11[%c0_6, %c0_7, %c0_8] : memref<8x8x512xf32, #tpu.memory_space<vmem>>, vector<8x8x512xf32>
    tpu.vector_store %arg11[%c0_6, %c0_7, %c0_8], %8 {strides = array<i32>} : memref<8x8x512xf32, #tpu.memory_space<vmem>>, vector<8x8x512xf32>,
    %c0_9 = arith.constant 0 : index
    %c0_10 = arith.constant 0 : index
    %10 = vector.load %arg3[%c0_9, %c0_10] : memref<128x512xbf16, #tpu.memory_space<vmem>>, vector<128x512xbf16>
    %c0_11 = arith.constant 0 : index
    %c0_12 = arith.constant 0 : index
    %11 = vector.load %arg5[%c0_11, %c0_12] : memref<128x512xbf16, #tpu.memory_space<vmem>>, vector<128x512xbf16>
    %c0_13 = arith.constant 0 : index
    %c0_14 = arith.constant 0 : index
    %12 = vector.load %arg6[%c0_13, %c0_14] : memref<128x512xbf16, #tpu.memory_space<vmem>>, vector<128x512xbf16>
    %c0_15 = arith.constant 0 : index
    %c0_16 = arith.constant 0 : index
    %13 = vector.load %arg7[%c0_15, %c0_16] : memref<1x512xf32, #tpu.memory_space<vmem>>, vector<1x512xf32>
    %14 = vector.shape_cast %13 : vector<1x512xf32> to vector<1x512xf32>
    %15 = vector.broadcast %14 : vector<1x512xf32> to vector<8x512xf32>
    %cst_17 = arith.constant 0.000000e+00 : f32
    %16 = vector.broadcast %cst_17 : f32 to vector<8x128xf32>
    %c0_i32 = arith.constant 0 : i32
    %17 = arith.index_cast %c0_i32 : i32 to index
    %c0_18 = arith.constant 0 : index
    %c0_19 = arith.constant 0 : index
    %18 = vector.load %arg11[%17, %c0_18, %c0_19] : memref<8x8x512xf32, #tpu.memory_space<vmem>>, vector<1x8x512xf32>
    %19 = vector.shape_cast %18 : vector<1x8x512xf32> to vector<8x512xf32>
    %20 = arith.truncf %16 : vector<8x128xf32> to vector<8x128xbf16>
    %cst_20 = arith.constant dense<0.000000e+00> : vector<8x512xf32>
    %21 = tpu.matmul %20, %10, %cst_20 {dimension_numbers = #tpu.dot_dimension_numbers<[1], [0], [0], [1], [0, 0, 1, 1], [], []>} : vector<8x128xbf16>, vector<128x512xbf16>, vector<8x512xf32> -> vector<8x512xf32>
    %22 = arith.addf %19, %21 : vector<8x512xf32>
    %23 = arith.truncf %16 : vector<8x128xf32> to vector<8x128xbf16>
    %cst_21 = arith.constant dense<0.000000e+00> : vector<8x512xf32>
    %24 = tpu.matmul %23, %12, %cst_21 {dimension_numbers = #tpu.dot_dimension_numbers<[1], [0], [0], [1], [0, 0, 1, 1], [], []>} : vector<8x128xbf16>, vector<128x512xbf16>, vector<8x512xf32> -> vector<8x512xf32>
    %25 = arith.addf %24, %15 : vector<8x512xf32>
    %26 = vector.extract_strided_slice %22 {offsets = [0, 0], sizes = [8, 128], strides = [1, 1]} : vector<8x512xf32> to vector<8x128xf32>
    %27 = arith.negf %26 : vector<8x128xf32>
    %28 = math.exp %27 : vector<8x128xf32>
    %cst_22 = arith.constant 1.000000e+00 : f32
    %29 = vector.broadcast %cst_22 : f32 to vector<8x128xf32>
    %30 = arith.addf %29, %28 : vector<8x128xf32>
    %31 = arith.divf %29, %30 : vector<8x128xf32>
    %32 = vector.extract_strided_slice %22 {offsets = [0, 128], sizes = [8, 128], strides = [1, 1]} : vector<8x512xf32> to vector<8x128xf32>
    %33 = arith.negf %32 : vector<8x128xf32>
    %34 = math.exp %33 : vector<8x128xf32>
    %cst_23 = arith.constant 1.000000e+00 : f32
    %35 = vector.broadcast %cst_23 : f32 to vector<8x128xf32>
    %36 = arith.addf %35, %34 : vector<8x128xf32>
    %37 = arith.divf %35, %36 : vector<8x128xf32>
    %38 = vector.extract_strided_slice %22 {offsets = [0, 256], sizes = [8, 128], strides = [1, 1]} : vector<8x512xf32> to vector<8x128xf32>
    %39 = math.tanh %38 : vector<8x128xf32>
    %40 = vector.extract_strided_slice %22 {offsets = [0, 384], sizes = [8, 128], strides = [1, 1]} : vector<8x512xf32> to vector<8x128xf32>
    %41 = arith.negf %40 : vector<8x128xf32>
    %42 = math.exp %41 : vector<8x128xf32>
    %cst_24 = arith.constant 1.000000e+00 : f32
    %43 = vector.broadcast %cst_24 : f32 to vector<8x128xf32>
    %44 = arith.addf %43, %42 : vector<8x128xf32>
    %45 = arith.divf %43, %44 : vector<8x128xf32>
    %46 = arith.mulf %37, %16 : vector<8x128xf32>
    %47 = arith.mulf %31, %39 : vector<8x128xf32>
    %48 = arith.addf %46, %47 : vector<8x128xf32>
    %49 = math.tanh %48 : vector<8x128xf32>
    %50 = arith.mulf %45, %49 : vector<8x128xf32>
    %51 = arith.truncf %50 : vector<8x128xf32> to vector<8x128xbf16>
    %cst_25 = arith.constant dense<0.000000e+00> : vector<8x512xf32>
    %52 = tpu.matmul %51, %11, %cst_25 {dimension_numbers = #tpu.dot_dimension_numbers<[1], [0], [0], [1], [0, 0, 1, 1], [], []>} : vector<8x128xbf16>, vector<128x512xbf16>, vector<8x512xf32> -> vector<8x512xf32>
    %53 = arith.addf %25, %52 : vector<8x512xf32>
    %54 = vector.extract_strided_slice %53 {offsets = [0, 0], sizes = [8, 128], strides = [1, 1]} : vector<8x512xf32> to vector<8x128xf32>
    %55 = arith.negf %54 : vector<8x128xf32>
    %56 = math.exp %55 : vector<8x128xf32>
    %cst_26 = arith.constant 1.000000e+00 : f32
    %57 = vector.broadcast %cst_26 : f32 to vector<8x128xf32>
    %58 = arith.addf %57, %56 : vector<8x128xf32>
    %59 = arith.divf %57, %58 : vector<8x128xf32>
    %60 = vector.extract_strided_slice %53 {offsets = [0, 128], sizes = [8, 128], strides = [1, 1]} : vector<8x512xf32> to vector<8x128xf32>
    %61 = arith.negf %60 : vector<8x128xf32>
    %62 = math.exp %61 : vector<8x128xf32>
    %cst_27 = arith.constant 1.000000e+00 : f32
    %63 = vector.broadcast %cst_27 : f32 to vector<8x128xf32>
    %64 = arith.addf %63, %62 : vector<8x128xf32>
    %65 = arith.divf %63, %64 : vector<8x128xf32>
    %66 = vector.extract_strided_slice %53 {offsets = [0, 256], sizes = [8, 128], strides = [1, 1]} : vector<8x512xf32> to vector<8x128xf32>
    %67 = math.tanh %66 : vector<8x128xf32>
    %68 = vector.extract_strided_slice %53 {offsets = [0, 384], sizes = [8, 128], strides = [1, 1]} : vector<8x512xf32> to vector<8x128xf32>
    %69 = arith.negf %68 : vector<8x128xf32>
    %70 = math.exp %69 : vector<8x128xf32>
    %cst_28 = arith.constant 1.000000e+00 : f32
    %71 = vector.broadcast %cst_28 : f32 to vector<8x128xf32>
    %72 = arith.addf %71, %70 : vector<8x128xf32>
    %73 = arith.divf %71, %72 : vector<8x128xf32>
    %74 = arith.mulf %65, %16 : vector<8x128xf32>
    %75 = arith.mulf %59, %67 : vector<8x128xf32>
    %76 = arith.addf %74, %75 : vector<8x128xf32>
    %77 = math.tanh %76 : vector<8x128xf32>
    %78 = arith.mulf %73, %77 : vector<8x128xf32>
    %c1_i32 = arith.constant 1 : i32
    %79 = arith.index_cast %c1_i32 : i32 to index
    %c0_29 = arith.constant 0 : index
    %c0_30 = arith.constant 0 : index
    %80 = vector.load %arg11[%79, %c0_29, %c0_30] : memref<8x8x512xf32, #tpu.memory_space<vmem>>, vector<1x8x512xf32>
    %81 = vector.shape_cast %80 : vector<1x8x512xf32> to vector<8x512xf32>
    %82 = arith.truncf %50 : vector<8x128xf32> to vector<8x128xbf16>
    %cst_31 = arith.constant dense<0.000000e+00> : vector<8x512xf32>
    %83 = tpu.matmul %82, %10, %cst_31 {dimension_numbers = #tpu.dot_dimension_numbers<[1], [0], [0], [1], [0, 0, 1, 1], [], []>} : vector<8x128xbf16>, vector<128x512xbf16>, vector<8x512xf32> -> vector<8x512xf32>
    %84 = arith.addf %81, %83 : vector<8x512xf32>
    %85 = arith.truncf %78 : vector<8x128xf32> to vector<8x128xbf16>
    %cst_32 = arith.constant dense<0.000000e+00> : vector<8x512xf32>
    %86 = tpu.matmul %85, %12, %cst_32 {dimension_numbers = #tpu.dot_dimension_numbers<[1], [0], [0], [1], [0, 0, 1, 1], [], []>} : vector<8x128xbf16>, vector<128x512xbf16>, vector<8x512xf32> -> vector<8x512xf32>
    %87 = arith.addf %86, %15 : vector<8x512xf32>
    %88 = vector.extract_strided_slice %84 {offsets = [0, 0], sizes = [8, 128], strides = [1, 1]} : vector<8x512xf32> to vector<8x128xf32>
    %89 = arith.negf %88 : vector<8x128xf32>
    %90 = math.exp %89 : vector<8x128xf32>
    %cst_33 = arith.constant 1.000000e+00 : f32
    %91 = vector.broadcast %cst_33 : f32 to vector<8x128xf32>
    %92 = arith.addf %91, %90 : vector<8x128xf32>
    %93 = arith.divf %91, %92 : vector<8x128xf32>
    %94 = vector.extract_strided_slice %84 {offsets = [0, 128], sizes = [8, 128], strides = [1, 1]} : vector<8x512xf32> to vector<8x128xf32>
    %95 = arith.negf %94 : vector<8x128xf32>
    %96 = math.exp %95 : vector<8x128xf32>
    %cst_34 = arith.constant 1.000000e+00 : f32
    %97 = vector.broadcast %cst_34 : f32 to vector<8x128xf32>
    %98 = arith.addf %97, %96 : vector<8x128xf32>
    %99 = arith.divf %97, %98 : vector<8x128xf32>
    %100 = vector.extract_strided_slice %84 {offsets = [0, 256], sizes = [8, 128], strides = [1, 1]} : vector<8x512xf32> to vector<8x128xf32>
    %101 = math.tanh %100 : vector<8x128xf32>
    %102 = vector.extract_strided_slice %84 {offsets = [0, 384], sizes = [8, 128], strides = [1, 1]} : vector<8x512xf32> to vector<8x128xf32>
    %103 = arith.negf %102 : vector<8x128xf32>
    %104 = math.exp %103 : vector<8x128xf32>
    %cst_35 = arith.constant 1.000000e+00 : f32
    %105 = vector.broadcast %cst_35 : f32 to vector<8x128xf32>
    %106 = arith.addf %105, %104 : vector<8x128xf32>
    %107 = arith.divf %105, %106 : vector<8x128xf32>
    %108 = arith.mulf %99, %48 : vector<8x128xf32>
    %109 = arith.mulf %93, %101 : vector<8x128xf32>
    %110 = arith.addf %108, %109 : vector<8x128xf32>
    %111 = math.tanh %110 : vector<8x128xf32>
    %112 = arith.mulf %107, %111 : vector<8x128xf32>
    %113 = arith.truncf %112 : vector<8x128xf32> to vector<8x128xbf16>
    %cst_36 = arith.constant dense<0.000000e+00> : vector<8x512xf32>
    %114 = tpu.matmul %113, %11, %cst_36 {dimension_numbers = #tpu.dot_dimension_numbers<[1], [0], [0], [1], [0, 0, 1, 1], [], []>} : vector<8x128xbf16>, vector<128x512xbf16>, vector<8x512xf32> -> vector<8x512xf32>
    %115 = arith.addf %87, %114 : vector<8x512xf32>
    %116 = vector.extract_strided_slice %115 {offsets = [0, 0], sizes = [8, 128], strides = [1, 1]} : vector<8x512xf32> to vector<8x128xf32>
    %117 = arith.negf %116 : vector<8x128xf32>
    %118 = math.exp %117 : vector<8x128xf32>
    %cst_37 = arith.constant 1.000000e+00 : f32
    %119 = vector.broadcast %cst_37 : f32 to vector<8x128xf32>
    %120 = arith.addf %119, %118 : vector<8x128xf32>
    %121 = arith.divf %119, %120 : vector<8x128xf32>
    %122 = vector.extract_strided_slice %115 {offsets = [0, 128], sizes = [8, 128], strides = [1, 1]} : vector<8x512xf32> to vector<8x128xf32>
    %123 = arith.negf %122 : vector<8x128xf32>
    %124 = math.exp %123 : vector<8x128xf32>
    %cst_38 = arith.constant 1.000000e+00 : f32
    %125 = vector.broadcast %cst_38 : f32 to vector<8x128xf32>
    %126 = arith.addf %125, %124 : vector<8x128xf32>
    %127 = arith.divf %125, %126 : vector<8x128xf32>
    %128 = vector.extract_strided_slice %115 {offsets = [0, 256], sizes = [8, 128], strides = [1, 1]} : vector<8x512xf32> to vector<8x128xf32>
    %129 = math.tanh %128 : vector<8x128xf32>
    %130 = vector.extract_strided_slice %115 {offsets = [0, 384], sizes = [8, 128], strides = [1, 1]} : vector<8x512xf32> to vector<8x128xf32>
    %131 = arith.negf %130 : vector<8x128xf32>
    %132 = math.exp %131 : vector<8x128xf32>
    %cst_39 = arith.constant 1.000000e+00 : f32
    %133 = vector.broadcast %cst_39 : f32 to vector<8x128xf32>
    %134 = arith.addf %133, %132 : vector<8x128xf32>
    %135 = arith.divf %133, %134 : vector<8x128xf32>
    %136 = arith.mulf %127, %76 : vector<8x128xf32>
    %137 = arith.mulf %121, %129 : vector<8x128xf32>
    %138 = arith.addf %136, %137 : vector<8x128xf32>
    %139 = math.tanh %138 : vector<8x128xf32>
    %140 = arith.mulf %135, %139 : vector<8x128xf32>
    %c2_i32 = arith.constant 2 : i32
    %141 = arith.index_cast %c2_i32 : i32 to index
    %c0_40 = arith.constant 0 : index
    %c0_41 = arith.constant 0 : index
    %142 = vector.load %arg11[%141, %c0_40, %c0_41] : memref<8x8x512xf32, #tpu.memory_space<vmem>>, vector<1x8x512xf32>
    %143 = vector.shape_cast %142 : vector<1x8x512xf32> to vector<8x512xf32>
    %144 = arith.truncf %112 : vector<8x128xf32> to vector<8x128xbf16>
    %cst_42 = arith.constant dense<0.000000e+00> : vector<8x512xf32>
    %145 = tpu.matmul %144, %10, %cst_42 {dimension_numbers = #tpu.dot_dimension_numbers<[1], [0], [0], [1], [0, 0, 1, 1], [], []>} : vector<8x128xbf16>, vector<128x512xbf16>, vector<8x512xf32> -> vector<8x512xf32>
    %146 = arith.addf %143, %145 : vector<8x512xf32>
    %147 = arith.truncf %140 : vector<8x128xf32> to vector<8x128xbf16>
    %cst_43 = arith.constant dense<0.000000e+00> : vector<8x512xf32>
    %148 = tpu.matmul %147, %12, %cst_43 {dimension_numbers = #tpu.dot_dimension_numbers<[1], [0], [0], [1], [0, 0, 1, 1], [], []>} : vector<8x128xbf16>, vector<128x512xbf16>, vector<8x512xf32> -> vector<8x512xf32>
    %149 = arith.addf %148, %15 : vector<8x512xf32>
    %150 = vector.extract_strided_slice %146 {offsets = [0, 0], sizes = [8, 128], strides = [1, 1]} : vector<8x512xf32> to vector<8x128xf32>
    %151 = arith.negf %150 : vector<8x128xf32>
    %152 = math.exp %151 : vector<8x128xf32>
    %cst_44 = arith.constant 1.000000e+00 : f32
    %153 = vector.broadcast %cst_44 : f32 to vector<8x128xf32>
    %154 = arith.addf %153, %152 : vector<8x128xf32>
    %155 = arith.divf %153, %154 : vector<8x128xf32>
    %156 = vector.extract_strided_slice %146 {offsets = [0, 128], sizes = [8, 128], strides = [1, 1]} : vector<8x512xf32> to vector<8x128xf32>
    %157 = arith.negf %156 : vector<8x128xf32>
    %158 = math.exp %157 : vector<8x128xf32>
    %cst_45 = arith.constant 1.000000e+00 : f32
    %159 = vector.broadcast %cst_45 : f32 to vector<8x128xf32>
    %160 = arith.addf %159, %158 : vector<8x128xf32>
    %161 = arith.divf %159, %160 : vector<8x128xf32>
    %162 = vector.extract_strided_slice %146 {offsets = [0, 256], sizes = [8, 128], strides = [1, 1]} : vector<8x512xf32> to vector<8x128xf32>
    %163 = math.tanh %162 : vector<8x128xf32>
    %164 = vector.extract_strided_slice %146 {offsets = [0, 384], sizes = [8, 128], strides = [1, 1]} : vector<8x512xf32> to vector<8x128xf32>
    %165 = arith.negf %164 : vector<8x128xf32>
    %166 = math.exp %165 : vector<8x128xf32>
    %cst_46 = arith.constant 1.000000e+00 : f32
    %167 = vector.broadcast %cst_46 : f32 to vector<8x128xf32>
    %168 = arith.addf %167, %166 : vector<8x128xf32>
    %169 = arith.divf %167, %168 : vector<8x128xf32>
    %170 = arith.mulf %161, %110 : vector<8x128xf32>
    %171 = arith.mulf %155, %163 : vector<8x128xf32>
    %172 = arith.addf %170, %171 : vector<8x128xf32>
    %173 = math.tanh %172 : vector<8x128xf32>
    %174 = arith.mulf %169, %173 : vector<8x128xf32>
    %175 = arith.truncf %174 : vector<8x128xf32> to vector<8x128xbf16>
    %cst_47 = arith.constant dense<0.000000e+00> : vector<8x512xf32>
    %176 = tpu.matmul %175, %11, %cst_47 {dimension_numbers = #tpu.dot_dimension_numbers<[1], [0], [0], [1], [0, 0, 1, 1], [], []>} : vector<8x128xbf16>, vector<128x512xbf16>, vector<8x512xf32> -> vector<8x512xf32>
    %177 = arith.addf %149, %176 : vector<8x512xf32>
    %178 = vector.extract_strided_slice %177 {offsets = [0, 0], sizes = [8, 128], strides = [1, 1]} : vector<8x512xf32> to vector<8x128xf32>
    %179 = arith.negf %178 : vector<8x128xf32>
    %180 = math.exp %179 : vector<8x128xf32>
    %cst_48 = arith.constant 1.000000e+00 : f32
    %181 = vector.broadcast %cst_48 : f32 to vector<8x128xf32>
    %182 = arith.addf %181, %180 : vector<8x128xf32>
    %183 = arith.divf %181, %182 : vector<8x128xf32>
    %184 = vector.extract_strided_slice %177 {offsets = [0, 128], sizes = [8, 128], strides = [1, 1]} : vector<8x512xf32> to vector<8x128xf32>
    %185 = arith.negf %184 : vector<8x128xf32>
    %186 = math.exp %185 : vector<8x128xf32>
    %cst_49 = arith.constant 1.000000e+00 : f32
    %187 = vector.broadcast %cst_49 : f32 to vector<8x128xf32>
    %188 = arith.addf %187, %186 : vector<8x128xf32>
    %189 = arith.divf %187, %188 : vector<8x128xf32>
    %190 = vector.extract_strided_slice %177 {offsets = [0, 256], sizes = [8, 128], strides = [1, 1]} : vector<8x512xf32> to vector<8x128xf32>
    %191 = math.tanh %190 : vector<8x128xf32>
    %192 = vector.extract_strided_slice %177 {offsets = [0, 384], sizes = [8, 128], strides = [1, 1]} : vector<8x512xf32> to vector<8x128xf32>
    %193 = arith.negf %192 : vector<8x128xf32>
    %194 = math.exp %193 : vector<8x128xf32>
    %cst_50 = arith.constant 1.000000e+00 : f32
    %195 = vector.broadcast %cst_50 : f32 to vector<8x128xf32>
    %196 = arith.addf %195, %194 : vector<8x128xf32>
    %197 = arith.divf %195, %196 : vector<8x128xf32>
    %198 = arith.mulf %189, %138 : vector<8x128xf32>
    %199 = arith.mulf %183, %191 : vector<8x128xf32>
    %200 = arith.addf %198, %199 : vector<8x128xf32>
    %201 = math.tanh %200 : vector<8x128xf32>
    %202 = arith.mulf %197, %201 : vector<8x128xf32>
    %c3_i32 = arith.constant 3 : i32
    %203 = arith.index_cast %c3_i32 : i32 to index
    %c0_51 = arith.constant 0 : index
    %c0_52 = arith.constant 0 : index
    %204 = vector.load %arg11[%203, %c0_51, %c0_52] : memref<8x8x512xf32, #tpu.memory_space<vmem>>, vector<1x8x512xf32>
    %205 = vector.shape_cast %204 : vector<1x8x512xf32> to vector<8x512xf32>
    %206 = arith.truncf %174 : vector<8x128xf32> to vector<8x128xbf16>
    %cst_53 = arith.constant dense<0.000000e+00> : vector<8x512xf32>
    %207 = tpu.matmul %206, %10, %cst_53 {dimension_numbers = #tpu.dot_dimension_numbers<[1], [0], [0], [1], [0, 0, 1, 1], [], []>} : vector<8x128xbf16>, vector<128x512xbf16>, vector<8x512xf32> -> vector<8x512xf32>
    %208 = arith.addf %205, %207 : vector<8x512xf32>
    %209 = arith.truncf %202 : vector<8x128xf32> to vector<8x128xbf16>
    %cst_54 = arith.constant dense<0.000000e+00> : vector<8x512xf32>
    %210 = tpu.matmul %209, %12, %cst_54 {dimension_numbers = #tpu.dot_dimension_numbers<[1], [0], [0], [1], [0, 0, 1, 1], [], []>} : vector<8x128xbf16>, vector<128x512xbf16>, vector<8x512xf32> -> vector<8x512xf32>
    %211 = arith.addf %210, %15 : vector<8x512xf32>
    %212 = vector.extract_strided_slice %208 {offsets = [0, 0], sizes = [8, 128], strides = [1, 1]} : vector<8x512xf32> to vector<8x128xf32>
    %213 = arith.negf %212 : vector<8x128xf32>
    %214 = math.exp %213 : vector<8x128xf32>
    %cst_55 = arith.constant 1.000000e+00 : f32
    %215 = vector.broadcast %cst_55 : f32 to vector<8x128xf32>
    %216 = arith.addf %215, %214 : vector<8x128xf32>
    %217 = arith.divf %215, %216 : vector<8x128xf32>
    %218 = vector.extract_strided_slice %208 {offsets = [0, 128], sizes = [8, 128], strides = [1, 1]} : vector<8x512xf32> to vector<8x128xf32>
    %219 = arith.negf %218 : vector<8x128xf32>
    %220 = math.exp %219 : vector<8x128xf32>
    %cst_56 = arith.constant 1.000000e+00 : f32
    %221 = vector.broadcast %cst_56 : f32 to vector<8x128xf32>
    %222 = arith.addf %221, %220 : vector<8x128xf32>
    %223 = arith.divf %221, %222 : vector<8x128xf32>
    %224 = vector.extract_strided_slice %208 {offsets = [0, 256], sizes = [8, 128], strides = [1, 1]} : vector<8x512xf32> to vector<8x128xf32>
    %225 = math.tanh %224 : vector<8x128xf32>
    %226 = vector.extract_strided_slice %208 {offsets = [0, 384], sizes = [8, 128], strides = [1, 1]} : vector<8x512xf32> to vector<8x128xf32>
    %227 = arith.negf %226 : vector<8x128xf32>
    %228 = math.exp %227 : vector<8x128xf32>
    %cst_57 = arith.constant 1.000000e+00 : f32
    %229 = vector.broadcast %cst_57 : f32 to vector<8x128xf32>
    %230 = arith.addf %229, %228 : vector<8x128xf32>
    %231 = arith.divf %229, %230 : vector<8x128xf32>
    %232 = arith.mulf %223, %172 : vector<8x128xf32>
    %233 = arith.mulf %217, %225 : vector<8x128xf32>
    %234 = arith.addf %232, %233 : vector<8x128xf32>
    %235 = math.tanh %234 : vector<8x128xf32>
    %236 = arith.mulf %231, %235 : vector<8x128xf32>
    %237 = arith.truncf %236 : vector<8x128xf32> to vector<8x128xbf16>
    %cst_58 = arith.constant dense<0.000000e+00> : vector<8x512xf32>
    %238 = tpu.matmul %237, %11, %cst_58 {dimension_numbers = #tpu.dot_dimension_numbers<[1], [0], [0], [1], [0, 0, 1, 1], [], []>} : vector<8x128xbf16>, vector<128x512xbf16>, vector<8x512xf32> -> vector<8x512xf32>
    %239 = arith.addf %211, %238 : vector<8x512xf32>
    %240 = vector.extract_strided_slice %239 {offsets = [0, 0], sizes = [8, 128], strides = [1, 1]} : vector<8x512xf32> to vector<8x128xf32>
    %241 = arith.negf %240 : vector<8x128xf32>
    %242 = math.exp %241 : vector<8x128xf32>
    %cst_59 = arith.constant 1.000000e+00 : f32
    %243 = vector.broadcast %cst_59 : f32 to vector<8x128xf32>
    %244 = arith.addf %243, %242 : vector<8x128xf32>
    %245 = arith.divf %243, %244 : vector<8x128xf32>
    %246 = vector.extract_strided_slice %239 {offsets = [0, 128], sizes = [8, 128], strides = [1, 1]} : vector<8x512xf32> to vector<8x128xf32>
    %247 = arith.negf %246 : vector<8x128xf32>
    %248 = math.exp %247 : vector<8x128xf32>
    %cst_60 = arith.constant 1.000000e+00 : f32
    %249 = vector.broadcast %cst_60 : f32 to vector<8x128xf32>
    %250 = arith.addf %249, %248 : vector<8x128xf32>
    %251 = arith.divf %249, %250 : vector<8x128xf32>
    %252 = vector.extract_strided_slice %239 {offsets = [0, 256], sizes = [8, 128], strides = [1, 1]} : vector<8x512xf32> to vector<8x128xf32>
    %253 = math.tanh %252 : vector<8x128xf32>
    %254 = vector.extract_strided_slice %239 {offsets = [0, 384], sizes = [8, 128], strides = [1, 1]} : vector<8x512xf32> to vector<8x128xf32>
    %255 = arith.negf %254 : vector<8x128xf32>
    %256 = math.exp %255 : vector<8x128xf32>
    %cst_61 = arith.constant 1.000000e+00 : f32
    %257 = vector.broadcast %cst_61 : f32 to vector<8x128xf32>
    %258 = arith.addf %257, %256 : vector<8x128xf32>
    %259 = arith.divf %257, %258 : vector<8x128xf32>
    %260 = arith.mulf %251, %200 : vector<8x128xf32>
    %261 = arith.mulf %245, %253 : vector<8x128xf32>
    %262 = arith.addf %260, %261 : vector<8x128xf32>
    %263 = math.tanh %262 : vector<8x128xf32>
    %264 = arith.mulf %259, %263 : vector<8x128xf32>
    %c4_i32 = arith.constant 4 : i32
    %265 = arith.index_cast %c4_i32 : i32 to index
    %c0_62 = arith.constant 0 : index
    %c0_63 = arith.constant 0 : index
    %266 = vector.load %arg11[%265, %c0_62, %c0_63] : memref<8x8x512xf32, #tpu.memory_space<vmem>>, vector<1x8x512xf32>
    %267 = vector.shape_cast %266 : vector<1x8x512xf32> to vector<8x512xf32>
    %268 = arith.truncf %236 : vector<8x128xf32> to vector<8x128xbf16>
    %cst_64 = arith.constant dense<0.000000e+00> : vector<8x512xf32>
    %269 = tpu.matmul %268, %10, %cst_64 {dimension_numbers = #tpu.dot_dimension_numbers<[1], [0], [0], [1], [0, 0, 1, 1], [], []>} : vector<8x128xbf16>, vector<128x512xbf16>, vector<8x512xf32> -> vector<8x512xf32>
    %270 = arith.addf %267, %269 : vector<8x512xf32>
    %271 = arith.truncf %264 : vector<8x128xf32> to vector<8x128xbf16>
    %cst_65 = arith.constant dense<0.000000e+00> : vector<8x512xf32>
    %272 = tpu.matmul %271, %12, %cst_65 {dimension_numbers = #tpu.dot_dimension_numbers<[1], [0], [0], [1], [0, 0, 1, 1], [], []>} : vector<8x128xbf16>, vector<128x512xbf16>, vector<8x512xf32> -> vector<8x512xf32>
    %273 = arith.addf %272, %15 : vector<8x512xf32>
    %274 = vector.extract_strided_slice %270 {offsets = [0, 0], sizes = [8, 128], strides = [1, 1]} : vector<8x512xf32> to vector<8x128xf32>
    %275 = arith.negf %274 : vector<8x128xf32>
    %276 = math.exp %275 : vector<8x128xf32>
    %cst_66 = arith.constant 1.000000e+00 : f32
    %277 = vector.broadcast %cst_66 : f32 to vector<8x128xf32>
    %278 = arith.addf %277, %276 : vector<8x128xf32>
    %279 = arith.divf %277, %278 : vector<8x128xf32>
    %280 = vector.extract_strided_slice %270 {offsets = [0, 128], sizes = [8, 128], strides = [1, 1]} : vector<8x512xf32> to vector<8x128xf32>
    %281 = arith.negf %280 : vector<8x128xf32>
    %282 = math.exp %281 : vector<8x128xf32>
    %cst_67 = arith.constant 1.000000e+00 : f32
    %283 = vector.broadcast %cst_67 : f32 to vector<8x128xf32>
    %284 = arith.addf %283, %282 : vector<8x128xf32>
    %285 = arith.divf %283, %284 : vector<8x128xf32>
    %286 = vector.extract_strided_slice %270 {offsets = [0, 256], sizes = [8, 128], strides = [1, 1]} : vector<8x512xf32> to vector<8x128xf32>
    %287 = math.tanh %286 : vector<8x128xf32>
    %288 = vector.extract_strided_slice %270 {offsets = [0, 384], sizes = [8, 128], strides = [1, 1]} : vector<8x512xf32> to vector<8x128xf32>
    %289 = arith.negf %288 : vector<8x128xf32>
    %290 = math.exp %289 : vector<8x128xf32>
    %cst_68 = arith.constant 1.000000e+00 : f32
    %291 = vector.broadcast %cst_68 : f32 to vector<8x128xf32>
    %292 = arith.addf %291, %290 : vector<8x128xf32>
    %293 = arith.divf %291, %292 : vector<8x128xf32>
    %294 = arith.mulf %285, %234 : vector<8x128xf32>
    %295 = arith.mulf %279, %287 : vector<8x128xf32>
    %296 = arith.addf %294, %295 : vector<8x128xf32>
    %297 = math.tanh %296 : vector<8x128xf32>
    %298 = arith.mulf %293, %297 : vector<8x128xf32>
    %299 = arith.truncf %298 : vector<8x128xf32> to vector<8x128xbf16>
    %cst_69 = arith.constant dense<0.000000e+00> : vector<8x512xf32>
    %300 = tpu.matmul %299, %11, %cst_69 {dimension_numbers = #tpu.dot_dimension_numbers<[1], [0], [0], [1], [0, 0, 1, 1], [], []>} : vector<8x128xbf16>, vector<128x512xbf16>, vector<8x512xf32> -> vector<8x512xf32>
    %301 = arith.addf %273, %300 : vector<8x512xf32>
    %302 = vector.extract_strided_slice %301 {offsets = [0, 0], sizes = [8, 128], strides = [1, 1]} : vector<8x512xf32> to vector<8x128xf32>
    %303 = arith.negf %302 : vector<8x128xf32>
    %304 = math.exp %303 : vector<8x128xf32>
    %cst_70 = arith.constant 1.000000e+00 : f32
    %305 = vector.broadcast %cst_70 : f32 to vector<8x128xf32>
    %306 = arith.addf %305, %304 : vector<8x128xf32>
    %307 = arith.divf %305, %306 : vector<8x128xf32>
    %308 = vector.extract_strided_slice %301 {offsets = [0, 128], sizes = [8, 128], strides = [1, 1]} : vector<8x512xf32> to vector<8x128xf32>
    %309 = arith.negf %308 : vector<8x128xf32>
    %310 = math.exp %309 : vector<8x128xf32>
    %cst_71 = arith.constant 1.000000e+00 : f32
    %311 = vector.broadcast %cst_71 : f32 to vector<8x128xf32>
    %312 = arith.addf %311, %310 : vector<8x128xf32>
    %313 = arith.divf %311, %312 : vector<8x128xf32>
    %314 = vector.extract_strided_slice %301 {offsets = [0, 256], sizes = [8, 128], strides = [1, 1]} : vector<8x512xf32> to vector<8x128xf32>
    %315 = math.tanh %314 : vector<8x128xf32>
    %316 = vector.extract_strided_slice %301 {offsets = [0, 384], sizes = [8, 128], strides = [1, 1]} : vector<8x512xf32> to vector<8x128xf32>
    %317 = arith.negf %316 : vector<8x128xf32>
    %318 = math.exp %317 : vector<8x128xf32>
    %cst_72 = arith.constant 1.000000e+00 : f32
    %319 = vector.broadcast %cst_72 : f32 to vector<8x128xf32>
    %320 = arith.addf %319, %318 : vector<8x128xf32>
    %321 = arith.divf %319, %320 : vector<8x128xf32>
    %322 = arith.mulf %313, %262 : vector<8x128xf32>
    %323 = arith.mulf %307, %315 : vector<8x128xf32>
    %324 = arith.addf %322, %323 : vector<8x128xf32>
    %325 = math.tanh %324 : vector<8x128xf32>
    %326 = arith.mulf %321, %325 : vector<8x128xf32>
    %c5_i32 = arith.constant 5 : i32
    %327 = arith.index_cast %c5_i32 : i32 to index
    %c0_73 = arith.constant 0 : index
    %c0_74 = arith.constant 0 : index
    %328 = vector.load %arg11[%327, %c0_73, %c0_74] : memref<8x8x512xf32, #tpu.memory_space<vmem>>, vector<1x8x512xf32>
    %329 = vector.shape_cast %328 : vector<1x8x512xf32> to vector<8x512xf32>
    %330 = arith.truncf %298 : vector<8x128xf32> to vector<8x128xbf16>
    %cst_75 = arith.constant dense<0.000000e+00> : vector<8x512xf32>
    %331 = tpu.matmul %330, %10, %cst_75 {dimension_numbers = #tpu.dot_dimension_numbers<[1], [0], [0], [1], [0, 0, 1, 1], [], []>} : vector<8x128xbf16>, vector<128x512xbf16>, vector<8x512xf32> -> vector<8x512xf32>
    %332 = arith.addf %329, %331 : vector<8x512xf32>
    %333 = arith.truncf %326 : vector<8x128xf32> to vector<8x128xbf16>
    %cst_76 = arith.constant dense<0.000000e+00> : vector<8x512xf32>
    %334 = tpu.matmul %333, %12, %cst_76 {dimension_numbers = #tpu.dot_dimension_numbers<[1], [0], [0], [1], [0, 0, 1, 1], [], []>} : vector<8x128xbf16>, vector<128x512xbf16>, vector<8x512xf32> -> vector<8x512xf32>
    %335 = arith.addf %334, %15 : vector<8x512xf32>
    %336 = vector.extract_strided_slice %332 {offsets = [0, 0], sizes = [8, 128], strides = [1, 1]} : vector<8x512xf32> to vector<8x128xf32>
    %337 = arith.negf %336 : vector<8x128xf32>
    %338 = math.exp %337 : vector<8x128xf32>
    %cst_77 = arith.constant 1.000000e+00 : f32
    %339 = vector.broadcast %cst_77 : f32 to vector<8x128xf32>
    %340 = arith.addf %339, %338 : vector<8x128xf32>
    %341 = arith.divf %339, %340 : vector<8x128xf32>
    %342 = vector.extract_strided_slice %332 {offsets = [0, 128], sizes = [8, 128], strides = [1, 1]} : vector<8x512xf32> to vector<8x128xf32>
    %343 = arith.negf %342 : vector<8x128xf32>
    %344 = math.exp %343 : vector<8x128xf32>
    %cst_78 = arith.constant 1.000000e+00 : f32
    %345 = vector.broadcast %cst_78 : f32 to vector<8x128xf32>
    %346 = arith.addf %345, %344 : vector<8x128xf32>
    %347 = arith.divf %345, %346 : vector<8x128xf32>
    %348 = vector.extract_strided_slice %332 {offsets = [0, 256], sizes = [8, 128], strides = [1, 1]} : vector<8x512xf32> to vector<8x128xf32>
    %349 = math.tanh %348 : vector<8x128xf32>
    %350 = vector.extract_strided_slice %332 {offsets = [0, 384], sizes = [8, 128], strides = [1, 1]} : vector<8x512xf32> to vector<8x128xf32>
    %351 = arith.negf %350 : vector<8x128xf32>
    %352 = math.exp %351 : vector<8x128xf32>
    %cst_79 = arith.constant 1.000000e+00 : f32
    %353 = vector.broadcast %cst_79 : f32 to vector<8x128xf32>
    %354 = arith.addf %353, %352 : vector<8x128xf32>
    %355 = arith.divf %353, %354 : vector<8x128xf32>
    %356 = arith.mulf %347, %296 : vector<8x128xf32>
    %357 = arith.mulf %341, %349 : vector<8x128xf32>
    %358 = arith.addf %356, %357 : vector<8x128xf32>
    %359 = math.tanh %358 : vector<8x128xf32>
    %360 = arith.mulf %355, %359 : vector<8x128xf32>
    %361 = arith.truncf %360 : vector<8x128xf32> to vector<8x128xbf16>
    %cst_80 = arith.constant dense<0.000000e+00> : vector<8x512xf32>
    %362 = tpu.matmul %361, %11, %cst_80 {dimension_numbers = #tpu.dot_dimension_numbers<[1], [0], [0], [1], [0, 0, 1, 1], [], []>} : vector<8x128xbf16>, vector<128x512xbf16>, vector<8x512xf32> -> vector<8x512xf32>
    %363 = arith.addf %335, %362 : vector<8x512xf32>
    %364 = vector.extract_strided_slice %363 {offsets = [0, 0], sizes = [8, 128], strides = [1, 1]} : vector<8x512xf32> to vector<8x128xf32>
    %365 = arith.negf %364 : vector<8x128xf32>
    %366 = math.exp %365 : vector<8x128xf32>
    %cst_81 = arith.constant 1.000000e+00 : f32
    %367 = vector.broadcast %cst_81 : f32 to vector<8x128xf32>
    %368 = arith.addf %367, %366 : vector<8x128xf32>
    %369 = arith.divf %367, %368 : vector<8x128xf32>
    %370 = vector.extract_strided_slice %363 {offsets = [0, 128], sizes = [8, 128], strides = [1, 1]} : vector<8x512xf32> to vector<8x128xf32>
    %371 = arith.negf %370 : vector<8x128xf32>
    %372 = math.exp %371 : vector<8x128xf32>
    %cst_82 = arith.constant 1.000000e+00 : f32
    %373 = vector.broadcast %cst_82 : f32 to vector<8x128xf32>
    %374 = arith.addf %373, %372 : vector<8x128xf32>
    %375 = arith.divf %373, %374 : vector<8x128xf32>
    %376 = vector.extract_strided_slice %363 {offsets = [0, 256], sizes = [8, 128], strides = [1, 1]} : vector<8x512xf32> to vector<8x128xf32>
    %377 = math.tanh %376 : vector<8x128xf32>
    %378 = vector.extract_strided_slice %363 {offsets = [0, 384], sizes = [8, 128], strides = [1, 1]} : vector<8x512xf32> to vector<8x128xf32>
    %379 = arith.negf %378 : vector<8x128xf32>
    %380 = math.exp %379 : vector<8x128xf32>
    %cst_83 = arith.constant 1.000000e+00 : f32
    %381 = vector.broadcast %cst_83 : f32 to vector<8x128xf32>
    %382 = arith.addf %381, %380 : vector<8x128xf32>
    %383 = arith.divf %381, %382 : vector<8x128xf32>
    %384 = arith.mulf %375, %324 : vector<8x128xf32>
    %385 = arith.mulf %369, %377 : vector<8x128xf32>
    %386 = arith.addf %384, %385 : vector<8x128xf32>
    %387 = math.tanh %386 : vector<8x128xf32>
    %388 = arith.mulf %383, %387 : vector<8x128xf32>
    %c6_i32 = arith.constant 6 : i32
    %389 = arith.index_cast %c6_i32 : i32 to index
    %c0_84 = arith.constant 0 : index
    %c0_85 = arith.constant 0 : index
    %390 = vector.load %arg11[%389, %c0_84, %c0_85] : memref<8x8x512xf32, #tpu.memory_space<vmem>>, vector<1x8x512xf32>
    %391 = vector.shape_cast %390 : vector<1x8x512xf32> to vector<8x512xf32>
    %392 = arith.truncf %360 : vector<8x128xf32> to vector<8x128xbf16>
    %cst_86 = arith.constant dense<0.000000e+00> : vector<8x512xf32>
    %393 = tpu.matmul %392, %10, %cst_86 {dimension_numbers = #tpu.dot_dimension_numbers<[1], [0], [0], [1], [0, 0, 1, 1], [], []>} : vector<8x128xbf16>, vector<128x512xbf16>, vector<8x512xf32> -> vector<8x512xf32>
    %394 = arith.addf %391, %393 : vector<8x512xf32>
    %395 = arith.truncf %388 : vector<8x128xf32> to vector<8x128xbf16>
    %cst_87 = arith.constant dense<0.000000e+00> : vector<8x512xf32>
    %396 = tpu.matmul %395, %12, %cst_87 {dimension_numbers = #tpu.dot_dimension_numbers<[1], [0], [0], [1], [0, 0, 1, 1], [], []>} : vector<8x128xbf16>, vector<128x512xbf16>, vector<8x512xf32> -> vector<8x512xf32>
    %397 = arith.addf %396, %15 : vector<8x512xf32>
    %398 = vector.extract_strided_slice %394 {offsets = [0, 0], sizes = [8, 128], strides = [1, 1]} : vector<8x512xf32> to vector<8x128xf32>
    %399 = arith.negf %398 : vector<8x128xf32>
    %400 = math.exp %399 : vector<8x128xf32>
    %cst_88 = arith.constant 1.000000e+00 : f32
    %401 = vector.broadcast %cst_88 : f32 to vector<8x128xf32>
    %402 = arith.addf %401, %400 : vector<8x128xf32>
    %403 = arith.divf %401, %402 : vector<8x128xf32>
    %404 = vector.extract_strided_slice %394 {offsets = [0, 128], sizes = [8, 128], strides = [1, 1]} : vector<8x512xf32> to vector<8x128xf32>
    %405 = arith.negf %404 : vector<8x128xf32>
    %406 = math.exp %405 : vector<8x128xf32>
    %cst_89 = arith.constant 1.000000e+00 : f32
    %407 = vector.broadcast %cst_89 : f32 to vector<8x128xf32>
    %408 = arith.addf %407, %406 : vector<8x128xf32>
    %409 = arith.divf %407, %408 : vector<8x128xf32>
    %410 = vector.extract_strided_slice %394 {offsets = [0, 256], sizes = [8, 128], strides = [1, 1]} : vector<8x512xf32> to vector<8x128xf32>
    %411 = math.tanh %410 : vector<8x128xf32>
    %412 = vector.extract_strided_slice %394 {offsets = [0, 384], sizes = [8, 128], strides = [1, 1]} : vector<8x512xf32> to vector<8x128xf32>
    %413 = arith.negf %412 : vector<8x128xf32>
    %414 = math.exp %413 : vector<8x128xf32>
    %cst_90 = arith.constant 1.000000e+00 : f32
    %415 = vector.broadcast %cst_90 : f32 to vector<8x128xf32>
    %416 = arith.addf %415, %414 : vector<8x128xf32>
    %417 = arith.divf %415, %416 : vector<8x128xf32>
    %418 = arith.mulf %409, %358 : vector<8x128xf32>
    %419 = arith.mulf %403, %411 : vector<8x128xf32>
    %420 = arith.addf %418, %419 : vector<8x128xf32>
    %421 = math.tanh %420 : vector<8x128xf32>
    %422 = arith.mulf %417, %421 : vector<8x128xf32>
    %423 = arith.truncf %422 : vector<8x128xf32> to vector<8x128xbf16>
    %cst_91 = arith.constant dense<0.000000e+00> : vector<8x512xf32>
    %424 = tpu.matmul %423, %11, %cst_91 {dimension_numbers = #tpu.dot_dimension_numbers<[1], [0], [0], [1], [0, 0, 1, 1], [], []>} : vector<8x128xbf16>, vector<128x512xbf16>, vector<8x512xf32> -> vector<8x512xf32>
    %425 = arith.addf %397, %424 : vector<8x512xf32>
    %426 = vector.extract_strided_slice %425 {offsets = [0, 0], sizes = [8, 128], strides = [1, 1]} : vector<8x512xf32> to vector<8x128xf32>
    %427 = arith.negf %426 : vector<8x128xf32>
    %428 = math.exp %427 : vector<8x128xf32>
    %cst_92 = arith.constant 1.000000e+00 : f32
    %429 = vector.broadcast %cst_92 : f32 to vector<8x128xf32>
    %430 = arith.addf %429, %428 : vector<8x128xf32>
    %431 = arith.divf %429, %430 : vector<8x128xf32>
    %432 = vector.extract_strided_slice %425 {offsets = [0, 128], sizes = [8, 128], strides = [1, 1]} : vector<8x512xf32> to vector<8x128xf32>
    %433 = arith.negf %432 : vector<8x128xf32>
    %434 = math.exp %433 : vector<8x128xf32>
    %cst_93 = arith.constant 1.000000e+00 : f32
    %435 = vector.broadcast %cst_93 : f32 to vector<8x128xf32>
    %436 = arith.addf %435, %434 : vector<8x128xf32>
    %437 = arith.divf %435, %436 : vector<8x128xf32>
    %438 = vector.extract_strided_slice %425 {offsets = [0, 256], sizes = [8, 128], strides = [1, 1]} : vector<8x512xf32> to vector<8x128xf32>
    %439 = math.tanh %438 : vector<8x128xf32>
    %440 = vector.extract_strided_slice %425 {offsets = [0, 384], sizes = [8, 128], strides = [1, 1]} : vector<8x512xf32> to vector<8x128xf32>
    %441 = arith.negf %440 : vector<8x128xf32>
    %442 = math.exp %441 : vector<8x128xf32>
    %cst_94 = arith.constant 1.000000e+00 : f32
    %443 = vector.broadcast %cst_94 : f32 to vector<8x128xf32>
    %444 = arith.addf %443, %442 : vector<8x128xf32>
    %445 = arith.divf %443, %444 : vector<8x128xf32>
    %446 = arith.mulf %437, %386 : vector<8x128xf32>
    %447 = arith.mulf %431, %439 : vector<8x128xf32>
    %448 = arith.addf %446, %447 : vector<8x128xf32>
    %449 = math.tanh %448 : vector<8x128xf32>
    %450 = arith.mulf %445, %449 : vector<8x128xf32>
    %c7_i32 = arith.constant 7 : i32
    %451 = arith.index_cast %c7_i32 : i32 to index
    %c0_95 = arith.constant 0 : index
    %c0_96 = arith.constant 0 : index
    %452 = vector.load %arg11[%451, %c0_95, %c0_96] : memref<8x8x512xf32, #tpu.memory_space<vmem>>, vector<1x8x512xf32>
    %453 = vector.shape_cast %452 : vector<1x8x512xf32> to vector<8x512xf32>
    %454 = arith.truncf %422 : vector<8x128xf32> to vector<8x128xbf16>
    %cst_97 = arith.constant dense<0.000000e+00> : vector<8x512xf32>
    %455 = tpu.matmul %454, %10, %cst_97 {dimension_numbers = #tpu.dot_dimension_numbers<[1], [0], [0], [1], [0, 0, 1, 1], [], []>} : vector<8x128xbf16>, vector<128x512xbf16>, vector<8x512xf32> -> vector<8x512xf32>
    %456 = arith.addf %453, %455 : vector<8x512xf32>
    %457 = arith.truncf %450 : vector<8x128xf32> to vector<8x128xbf16>
    %cst_98 = arith.constant dense<0.000000e+00> : vector<8x512xf32>
    %458 = tpu.matmul %457, %12, %cst_98 {dimension_numbers = #tpu.dot_dimension_numbers<[1], [0], [0], [1], [0, 0, 1, 1], [], []>} : vector<8x128xbf16>, vector<128x512xbf16>, vector<8x512xf32> -> vector<8x512xf32>
    %459 = arith.addf %458, %15 : vector<8x512xf32>
    %460 = vector.extract_strided_slice %456 {offsets = [0, 0], sizes = [8, 128], strides = [1, 1]} : vector<8x512xf32> to vector<8x128xf32>
    %461 = arith.negf %460 : vector<8x128xf32>
    %462 = math.exp %461 : vector<8x128xf32>
    %cst_99 = arith.constant 1.000000e+00 : f32
    %463 = vector.broadcast %cst_99 : f32 to vector<8x128xf32>
    %464 = arith.addf %463, %462 : vector<8x128xf32>
    %465 = arith.divf %463, %464 : vector<8x128xf32>
    %466 = vector.extract_strided_slice %456 {offsets = [0, 128], sizes = [8, 128], strides = [1, 1]} : vector<8x512xf32> to vector<8x128xf32>
    %467 = arith.negf %466 : vector<8x128xf32>
    %468 = math.exp %467 : vector<8x128xf32>
    %cst_100 = arith.constant 1.000000e+00 : f32
    %469 = vector.broadcast %cst_100 : f32 to vector<8x128xf32>
    %470 = arith.addf %469, %468 : vector<8x128xf32>
    %471 = arith.divf %469, %470 : vector<8x128xf32>
    %472 = vector.extract_strided_slice %456 {offsets = [0, 256], sizes = [8, 128], strides = [1, 1]} : vector<8x512xf32> to vector<8x128xf32>
    %473 = math.tanh %472 : vector<8x128xf32>
    %474 = vector.extract_strided_slice %456 {offsets = [0, 384], sizes = [8, 128], strides = [1, 1]} : vector<8x512xf32> to vector<8x128xf32>
    %475 = arith.negf %474 : vector<8x128xf32>
    %476 = math.exp %475 : vector<8x128xf32>
    %cst_101 = arith.constant 1.000000e+00 : f32
    %477 = vector.broadcast %cst_101 : f32 to vector<8x128xf32>
    %478 = arith.addf %477, %476 : vector<8x128xf32>
    %479 = arith.divf %477, %478 : vector<8x128xf32>
    %480 = arith.mulf %471, %420 : vector<8x128xf32>
    %481 = arith.mulf %465, %473 : vector<8x128xf32>
    %482 = arith.addf %480, %481 : vector<8x128xf32>
    %483 = math.tanh %482 : vector<8x128xf32>
    %484 = arith.mulf %479, %483 : vector<8x128xf32>
    %485 = arith.truncf %484 : vector<8x128xf32> to vector<8x128xbf16>
    %cst_102 = arith.constant dense<0.000000e+00> : vector<8x512xf32>
    %486 = tpu.matmul %485, %11, %cst_102 {dimension_numbers = #tpu.dot_dimension_numbers<[1], [0], [0], [1], [0, 0, 1, 1], [], []>} : vector<8x128xbf16>, vector<128x512xbf16>, vector<8x512xf32> -> vector<8x512xf32>
    %487 = arith.addf %459, %486 : vector<8x512xf32>
    %488 = vector.extract_strided_slice %487 {offsets = [0, 0], sizes = [8, 128], strides = [1, 1]} : vector<8x512xf32> to vector<8x128xf32>
    %489 = arith.negf %488 : vector<8x128xf32>
    %490 = math.exp %489 : vector<8x128xf32>
    %cst_103 = arith.constant 1.000000e+00 : f32
    %491 = vector.broadcast %cst_103 : f32 to vector<8x128xf32>
    %492 = arith.addf %491, %490 : vector<8x128xf32>
    %493 = arith.divf %491, %492 : vector<8x128xf32>
    %494 = vector.extract_strided_slice %487 {offsets = [0, 128], sizes = [8, 128], strides = [1, 1]} : vector<8x512xf32> to vector<8x128xf32>
    %495 = arith.negf %494 : vector<8x128xf32>
    %496 = math.exp %495 : vector<8x128xf32>
    %cst_104 = arith.constant 1.000000e+00 : f32
    %497 = vector.broadcast %cst_104 : f32 to vector<8x128xf32>
    %498 = arith.addf %497, %496 : vector<8x128xf32>
    %499 = arith.divf %497, %498 : vector<8x128xf32>
    %500 = vector.extract_strided_slice %487 {offsets = [0, 256], sizes = [8, 128], strides = [1, 1]} : vector<8x512xf32> to vector<8x128xf32>
    %501 = math.tanh %500 : vector<8x128xf32>
    %502 = vector.extract_strided_slice %487 {offsets = [0, 384], sizes = [8, 128], strides = [1, 1]} : vector<8x512xf32> to vector<8x128xf32>
    %503 = arith.negf %502 : vector<8x128xf32>
    %504 = math.exp %503 : vector<8x128xf32>
    %cst_105 = arith.constant 1.000000e+00 : f32
    %505 = vector.broadcast %cst_105 : f32 to vector<8x128xf32>
    %506 = arith.addf %505, %504 : vector<8x128xf32>
    %507 = arith.divf %505, %506 : vector<8x128xf32>
    %508 = arith.mulf %499, %448 : vector<8x128xf32>
    %509 = arith.mulf %493, %501 : vector<8x128xf32>
    %510 = arith.addf %508, %509 : vector<8x128xf32>
    %511 = math.tanh %510 : vector<8x128xf32>
    %512 = arith.mulf %507, %511 : vector<8x128xf32>
    %c8_i32 = arith.constant 8 : i32
    %513 = arith.truncf %512 : vector<8x128xf32> to vector<8x128xbf16>
    %c0_106 = arith.constant 0 : index
    %c0_107 = arith.constant 0 : index
    %514 = vector.load %arg8[%c0_106, %c0_107] : memref<128x128xbf16, #tpu.memory_space<vmem>>, vector<128x128xbf16>
    %cst_108 = arith.constant dense<0.000000e+00> : vector<8x128xf32>
    %515 = tpu.matmul %513, %514, %cst_108 {dimension_numbers = #tpu.dot_dimension_numbers<[1], [0], [0], [1], [0, 0, 1, 1], [], []>} : vector<8x128xbf16>, vector<128x128xbf16>, vector<8x128xf32> -> vector<8x128xf32>
    %c0_109 = arith.constant 0 : index
    %c0_110 = arith.constant 0 : index
    %516 = vector.load %arg9[%c0_109, %c0_110] : memref<1x128xf32, #tpu.memory_space<vmem>>, vector<1x128xf32>
    %517 = vector.broadcast %516 : vector<1x128xf32> to vector<8x128xf32>
    %518 = arith.addf %515, %517 : vector<8x128xf32>
    %c0_111 = arith.constant 0 : index
    %c0_112 = arith.constant 0 : index
    %519 = vector.load %arg10[%c0_111, %c0_112] : memref<8x128xf32, #tpu.memory_space<vmem>>, vector<8x128xf32>
    tpu.vector_store %arg10[%c0_111, %c0_112], %518 {strides = array<i32>} : memref<8x128xf32, #tpu.memory_space<vmem>>, vector<8x128xf32>,
    return
  }
  func.func @transform_0(%arg0: i32) -> (i32, i32, i32) {
    %c0_i32 = arith.constant 0 : i32
    %c0_i32_0 = arith.constant 0 : i32
    %c0_i32_1 = arith.constant 0 : i32
    return %c0_i32, %arg0, %c0_i32_0 : i32, i32, i32
  }
  func.func @transform_1(%arg0: i32) -> (i32, i32) {
    %c0_i32 = arith.constant 0 : i32
    %c0_i32_0 = arith.constant 0 : i32
    %c0_i32_1 = arith.constant 0 : i32
    return %c0_i32, %c0_i32_0 : i32, i32
  }
  func.func @transform_2(%arg0: i32) -> (i32, i32) {
    %c0_i32 = arith.constant 0 : i32
    %c0_i32_0 = arith.constant 0 : i32
    %c0_i32_1 = arith.constant 0 : i32
    return %c0_i32, %c0_i32_0 : i32, i32
  }
  func.func @transform_3(%arg0: i32) -> (i32, i32) {
    %c0_i32 = arith.constant 0 : i32
    %c0_i32_0 = arith.constant 0 : i32
    %c0_i32_1 = arith.constant 0 : i32
    return %c0_i32, %c0_i32_0 : i32, i32
  }
  func.func @transform_4(%arg0: i32) -> (i32, i32) {
    %c0_i32 = arith.constant 0 : i32
    %c0_i32_0 = arith.constant 0 : i32
    %c0_i32_1 = arith.constant 0 : i32
    return %c0_i32, %c0_i32_0 : i32, i32
  }
  func.func @transform_5(%arg0: i32) -> (i32, i32) {
    %c0_i32 = arith.constant 0 : i32
    %c0_i32_0 = arith.constant 0 : i32
    %c0_i32_1 = arith.constant 0 : i32
    return %c0_i32, %c0_i32_0 : i32, i32
  }
  func.func @transform_6(%arg0: i32) -> (i32, i32) {
    %c0_i32 = arith.constant 0 : i32
    %c0_i32_0 = arith.constant 0 : i32
    %c0_i32_1 = arith.constant 0 : i32
    return %c0_i32, %c0_i32_0 : i32, i32
  }
  func.func @transform_7(%arg0: i32) -> (i32, i32) {
    %c0_i32 = arith.constant 0 : i32
    %c0_i32_0 = arith.constant 0 : i32
    %c0_i32_1 = arith.constant 0 : i32
    return %c0_i32, %c0_i32_0 : i32, i32
  }
  func.func @transform_8(%arg0: i32) -> (i32, i32) {
    %c0_i32 = arith.constant 0 : i32
    %c0_i32_0 = arith.constant 0 : i32
    %c0_i32_1 = arith.constant 0 : i32
    return %c0_i32, %c0_i32_0 : i32, i32
  }
  func.func @transform_9(%arg0: i32) -> (i32, i32) {
    %c0_i32 = arith.constant 0 : i32
    %c0_i32_0 = arith.constant 0 : i32
    return %arg0, %c0_i32 : i32, i32
  }
}

</mosaic_0001>

<bundles_post_ra>
// kernel: tpu_custom_call.1
= control target key start
LH: loop header
LB: loop body
LE: loop exit
PB: predicated region body
PF: predicated region fallthrough
CT: control target
= control target key end

     0   :  { %14 = vsyncpa [#allocation4], 0  ;;  %s6394_s0 = inlined_call_operand.vmem [shape: f32[8,8,5], index: 0, kind: input, shape index: {}]   ;;  %s6395_s1 = inlined_call_operand.vmem [shape: bf16[5,512], index: 1, kind: input, shape index: {}]   ;;  %s6396_s2 = inlined_call_operand.hbm [shape: bf16[128,512], index: 2, kind: input, shape index: {}]   ;;  %s6397_s3 = inlined_call_operand.vmem [shape: f32[1,512], index: 3, kind: input, shape index: {}]   ;;  %s6398_s4 = inlined_call_operand.hbm [shape: bf16[128,512], index: 4, kind: input, shape index: {}]   ;;  %s6399_s5 = inlined_call_operand.hbm [shape: bf16[128,512], index: 5, kind: input, shape index: {}]   ;;  %s6400_s6 = inlined_call_operand.vmem [shape: f32[1,512], index: 6, kind: input, shape index: {}]   ;;  %s6401_s7 = inlined_call_operand.vmem [shape: bf16[128,128], index: 7, kind: input, shape index: {}]   ;;  %s6402_s8 = inlined_call_operand.vmem [shape: f32[1,128], index: 8, kind: input, shape index: {}]   ;;  %s6403_s9 = inlined_call_operand.hbm [shape: f32[8,128], index: 9, kind: output, shape index: {}]  }
   0x1   :  { %15 = vsyncpa [#allocation7], 0 }
   0x2   :  { %16 = vsyncpa [#allocation5], 0  ;;  %s4555_s30 = smov [#allocation6]   ;;  %s4556_s11 = smov [#allocation3]  }
   0x3   :  { %s40_s10 = sshll.u32 %s4555_s30, 4  ;;  %s26_s12 = sshll.u32 %s4556_s11, 4  ;;  %s41_s10 = int_to_ptr.vmem [resolvable:$true] %s40_s10  ;;  %s4615_s12 = int_to_ptr.vmem [resolvable:$true] %s26_s12 }
   0x4   :  { %s4461_s15 = scalar_lea.hbm %s6398_s4, 4096 }
   0x5   :  { %p4462_p0 = scmp.ne.s32.totalorder %s6398_s4, %s4461_s15  ;;  %p4465_p1 = scmp.lt.u32.totalorder %s4461_s15, %s6398_s4 }
   0x7   :  { %p4467_p2 = pnand %p4465_p1, %p4462_p0 }
   0x9   :  { %4470 = shalt.err (!%p4467_p2)
}
   0xa   :  { %s4471_s20 = scalar_lea.vmem %s41_s10, 4096  ;;  %p4476_p4 = scmp.lt.s32.totalorder %s41_s10, %s41_s10 }
   0xb   :  { %p4472_p3 = scmp.ne.s32.totalorder %s41_s10, %s4471_s20  ;;  %p4477_p5 = scmp.lt.s32.totalorder %s4471_s20, %s4471_s20 }
   0xd   :  { %p4478_p6 = por %p4477_p5, %p4476_p4 }
   0xf   :  { %p4479_p7 = pnand %p4478_p6, %p4472_p3 }
  0x11   :  { %4482 = shalt.err (!%p4479_p7)
}
  0x12   :  { %s4557_s21 = smov 256   ;;  %s4558_s22 = smov 16  }
  0x13   :  { %46 = dma.hbm_to_vmem [thread:$0]  %s6398_s4, 4096, %s41_s10, [#allocation7], %s4557_s21, %s4557_s21, %s4558_s22  }
  0x14   :  { %s4483_s27 = scalar_lea.hbm %s6396_s2, 4096 }
  0x15   :  { %p4484_p8 = scmp.ne.s32.totalorder %s6396_s2, %s4483_s27  ;;  %p4487_p9 = scmp.lt.u32.totalorder %s4483_s27, %s6396_s2 }
  0x17   :  { %p4489_p10 = pnand %p4487_p9, %p4484_p8 }
  0x19   :  { %4492 = shalt.err (!%p4489_p10)
}
  0x1a   :  { %s4493_s13 = scalar_lea.vmem %s4615_s12, 4096  ;;  %p4498_p12 = scmp.lt.s32.totalorder %s4615_s12, %s4615_s12 }
  0x1b   :  { %p4494_p11 = scmp.ne.s32.totalorder %s4615_s12, %s4493_s13  ;;  %p4499_p13 = scmp.lt.s32.totalorder %s4493_s13, %s4493_s13 }
  0x1d   :  { %p4500_p0 = por %p4499_p13, %p4498_p12 }
  0x1f   :  { %p4501_p1 = pnand %p4500_p0, %p4494_p11 }
  0x21   :  { %4504 = shalt.err (!%p4501_p1)
}
  0x22   :  { %32 = dma.hbm_to_vmem [thread:$0]  %s6396_s2, 4096, %s4615_s12, [#allocation4], %s4557_s21, %s4557_s21, %s4558_s22  }
  0x23   :  { %s4559_s14 = smov [#allocation8]   ;;  %s4505_s18 = scalar_lea.hbm %s6399_s5, 4096 }
  0x24   :  { %s52_s15 = sshll.u32 %s4559_s14, 4  ;;  %p4506_p2 = scmp.ne.s32.totalorder %s6399_s5, %s4505_s18  ;;  %s53_s15 = int_to_ptr.vmem [resolvable:$true] %s52_s15 }
  0x25   :  { %p4509_p3 = scmp.lt.u32.totalorder %s4505_s18, %s6399_s5 }
  0x27   :  { %p4511_p4 = pnand %p4509_p3, %p4506_p2 }
  0x29   :  { %4514 = shalt.err (!%p4511_p4)
}
  0x2a   :  { %s4515_s25 = scalar_lea.vmem %s53_s15, 4096  ;;  %p4520_p6 = scmp.lt.s32.totalorder %s53_s15, %s53_s15 }
  0x2b   :  { %p4516_p5 = scmp.ne.s32.totalorder %s53_s15, %s4515_s25  ;;  %p4521_p7 = scmp.lt.s32.totalorder %s4515_s25, %s4515_s25 }
  0x2d   :  { %p4522_p8 = por %p4521_p7, %p4520_p6 }
  0x2f   :  { %p4523_p9 = pnand %p4522_p8, %p4516_p5 }
  0x31   :  { %4526 = shalt.err (!%p4523_p9)
}
  0x32   :  { %58 = dma.hbm_to_vmem [thread:$0]  %s6399_s5, 4096, %s53_s15, [#allocation7], %s4557_s21, %s4557_s21, %s4558_s22  }
  0x33   :  { %4549 = dma.done.wait [#allocation4], 4096  }
  0x34   :  { %4550 = vsyncadd [#allocation4], 4294963200 }
  0x35   :  { %4551 = dma.done.wait [#allocation7], 8192  }
  0x36   :  { %4552 = vsyncadd [#allocation7], 4294959104  ;;  %vm158_vm0 = vcmask 1041408   ;;  %v6404_v0 = vmov 0   ;;  %vm159_vm1 = vcmask 1042432   ;;  %v4561_v1 = vmov 65535  }
  0x37   :  { %206 = vmatprep.mubr.bf16.mxu0 %v6404_v0  ;;  %279 = vmatprep.mubr.bf16.mxu1 %v6404_v0  ;;  %v160_v2 = vsel %vm158_vm0, 4294967295, %v4561_v1  ;;  %v91_v3 = vld [vmem:[%s6395_s1] sm:$0x77]  ;;  %v92_v5 = vld [vmem:[%s6395_s1 + $0x8] sm:$0x77]  ;;  %vm145_vm2 = vcmask 39936  }
  0x38   :  { %v161_v4 = vsel %vm159_vm1, %v160_v2, 0  ;;  %v3554_v6 = vcombine.high %v91_v3, %v91_v3  ;;  %v3556_v7 = vcombine.high %v92_v5, %v92_v5  ;;  %v3553_v8 = vcombine.low %v91_v3, %v91_v3  ;;  %v75_v10 = vld [vmem:[%s6394_s0] sm:$0xff]  ;;  %v76_v11 = vld [vmem:[%s6394_s0 + $0x8] sm:$0xff]  ;;  %v77_v25 = vld [vmem:[%s6394_s0 + $0x10] sm:$0xff]  ;;  %s4564_s14 = smov [#allocation9]  }
  0x39   :  { %v3555_v9 = vcombine.low %v92_v5, %v92_v5  ;;  %v4681_v16 = vld [vmem:[#allocation3 + $0x4] ss:$16 sps:$4 sm:$0xff]   ;;  %v4683_v17 = vld [vmem:[#allocation3 + $0xc] ss:$16 sps:$4 sm:$0xff]   ;;  %v3718_v18 = vpack.c.bf16 %v76_v11, %v75_v10  ;;  %v4685_v19 = vld [vmem:[#allocation3] ss:$16 sps:$4 sm:$0xff]  }
  0x3a   :  { %v166_v12 = vand.u32 %v3554_v6, %v161_v4  ;;  %v172_v13 = vand.u32 %v3556_v7, %v161_v4  ;;  %v163_v14 = vand.u32 %v3553_v8, %v161_v4  ;;  %v4687_v20 = vld [vmem:[#allocation3 + $0x8] ss:$16 sps:$4 sm:$0xff]   ;;  %v4689_v21 = vld [vmem:[#allocation3 + $0x24] ss:$16 sps:$4 sm:$0xff]   ;;  %v4693_v22 = vld [vmem:[#allocation3 + $0x2c] ss:$16 sps:$4 sm:$0xff]  }
  0x3b   :  { %v169_v15 = vand.u32 %v3555_v9, %v161_v4  ;;  %v4695_v23 = vld [vmem:[#allocation3 + $0x20] ss:$16 sps:$4 sm:$0xff]   ;;  %v4699_v24 = vld [vmem:[#allocation3 + $0x28] ss:$16 sps:$4 sm:$0xff]   ;;  %v4709_v27 = vld [vmem:[#allocation3 + $0x44] ss:$16 sps:$4 sm:$0xff]  }
  0x3c   :  { %174 = vmatprep.subr.bf16.mxu0 %v166_v12  ;;  %247 = vmatprep.subr.bf16.mxu1 %v172_v13  ;;  %v78_v26 = vld [vmem:[%s6394_s0 + $0x18] sm:$0xff]  ;;  %v4717_v30 = vld [vmem:[#allocation3 + $0x40] ss:$16 sps:$4 sm:$0xff]   ;;  %v4725_v32 = vld [vmem:[#allocation3 + $0x64] ss:$16 sps:$4 sm:$0xff]   ;;  %vm4563_vm3 = vmmov 0  }
  0x3d   :  { %175 = vmatpush1.bf16.msra.mxu0 %v163_v14  ;;  %248 = vmatpush1.bf16.msra.mxu1 %v169_v15  ;;  %v4713_v28 = vld [vmem:[#allocation3 + $0x4c] ss:$16 sps:$4 sm:$0xff]   ;;  %v3719_v29 = vpack.c.bf16 %v78_v26, %v77_v25  ;;  %v4721_v31 = vld [vmem:[#allocation3 + $0x48] ss:$16 sps:$4 sm:$0xff]   ;;  %v4729_v34 = vld [vmem:[#allocation3 + $0x60] ss:$16 sps:$4 sm:$0xff]  }
  0x3e   :  { %634 = vmatprep.subr.bf16.mxu0 %v4681_v16  ;;  %675 = vmatprep.subr.bf16.mxu1 %v4683_v17  ;;  %v4727_v33 = vld [vmem:[#allocation3 + $0x6c] ss:$16 sps:$4 sm:$0xff]   ;;  %v4733_v35 = vld [vmem:[#allocation3 + $0x68] ss:$16 sps:$4 sm:$0xff]   ;;  %v79_v36 = vld [vmem:[%s6394_s0 + $0x20] sm:$0xff]  ;;  %s3539_s15 = sshll.u32 %s4564_s14, 4  ;;  %s3540_s15 = int_to_ptr.vmem [resolvable:$true] %s3539_s15 }
  0x3f   :  { %v80_v37 = vld [vmem:[%s6394_s0 + $0x28] sm:$0xff]  ;;  %v4743_v38 = vld [vmem:[#allocation3 + $0x84] ss:$16 sps:$4 sm:$0xff]   ;;  %v4751_v41 = vld [vmem:[#allocation3 + $0x80] ss:$16 sps:$4 sm:$0xff]   ;;  %s4527_s16 = scalar_lea.vmem %s3540_s15, 128  ;;  %p4532_p11 = scmp.lt.s32.totalorder %s3540_s15, %s3540_s15 }
  0x40   :  { %3557 = vmatmul.mubr.msk.bf16.vlgmr.msra.gmra.mrb[0].mxu0 %vm145_vm2, %v3718_v18  ;;  %3561 = vmatmul.mubr.msk.bf16.vlgmr.msra.gmra.mrb[0].mxu1 %vm145_vm2, %v3718_v18  ;;  %v4747_v39 = vld [vmem:[#allocation3 + $0x8c] ss:$16 sps:$4 sm:$0xff]   ;;  %v3720_v40 = vpack.c.bf16 %v80_v37, %v79_v36  ;;  %v4753_v42 = vld [vmem:[#allocation3 + $0x88] ss:$16 sps:$4 sm:$0xff]   ;;  %v4757_v43 = vld [vmem:[#allocation3 + $0xa4] ss:$16 sps:$4 sm:$0xff]   ;;  %p4528_p10 = scmp.ne.s32.totalorder %s3540_s15, %s4527_s16  ;;  %p4533_p12 = scmp.lt.s32.totalorder %s4527_s16, %s4527_s16 }
  0x41   :  { %635 = vmatpush1.bf16.msra.mxu0 %v4685_v19  ;;  %676 = vmatpush1.bf16.msra.mxu1 %v4687_v20  ;;  %v4761_v44 = vld [vmem:[#allocation3 + $0xac] ss:$16 sps:$4 sm:$0xff]   ;;  %v4763_v45 = vld [vmem:[#allocation3 + $0xa0] ss:$16 sps:$4 sm:$0xff]   ;;  %v4765_v46 = vld [vmem:[#allocation3 + $0xa8] ss:$16 sps:$4 sm:$0xff]  }
  0x42   :  { %636 = vmatprep.subr.bf16.mxu0 %v4689_v21  ;;  %677 = vmatprep.subr.bf16.mxu1 %v4693_v22  ;;  %v81_v47 = vld [vmem:[%s6394_s0 + $0x30] sm:$0xff]  ;;  %v82_v48 = vld [vmem:[%s6394_s0 + $0x38] sm:$0xff]  ;;  %p4534_p13 = por %p4533_p12, %p4532_p11 }
  0x43   :  { %216 = vmatprep.mubr.bf16.mxu0 %v6404_v0  ;;  %289 = vmatprep.mubr.bf16.mxu1 %v6404_v0  ;;  %v4775_v49 = vld [vmem:[#allocation3 + $0xc4] ss:$16 sps:$4 sm:$0xff]   ;;  %v4777_v50 = vld [vmem:[#allocation3 + $0xcc] ss:$16 sps:$4 sm:$0xff]   ;;  %v4785_v51 = vld [vmem:[#allocation3 + $0xc0] ss:$16 sps:$4 sm:$0xff]   ;;  %v3721_v53 = vpack.c.bf16 %v82_v48, %v81_v47 }
  0x44   :  { %v4787_v52 = vld [vmem:[#allocation3 + $0xc8] ss:$16 sps:$4 sm:$0xff]   ;;  %v4789_v54 = vld [vmem:[#allocation3 + $0xe4] ss:$16 sps:$4 sm:$0xff]   ;;  %v4791_v55 = vld [vmem:[#allocation3 + $0xec] ss:$16 sps:$4 sm:$0xff]   ;;  %p4535_p0 = pnand %p4534_p13, %p4528_p10 }
  0x45   :  { %637 = vmatpush1.bf16.msra.mxu0 %v4695_v23  ;;  %678 = vmatpush1.bf16.msra.mxu1 %v4699_v24  ;;  %v4797_v56 = vld [vmem:[#allocation3 + $0xe0] ss:$16 sps:$4 sm:$0xff]   ;;  %v4799_v57 = vld [vmem:[#allocation3 + $0xe8] ss:$16 sps:$4 sm:$0xff]   ;;  %v4815_v58 = vld [vmem:[#allocation8 + $0x4] ss:$16 sps:$4 sm:$0xff]  }
  0x46   :  { %638 = vmatprep.subr.bf16.mxu0 %v4709_v27  ;;  %679 = vmatprep.subr.bf16.mxu1 %v4713_v28  ;;  %v4817_v59 = vld [vmem:[#allocation8 + $0xc] ss:$16 sps:$4 sm:$0xff]   ;;  %v4819_v60 = vld [vmem:[#allocation8] ss:$16 sps:$4 sm:$0xff]   ;;  %v4821_v61 = vld [vmem:[#allocation8 + $0x8] ss:$16 sps:$4 sm:$0xff]  }
  0x47   :  { %v4827_v62 = vld [vmem:[#allocation8 + $0x24] ss:$16 sps:$4 sm:$0xff]   ;;  %v4829_v63 = vld [vmem:[#allocation8 + $0x2c] ss:$16 sps:$4 sm:$0xff]   ;;  %v4831_v1 = vld [vmem:[#allocation8 + $0x20] ss:$16 sps:$4 sm:$0xff]  }
  0x48   :  { %3558 = vmatmul.mubr.msk.bf16.gmra.mrb[4].mxu0 %vm145_vm2, %v3719_v29  ;;  %3562 = vmatmul.mubr.msk.bf16.gmra.mrb[4].mxu1 %vm145_vm2, %v3719_v29  ;;  %v4833_v2 = vld [vmem:[#allocation8 + $0x28] ss:$16 sps:$4 sm:$0xff]   ;;  %v4839_v3 = vld [vmem:[#allocation8 + $0x44] ss:$16 sps:$4 sm:$0xff]   ;;  %v4841_v4 = vld [vmem:[#allocation8 + $0x4c] ss:$16 sps:$4 sm:$0xff]  }
  0x49   :  { %639 = vmatpush1.bf16.msra.mxu0 %v4717_v30  ;;  %680 = vmatpush1.bf16.msra.mxu1 %v4721_v31  ;;  %6754 = vst [vmem:[#allocation13_spill] sm:$0xff] %v4839_v3  ;;  %6755 = vst [vmem:[#allocation14_spill] sm:$0xff] %v4841_v4  ;;  %v4843_v5 = vld [vmem:[#allocation8 + $0x40] ss:$16 sps:$4 sm:$0xff]   ;;  %v4845_v6 = vld [vmem:[#allocation8 + $0x48] ss:$16 sps:$4 sm:$0xff]  }
  0x4a   :  { %640 = vmatprep.subr.bf16.mxu0 %v4725_v32  ;;  %681 = vmatprep.subr.bf16.mxu1 %v4727_v33  ;;  %6756 = vst [vmem:[#allocation15_spill] sm:$0xff] %v4843_v5  ;;  %6757 = vst [vmem:[#allocation16_spill] sm:$0xff] %v4845_v6  ;;  %v4851_v7 = vld [vmem:[#allocation8 + $0x64] ss:$16 sps:$4 sm:$0xff]   ;;  %v4853_v8 = vld [vmem:[#allocation8 + $0x6c] ss:$16 sps:$4 sm:$0xff]  }
  0x4b   :  { %226 = vmatprep.mubr.bf16.mxu0 %v6404_v0  ;;  %299 = vmatprep.mubr.bf16.mxu1 %v6404_v0  ;;  %6758 = vst [vmem:[#allocation17_spill] sm:$0xff] %v4851_v7  ;;  %6759 = vst [vmem:[#allocation18_spill] sm:$0xff] %v4853_v8  ;;  %v4855_v9 = vld [vmem:[#allocation8 + $0x60] ss:$16 sps:$4 sm:$0xff]   ;;  %v4857_v10 = vld [vmem:[#allocation8 + $0x68] ss:$16 sps:$4 sm:$0xff]  }
  0x4c   :  { %6760 = vst [vmem:[#allocation19_spill] sm:$0xff] %v4855_v9  ;;  %6761 = vst [vmem:[#allocation20_spill] sm:$0xff] %v4857_v10  ;;  %v4863_v11 = vld [vmem:[#allocation8 + $0x84] ss:$16 sps:$4 sm:$0xff]   ;;  %v4865_v12 = vld [vmem:[#allocation8 + $0x8c] ss:$16 sps:$4 sm:$0xff]  }
  0x4d   :  { %641 = vmatpush1.bf16.msra.mxu0 %v4729_v34  ;;  %682 = vmatpush1.bf16.msra.mxu1 %v4733_v35  ;;  %6762 = vst [vmem:[#allocation21_spill] sm:$0xff] %v4863_v11  ;;  %6763 = vst [vmem:[#allocation22_spill] sm:$0xff] %v4865_v12  ;;  %v4869_v13 = vld [vmem:[#allocation8 + $0x80] ss:$16 sps:$4 sm:$0xff]   ;;  %v4871_v14 = vld [vmem:[#allocation8 + $0x88] ss:$16 sps:$4 sm:$0xff]  }
  0x4e   :  { %642 = vmatprep.subr.bf16.mxu0 %v4743_v38  ;;  %683 = vmatprep.subr.bf16.mxu1 %v4747_v39  ;;  %6764 = vst [vmem:[#allocation23_spill] sm:$0xff] %v4869_v13  ;;  %6765 = vst [vmem:[#allocation24_spill] sm:$0xff] %v4871_v14  ;;  %v4875_v15 = vld [vmem:[#allocation8 + $0xa4] ss:$16 sps:$4 sm:$0xff]   ;;  %v4877_v18 = vld [vmem:[#allocation8 + $0xac] ss:$16 sps:$4 sm:$0xff]  }
  0x4f   :  { %6766 = vst [vmem:[#allocation25_spill] sm:$0xff] %v4875_v15  ;;  %6767 = vst [vmem:[#allocation26_spill] sm:$0xff] %v4877_v18  ;;  %v4879_v25 = vld [vmem:[#allocation8 + $0xa0] ss:$16 sps:$4 sm:$0xff]   ;;  %v4881_v26 = vld [vmem:[#allocation8 + $0xa8] ss:$16 sps:$4 sm:$0xff]  }
  0x50   :  { %3559 = vmatmul.mubr.msk.bf16.gmra.mrb[8].mxu0 %vm145_vm2, %v3720_v40  ;;  %3563 = vmatmul.mubr.msk.bf16.gmra.mrb[8].mxu1 %vm145_vm2, %v3720_v40  ;;  %6768 = vst [vmem:[#allocation27_spill] sm:$0xff] %v4879_v25  ;;  %6769 = vst [vmem:[#allocation28_spill] sm:$0xff] %v4881_v26  ;;  %v4887_v29 = vld [vmem:[#allocation8 + $0xc4] ss:$16 sps:$4 sm:$0xff]   ;;  %v4889_v36 = vld [vmem:[#allocation8 + $0xcc] ss:$16 sps:$4 sm:$0xff]  }
  0x51   :  { %643 = vmatpush1.bf16.msra.mxu0 %v4751_v41  ;;  %684 = vmatpush1.bf16.msra.mxu1 %v4753_v42  ;;  %6770 = vst [vmem:[#allocation29_spill] sm:$0xff] %v4887_v29  ;;  %6771 = vst [vmem:[#allocation30_spill] sm:$0xff] %v4889_v36  ;;  %v4891_v37 = vld [vmem:[#allocation8 + $0xc0] ss:$16 sps:$4 sm:$0xff]   ;;  %v4893_v40 = vld [vmem:[#allocation8 + $0xc8] ss:$16 sps:$4 sm:$0xff]  }
  0x52   :  { %644 = vmatprep.subr.bf16.mxu0 %v4757_v43  ;;  %685 = vmatprep.subr.bf16.mxu1 %v4761_v44  ;;  %6772 = vst [vmem:[#allocation31_spill] sm:$0xff] %v4891_v37  ;;  %6773 = vst [vmem:[#allocation32_spill] sm:$0xff] %v4893_v40  ;;  %v4899_v47 = vld [vmem:[#allocation8 + $0xe4] ss:$16 sps:$4 sm:$0xff]   ;;  %v4901_v48 = vld [vmem:[#allocation8 + $0xec] ss:$16 sps:$4 sm:$0xff]  }
  0x53   :  { %236 = vmatprep.mubr.bf16.mxu0 %v6404_v0  ;;  %309 = vmatprep.mubr.bf16.mxu1 %v6404_v0  ;;  %6774 = vst [vmem:[#allocation33_spill] sm:$0xff] %v4899_v47  ;;  %6775 = vst [vmem:[#allocation34_spill] sm:$0xff] %v4901_v48 }
  0x55   :  { %645 = vmatpush1.bf16.msra.mxu0 %v4763_v45  ;;  %686 = vmatpush1.bf16.msra.mxu1 %v4765_v46 }
  0x56   :  { %646 = vmatprep.subr.bf16.mxu0 %v4775_v49  ;;  %687 = vmatprep.subr.bf16.mxu1 %v4777_v50 }
  0x58   :  { %3560 = vmatmul.mubr.msk.bf16.gmra.mrb[12].mxu0 %vm145_vm2, %v3721_v53  ;;  %3564 = vmatmul.mubr.msk.bf16.gmra.mrb[12].mxu1 %vm145_vm2, %v3721_v53  ;;  %v4903_v53 = vld [vmem:[#allocation8 + $0xe0] ss:$16 sps:$4 sm:$0xff]  }
  0x59   :  { %647 = vmatpush1.bf16.msra.mxu0 %v4785_v51  ;;  %688 = vmatpush1.bf16.msra.mxu1 %v4787_v52  ;;  %6776 = vst [vmem:[#allocation35_spill] sm:$0xff] %v4903_v53 }
  0x5a   :  { %648 = vmatprep.subr.bf16.mxu0 %v4789_v54  ;;  %689 = vmatprep.subr.bf16.mxu1 %v4791_v55 }
  0x5b   :  { %666 = vmatprep.mubr.bf16.mxu0 %v6404_v0  ;;  %707 = vmatprep.mubr.bf16.mxu1 %v6404_v0 }
  0x5d   :  { %649 = vmatpush1.bf16.msra.mxu0 %v4797_v56  ;;  %690 = vmatpush1.bf16.msra.mxu1 %v4799_v57 }
  0x5e   :  { %880 = vmatprep.subr.bf16.mxu0 %v4815_v58  ;;  %921 = vmatprep.subr.bf16.mxu1 %v4817_v59 }
  0x60   :  { %667 = vmatmul.mubr.bf16.vlgmr.msra.gmra.mrb[16].mxu0 %v6404_v0  ;;  %708 = vmatmul.mubr.bf16.vlgmr.msra.gmra.mrb[16].mxu1 %v6404_v0 }
  0x61   :  { %912 = vmatprep.mubr.bf16.mxu0 %v6404_v0  ;;  %953 = vmatprep.mubr.bf16.mxu1 %v6404_v0  ;;  %v4905_v0 = vld [vmem:[#allocation8 + $0xe8] ss:$16 sps:$4 sm:$0xff]  }
  0x62   :  { %881 = vmatpush1.bf16.msra.mxu0 %v4819_v60  ;;  %922 = vmatpush1.bf16.msra.mxu1 %v4821_v61  ;;  %6777 = vst [vmem:[#allocation36_spill] sm:$0xff] %v4905_v0 }
  0x63   :  { %882 = vmatprep.subr.bf16.mxu0 %v4827_v62  ;;  %923 = vmatprep.subr.bf16.mxu1 %v4829_v63 }
  0x66   :  { %883 = vmatpush1.bf16.msra.mxu0 %v4831_v1  ;;  %924 = vmatpush1.bf16.msra.mxu1 %v4833_v2 }
  0x67   :  { %884 = vmatprep.subr.bf16.mxu0 %v4839_v3  ;;  %925 = vmatprep.subr.bf16.mxu1 %v4841_v4 }
  0x6a   :  { %885 = vmatpush1.bf16.msra.mxu0 %v4843_v5  ;;  %926 = vmatpush1.bf16.msra.mxu1 %v4845_v6 }
  0x6b   :  { %886 = vmatprep.subr.bf16.mxu0 %v4851_v7  ;;  %927 = vmatprep.subr.bf16.mxu1 %v4853_v8 }
  0x6e   :  { %887 = vmatpush1.bf16.msra.mxu0 %v4855_v9  ;;  %928 = vmatpush1.bf16.msra.mxu1 %v4857_v10 }
  0x6f   :  { %888 = vmatprep.subr.bf16.mxu0 %v4863_v11  ;;  %929 = vmatprep.subr.bf16.mxu1 %v4865_v12 }
  0x72   :  { %889 = vmatpush1.bf16.msra.mxu0 %v4869_v13  ;;  %930 = vmatpush1.bf16.msra.mxu1 %v4871_v14 }
  0x73   :  { %890 = vmatprep.subr.bf16.mxu0 %v4875_v15  ;;  %931 = vmatprep.subr.bf16.mxu1 %v4877_v18 }
  0x76   :  { %891 = vmatpush1.bf16.msra.mxu0 %v4879_v25  ;;  %932 = vmatpush1.bf16.msra.mxu1 %v4881_v26  ;;  %v6782_v26 = vmov 0   ;;  %v4973_v25 = vld [vmem:[#allocation6 + $0xa4] ss:$16 sps:$4 sm:$0xff]  }
  0x77   :  { %892 = vmatprep.subr.bf16.mxu0 %v4887_v29  ;;  %933 = vmatprep.subr.bf16.mxu1 %v4889_v36  ;;  %v4911_v36 = vld [vmem:[#allocation6 + $0x4] ss:$16 sps:$4 sm:$0xff]   ;;  %v4917_v29 = vld [vmem:[#allocation6 + $0x8] ss:$16 sps:$4 sm:$0xff]   ;;  %6799 = vst [vmem:[#allocation57_spill] sm:$0xff] %v4973_v25 }
  0x78   :  { %6778 = vst [vmem:[#allocation37_spill] sm:$0xff] %v4911_v36  ;;  %6781 = vst [vmem:[#allocation40_spill] sm:$0xff] %v4917_v29 }
  0x7a   :  { %893 = vmatpush1.bf16.msra.mxu0 %v4891_v37  ;;  %934 = vmatpush1.bf16.msra.mxu1 %v4893_v40  ;;  %v4913_v37 = vld [vmem:[#allocation6 + $0xc] ss:$16 sps:$4 sm:$0xff]   ;;  %v4915_v40 = vld [vmem:[#allocation6] ss:$16 sps:$4 sm:$0xff]  }
  0x7b   :  { %894 = vmatprep.subr.bf16.mxu0 %v4899_v47  ;;  %935 = vmatprep.subr.bf16.mxu1 %v4901_v48  ;;  %6779 = vst [vmem:[#allocation38_spill] sm:$0xff] %v4913_v37  ;;  %6780 = vst [vmem:[#allocation39_spill] sm:$0xff] %v4915_v40  ;;  %v4929_v48 = vld [vmem:[#allocation6 + $0x20] ss:$16 sps:$4 sm:$0xff]   ;;  %v4931_v47 = vld [vmem:[#allocation6 + $0x28] ss:$16 sps:$4 sm:$0xff]  }
  0x7c   :  { %6785 = vst [vmem:[#allocation43_spill] sm:$0xff] %v4929_v48  ;;  %6786 = vst [vmem:[#allocation44_spill] sm:$0xff] %v4931_v47 }
  0x7e   :  { %895 = vmatpush1.bf16.msra.mxu0 %v4903_v53  ;;  %936 = vmatpush1.bf16.msra.mxu1 %v4905_v0  ;;  %v4925_v0 = vld [vmem:[#allocation6 + $0x24] ss:$16 sps:$4 sm:$0xff]   ;;  %v4927_v53 = vld [vmem:[#allocation6 + $0x2c] ss:$16 sps:$4 sm:$0xff]  }
  0x7f   :  { %1147 = vmatprep.subr.bf16.mxu0 %v4911_v36  ;;  %1188 = vmatprep.subr.bf16.mxu1 %v4913_v37  ;;  %6783 = vst [vmem:[#allocation41_spill] sm:$0xff] %v4925_v0  ;;  %6784 = vst [vmem:[#allocation42_spill] sm:$0xff] %v4927_v53  ;;  %v4943_v37 = vld [vmem:[#allocation6 + $0x40] ss:$16 sps:$4 sm:$0xff]   ;;  %v4945_v36 = vld [vmem:[#allocation6 + $0x48] ss:$16 sps:$4 sm:$0xff]  }
  0x80   :  { %6789 = vst [vmem:[#allocation47_spill] sm:$0xff] %v4943_v37  ;;  %6790 = vst [vmem:[#allocation48_spill] sm:$0xff] %v4945_v36 }
  0x81   :  { %913 = vmatmul.mubr.bf16.vlgmr.msra.gmra.mrb[20].mxu0 %v6782_v26  ;;  %954 = vmatmul.mubr.bf16.vlgmr.msra.gmra.mrb[20].mxu1 %v6782_v26 }
  0x82   :  { %1148 = vmatpush1.bf16.msra.mxu0 %v4915_v40  ;;  %1189 = vmatpush1.bf16.msra.mxu1 %v4917_v29  ;;  %v4939_v29 = vld [vmem:[#allocation6 + $0x44] ss:$16 sps:$4 sm:$0xff]   ;;  %v4941_v40 = vld [vmem:[#allocation6 + $0x4c] ss:$16 sps:$4 sm:$0xff]  }
  0x83   :  { %1179 = vmatprep.mubr.bf16.mxu0 %v6782_v26  ;;  %1220 = vmatprep.mubr.bf16.mxu1 %v6782_v26  ;;  %6787 = vst [vmem:[#allocation45_spill] sm:$0xff] %v4939_v29  ;;  %6788 = vst [vmem:[#allocation46_spill] sm:$0xff] %v4941_v40 }
  0x84   :  { %1149 = vmatprep.subr.bf16.mxu0 %v4925_v0  ;;  %1190 = vmatprep.subr.bf16.mxu1 %v4927_v53  ;;  %v4951_v53 = vld [vmem:[#allocation6 + $0x64] ss:$16 sps:$4 sm:$0xff]   ;;  %v4957_v0 = vld [vmem:[#allocation6 + $0x68] ss:$16 sps:$4 sm:$0xff]  }
  0x85   :  { %6791 = vst [vmem:[#allocation49_spill] sm:$0xff] %v4951_v53  ;;  %6794 = vst [vmem:[#allocation52_spill] sm:$0xff] %v4957_v0 }
  0x86   :  { %1150 = vmatpush1.bf16.msra.mxu0 %v4929_v48  ;;  %1191 = vmatpush1.bf16.msra.mxu1 %v4931_v47  ;;  %v4953_v48 = vld [vmem:[#allocation6 + $0x6c] ss:$16 sps:$4 sm:$0xff]   ;;  %v4955_v47 = vld [vmem:[#allocation6 + $0x60] ss:$16 sps:$4 sm:$0xff]  }
  0x87   :  { %1151 = vmatprep.subr.bf16.mxu0 %v4939_v29  ;;  %1192 = vmatprep.subr.bf16.mxu1 %v4941_v40  ;;  %6792 = vst [vmem:[#allocation50_spill] sm:$0xff] %v4953_v48  ;;  %6793 = vst [vmem:[#allocation51_spill] sm:$0xff] %v4955_v47  ;;  %v4963_v40 = vld [vmem:[#allocation6 + $0x84] ss:$16 sps:$4 sm:$0xff]   ;;  %v4969_v29 = vld [vmem:[#allocation6 + $0x88] ss:$16 sps:$4 sm:$0xff]  }
  0x88   :  { %6795 = vst [vmem:[#allocation53_spill] sm:$0xff] %v4963_v40  ;;  %6798 = vst [vmem:[#allocation56_spill] sm:$0xff] %v4969_v29 }
  0x8a   :  { %1152 = vmatpush1.bf16.msra.mxu0 %v4943_v37  ;;  %1193 = vmatpush1.bf16.msra.mxu1 %v4945_v36  ;;  %v4965_v37 = vld [vmem:[#allocation6 + $0x8c] ss:$16 sps:$4 sm:$0xff]   ;;  %v4967_v36 = vld [vmem:[#allocation6 + $0x80] ss:$16 sps:$4 sm:$0xff]  }
  0x8b   :  { %1153 = vmatprep.subr.bf16.mxu0 %v4951_v53  ;;  %1194 = vmatprep.subr.bf16.mxu1 %v4953_v48  ;;  %6796 = vst [vmem:[#allocation54_spill] sm:$0xff] %v4965_v37  ;;  %6797 = vst [vmem:[#allocation55_spill] sm:$0xff] %v4967_v36  ;;  %v4975_v53 = vld [vmem:[#allocation6 + $0xac] ss:$16 sps:$4 sm:$0xff]   ;;  %v4985_v48 = vld [vmem:[#allocation6 + $0xc4] ss:$16 sps:$4 sm:$0xff]  }
  0x8c   :  { %6800 = vst [vmem:[#allocation58_spill] sm:$0xff] %v4975_v53  ;;  %6803 = vst [vmem:[#allocation61_spill] sm:$0xff] %v4985_v48 }
  0x8e   :  { %1154 = vmatpush1.bf16.msra.mxu0 %v4955_v47  ;;  %1195 = vmatpush1.bf16.msra.mxu1 %v4957_v0  ;;  %v4979_v0 = vld [vmem:[#allocation6 + $0xa0] ss:$16 sps:$4 sm:$0xff]   ;;  %v4981_v47 = vld [vmem:[#allocation6 + $0xa8] ss:$16 sps:$4 sm:$0xff]  }
  0x8f   :  { %1155 = vmatprep.subr.bf16.mxu0 %v4963_v40  ;;  %1196 = vmatprep.subr.bf16.mxu1 %v4965_v37  ;;  %6801 = vst [vmem:[#allocation59_spill] sm:$0xff] %v4979_v0  ;;  %6802 = vst [vmem:[#allocation60_spill] sm:$0xff] %v4981_v47  ;;  %v4987_v40 = vld [vmem:[#allocation6 + $0xcc] ss:$16 sps:$4 sm:$0xff]   ;;  %v4991_v37 = vld [vmem:[#allocation6 + $0xc0] ss:$16 sps:$4 sm:$0xff]  }
  0x90   :  { %6804 = vst [vmem:[#allocation62_spill] sm:$0xff] %v4987_v40  ;;  %6805 = vst [vmem:[#allocation63_spill] sm:$0xff] %v4991_v37 }
  0x92   :  { %1156 = vmatpush1.bf16.msra.mxu0 %v4967_v36  ;;  %1197 = vmatpush1.bf16.msra.mxu1 %v4969_v29  ;;  %v4993_v36 = vld [vmem:[#allocation6 + $0xc8] ss:$16 sps:$4 sm:$0xff]   ;;  %v4997_v29 = vld [vmem:[#allocation6 + $0xe4] ss:$16 sps:$4 sm:$0xff]  }
  0x93   :  { %1157 = vmatprep.subr.bf16.mxu0 %v4973_v25  ;;  %1198 = vmatprep.subr.bf16.mxu1 %v4975_v53  ;;  %6806 = vst [vmem:[#allocation64_spill] sm:$0xff] %v4993_v36  ;;  %6807 = vst [vmem:[#allocation65_spill] sm:$0xff] %v4997_v29  ;;  %v4999_v25 = vld [vmem:[#allocation6 + $0xec] ss:$16 sps:$4 sm:$0xff]   ;;  %v5003_v53 = vld [vmem:[#allocation6 + $0xe0] ss:$16 sps:$4 sm:$0xff]  }
  0x94   :  { %6808 = vst [vmem:[#allocation66_spill] sm:$0xff] %v4999_v25  ;;  %6809 = vst [vmem:[#allocation67_spill] sm:$0xff] %v5003_v53 }
  0x96   :  { %1158 = vmatpush1.bf16.msra.mxu0 %v4979_v0  ;;  %1199 = vmatpush1.bf16.msra.mxu1 %v4981_v47  ;;  %v5005_v0 = vld [vmem:[#allocation6 + $0xe8] ss:$16 sps:$4 sm:$0xff]  }
  0x97   :  { %1159 = vmatprep.subr.bf16.mxu0 %v4985_v48  ;;  %1200 = vmatprep.subr.bf16.mxu1 %v4987_v40  ;;  %6810 = vst [vmem:[#allocation68_spill] sm:$0xff] %v5005_v0  ;;  %v95_v40 = vlaneseq }
  0x9a   :  { %1160 = vmatpush1.bf16.msra.mxu0 %v4991_v37  ;;  %1201 = vmatpush1.bf16.msra.mxu1 %v4993_v36  ;;  %v5013_v37 = vshrl.u32 %v95_v40, 7 }
  0x9b   :  { %1161 = vmatprep.subr.bf16.mxu0 %v4997_v29  ;;  %1202 = vmatprep.subr.bf16.mxu1 %v4999_v25  ;;  %v93_v25 = vld [vmem:[%s6397_s3] sm:$0xf] }
  0x9c   :  { %6811 = vst [vmem:[#allocation69_spill] sm:$0xff] %v5013_v37  ;;  %v6500_v36 = vsub.s32 2, %v5013_v37  ;;  %v6509_v48 = vsub.s32 3, %v5013_v37  ;;  %v6510_v47 = vsub.s32 0, %v5013_v37 }
  0x9e   :  { %1162 = vmatpush1.bf16.msra.mxu0 %v5003_v53  ;;  %1203 = vmatpush1.bf16.msra.mxu1 %v5005_v0  ;;  %v6517_v53 = vsub.s32 1, %v5013_v37  ;;  %v5032_v0 = vrot.slane %v93_v25, %v6509_v48  ;;  %v98_v29 = vrot.slane %v93_v25, %v6510_v47 }
  0x9f   :  { %1262 = vmatprep.subr.bf16.mxu0 %v4681_v16  ;;  %1303 = vmatprep.subr.bf16.mxu1 %v4683_v17  ;;  %v5024_v16 = vrot.slane %v93_v25, %v6500_v36 }
  0xa0   :  { %v102_v14 = vrot.slane %v93_v25, %v6517_v53 }
 0x113   :  { %v5026_v17 = vpop.f32.mrb[0].mxu0  ;;  %v5028_v40 = vpop.f32.mrb[0].mxu1 }
 0x114   :  { %v210_v18 = vpop.f32.mrb[1].mxu0  ;;  %v283_v15 = vpop.f32.mrb[1].mxu1 }
 0x115   :  { %v212_v13 = vpop.f32.mrb[2].mxu0  ;;  %v285_v12 = vpop.f32.mrb[2].mxu1 }
 0x116   :  { %v5038_v36 = vadd.f32 %v212_v13, %v98_v29  ;;  %v214_v11 = vpop.f32.mrb[3].mxu0  ;;  %v5041_v10 = vadd.f32 %v285_v12, %v5024_v16  ;;  %v287_v9 = vpop.f32.mrb[3].mxu1 }
 0x117   :  { %v5043_v8 = vadd.f32 %v214_v11, %v102_v14  ;;  %v5046_v48 = vadd.f32 %v287_v9, %v5032_v0 }
 0x118   :  { %6812 = vst [vmem:[#allocation70_spill] sm:$0xff] %v5038_v36  ;;  %6813 = vst [vmem:[#allocation71_spill] sm:$0xff] %v5041_v10 }
 0x119   :  { %6814 = vst [vmem:[#allocation72_spill] sm:$0xff] %v5043_v8  ;;  %6815 = vst [vmem:[#allocation73_spill] sm:$0xff] %v5046_v48 }
 0x11b   :  { %v218_v47 = vpop.f32.mrb[4].mxu0  ;;  %v291_v7 = vpop.f32.mrb[4].mxu1 }
 0x11c   :  { %v5048_v6 = vadd.f32 %v218_v47, %v98_v29  ;;  %v220_v37 = vpop.f32.mrb[5].mxu0  ;;  %v5051_v25 = vadd.f32 %v291_v7, %v5024_v16  ;;  %v293_v13 = vpop.f32.mrb[5].mxu1 }
 0x11d   :  { %v5053_v53 = vadd.f32 %v220_v37, %v102_v14  ;;  %v222_v36 = vpop.f32.mrb[6].mxu0  ;;  %v5056_v12 = vadd.f32 %v293_v13, %v5032_v0  ;;  %v295_v11 = vpop.f32.mrb[6].mxu1 }
 0x11e   :  { %6816 = vst [vmem:[#allocation74_spill] sm:$0xff] %v5048_v6  ;;  %6817 = vst [vmem:[#allocation75_spill] sm:$0xff] %v5051_v25  ;;  %v5058_v8 = vadd.f32 %v222_v36, %v98_v29  ;;  %v224_v9 = vpop.f32.mrb[7].mxu0  ;;  %v5061_v48 = vadd.f32 %v295_v11, %v5024_v16  ;;  %v297_v47 = vpop.f32.mrb[7].mxu1 }
 0x11f   :  { %6818 = vst [vmem:[#allocation76_spill] sm:$0xff] %v5053_v53  ;;  %6819 = vst [vmem:[#allocation77_spill] sm:$0xff] %v5056_v12  ;;  %v5063_v6 = vadd.f32 %v224_v9, %v102_v14  ;;  %v5066_v7 = vadd.f32 %v297_v47, %v5032_v0 }
 0x120   :  { %6820 = vst [vmem:[#allocation78_spill] sm:$0xff] %v5058_v8  ;;  %6821 = vst [vmem:[#allocation79_spill] sm:$0xff] %v5061_v48 }
 0x121   :  { %6822 = vst [vmem:[#allocation80_spill] sm:$0xff] %v5063_v6  ;;  %6823 = vst [vmem:[#allocation81_spill] sm:$0xff] %v5066_v7 }
 0x123   :  { %v228_v25 = vpop.f32.mrb[8].mxu0  ;;  %v301_v37 = vpop.f32.mrb[8].mxu1 }
 0x124   :  { %v5068_v53 = vadd.f32 %v228_v25, %v98_v29  ;;  %v230_v10 = vpop.f32.mrb[9].mxu0  ;;  %v5071_v13 = vadd.f32 %v301_v37, %v5024_v16  ;;  %v303_v36 = vpop.f32.mrb[9].mxu1 }
 0x125   :  { %v5073_v8 = vadd.f32 %v230_v10, %v102_v14  ;;  %v232_v12 = vpop.f32.mrb[10].mxu0  ;;  %v5076_v11 = vadd.f32 %v303_v36, %v5032_v0  ;;  %v305_v9 = vpop.f32.mrb[10].mxu1 }
 0x126   :  { %6824 = vst [vmem:[#allocation82_spill] sm:$0xff] %v5068_v53  ;;  %6825 = vst [vmem:[#allocation83_spill] sm:$0xff] %v5071_v13  ;;  %v5078_v6 = vadd.f32 %v232_v12, %v98_v29  ;;  %v234_v47 = vpop.f32.mrb[11].mxu0  ;;  %v5081_v7 = vadd.f32 %v305_v9, %v5024_v16  ;;  %v307_v25 = vpop.f32.mrb[11].mxu1 }
 0x127   :  { %6826 = vst [vmem:[#allocation84_spill] sm:$0xff] %v5073_v8  ;;  %6827 = vst [vmem:[#allocation85_spill] sm:$0xff] %v5076_v11  ;;  %v5083_v53 = vadd.f32 %v234_v47, %v102_v14  ;;  %v5086_v37 = vadd.f32 %v307_v25, %v5032_v0 }
 0x128   :  { %6828 = vst [vmem:[#allocation86_spill] sm:$0xff] %v5078_v6  ;;  %6829 = vst [vmem:[#allocation87_spill] sm:$0xff] %v5081_v7 }
 0x129   :  { %6830 = vst [vmem:[#allocation88_spill] sm:$0xff] %v5083_v53  ;;  %6831 = vst [vmem:[#allocation89_spill] sm:$0xff] %v5086_v37 }
 0x12b   :  { %v238_v13 = vpop.f32.mrb[12].mxu0  ;;  %v311_v10 = vpop.f32.mrb[12].mxu1 }
 0x12c   :  { %v5088_v8 = vadd.f32 %v238_v13, %v98_v29  ;;  %v240_v48 = vpop.f32.mrb[13].mxu0  ;;  %v5091_v36 = vadd.f32 %v311_v10, %v5024_v16  ;;  %v313_v12 = vpop.f32.mrb[13].mxu1 }
 0x12d   :  { %v5093_v6 = vadd.f32 %v240_v48, %v102_v14  ;;  %v242_v11 = vpop.f32.mrb[14].mxu0  ;;  %v5096_v9 = vadd.f32 %v313_v12, %v5032_v0  ;;  %v315_v47 = vpop.f32.mrb[14].mxu1  ;;  %v209_v48 = vadd.f32 %v5026_v17, %v98_v29  ;;  %v211_v12 = vadd.f32 %v210_v18, %v102_v14 }
 0x12e   :  { %6832 = vst [vmem:[#allocation90_spill] sm:$0xff] %v5088_v8  ;;  %6833 = vst [vmem:[#allocation91_spill] sm:$0xff] %v5091_v36  ;;  %v5098_v53 = vadd.f32 %v242_v11, %v98_v29  ;;  %v244_v25 = vpop.f32.mrb[15].mxu0  ;;  %v5101_v37 = vadd.f32 %v315_v47, %v5024_v16  ;;  %v317_v13 = vpop.f32.mrb[15].mxu1 }
 0x12f   :  { %6834 = vst [vmem:[#allocation92_spill] sm:$0xff] %v5093_v6  ;;  %6835 = vst [vmem:[#allocation93_spill] sm:$0xff] %v5096_v9  ;;  %v5103_v8 = vadd.f32 %v244_v25, %v102_v14  ;;  %v5106_v10 = vadd.f32 %v317_v13, %v5032_v0  ;;  %v282_v6 = vadd.f32 %v5028_v40, %v5024_v16 }
 0x130   :  { %6836 = vst [vmem:[#allocation94_spill] sm:$0xff] %v5098_v53  ;;  %6837 = vst [vmem:[#allocation95_spill] sm:$0xff] %v5101_v37  ;;  %v284_v9 = vadd.f32 %v283_v15, %v5032_v0 }
 0x131   :  { %6838 = vst [vmem:[#allocation96_spill] sm:$0xff] %v5103_v8  ;;  %6839 = vst [vmem:[#allocation97_spill] sm:$0xff] %v5106_v10 }
 0x133   :  { %v668_v11 = vpop.f32.mrb[16].mxu0  ;;  %v709_v53 = vpop.f32.mrb[16].mxu1 }
 0x134   :  { %v716_v36 = vadd.f32 %v668_v11, %v209_v48  ;;  %v718_v7 = vadd.f32 %v709_v53, %v282_v6  ;;  %v670_v47 = vpop.f32.mrb[17].mxu0  ;;  %v711_v37 = vpop.f32.mrb[17].mxu1 }
 0x135   :  { %v717_v5 = vadd.f32 %v670_v47, %v211_v12  ;;  %v719_v25 = vadd.f32 %v711_v37, %v284_v9  ;;  %v672_v8 = vpop.f32.mrb[18].mxu0  ;;  %v713_v4 = vpop.f32.mrb[18].mxu1 }
 0x136   :  { %v3629_v13 = vmul.f32 -1.442695, %v716_v36  ;;  %v673_v10 = vpop.f32.mrb[19].mxu0  ;;  %v714_v3 = vpop.f32.mrb[19].mxu1 }
 0x137   :  { %v3630_v29 = vmul.f32 -1.442695, %v717_v5  ;;  %v3631_v16 = vmul.f32 -1.442695, %v719_v25 }
 0x138   :  { %4013 = vpow2.f32 %v3629_v13 }
 0x139   :  { %4015 = vpow2.f32 %v3630_v29 }
 0x13a   :  { %4017 = vpow2.f32 %v3631_v16 }
 0x13b   :  { %4019 = vtanh.f32 %v718_v7 }
 0x142   :  { %v4014_v14 = vpop.eup %4013 }
 0x143   :  { %v4016_v18 = vpop.eup %4015  ;;  %v965_v0 = vadd.f32 1.0, %v4014_v14 }
 0x144   :  { %v971_v15 = vadd.f32 1.0, %v4016_v18  ;;  %v4018_v6 = vpop.eup %4017 }
 0x145   :  { %4021 = vrcp.f32 %v965_v0  ;;  %v4020_v53 = vpop.eup %4019  ;;  %v978_v40 = vadd.f32 1.0, %v4018_v6 }
 0x146   :  { %4023 = vrcp.f32 %v971_v15 }
 0x147   :  { %4025 = vrcp.f32 %v978_v40 }
 0x14f   :  { %v4022_v17 = vpop.eup %4021 }
 0x150   :  { %v4024_v8 = vpop.eup %4023  ;;  %v982_v4 = vmul.f32 %v4022_v17, %v4020_v53 }
 0x151   :  { %v981_v37 = vmul.f32 0.0, %v4024_v8  ;;  %v4026_v5 = vpop.eup %4025 }
 0x153   :  { %v5112_v3 = vadd.f32 %v982_v4, %v981_v37 }
 0x155   :  { %4027 = vtanh.f32 %v5112_v3 }
 0x15f   :  { %v4028_v36 = vpop.eup %4027 }
 0x160   :  { %v985_v9 = vmul.f32 %v4028_v36, %v4026_v5 }
 0x162   :  { %v986_v10 = vpack.c.bf16 %v985_v9, %v985_v9 }
 0x164   :  { %1180 = vmatmul.mubr.bf16.vlgmr.msra.gmra.mrb[20].mxu0 %v986_v10  ;;  %1221 = vmatmul.mubr.bf16.vlgmr.msra.gmra.mrb[20].mxu1 %v986_v10 }
 0x165   :  { %1263 = vmatpush1.bf16.msra.mxu0 %v4685_v19  ;;  %1304 = vmatpush1.bf16.msra.mxu1 %v4687_v20  ;;  %v6840_v19 = vld [vmem:[#allocation13_spill] sm:$0xff]  ;;  %v6841_v20 = vld [vmem:[#allocation14_spill] sm:$0xff] }
 0x166   :  { %1264 = vmatprep.subr.bf16.mxu0 %v4689_v21  ;;  %1305 = vmatprep.subr.bf16.mxu1 %v4693_v22  ;;  %v6842_v21 = vld [vmem:[#allocation15_spill] sm:$0xff]  ;;  %v6843_v22 = vld [vmem:[#allocation16_spill] sm:$0xff] }
 0x167   :  { %1294 = vmatprep.mubr.bf16.mxu0 %v6782_v26  ;;  %1335 = vmatprep.mubr.bf16.mxu1 %v6782_v26 }
 0x169   :  { %1265 = vmatpush1.bf16.msra.mxu0 %v4695_v23  ;;  %1306 = vmatpush1.bf16.msra.mxu1 %v4699_v24  ;;  %v6844_v23 = vld [vmem:[#allocation17_spill] sm:$0xff]  ;;  %v6845_v24 = vld [vmem:[#allocation18_spill] sm:$0xff] }
 0x16a   :  { %1266 = vmatprep.subr.bf16.mxu0 %v4709_v27  ;;  %1307 = vmatprep.subr.bf16.mxu1 %v4713_v28  ;;  %v6846_v27 = vld [vmem:[#allocation19_spill] sm:$0xff]  ;;  %v6847_v28 = vld [vmem:[#allocation20_spill] sm:$0xff] }
 0x16d   :  { %1267 = vmatpush1.bf16.msra.mxu0 %v4717_v30  ;;  %1308 = vmatpush1.bf16.msra.mxu1 %v4721_v31  ;;  %v6848_v30 = vld [vmem:[#allocation21_spill] sm:$0xff]  ;;  %v6849_v31 = vld [vmem:[#allocation22_spill] sm:$0xff] }
 0x16e   :  { %1268 = vmatprep.subr.bf16.mxu0 %v4725_v32  ;;  %1309 = vmatprep.subr.bf16.mxu1 %v4727_v33  ;;  %v6850_v32 = vld [vmem:[#allocation23_spill] sm:$0xff]  ;;  %v6851_v33 = vld [vmem:[#allocation24_spill] sm:$0xff] }
 0x171   :  { %1269 = vmatpush1.bf16.msra.mxu0 %v4729_v34  ;;  %1310 = vmatpush1.bf16.msra.mxu1 %v4733_v35  ;;  %v6852_v34 = vld [vmem:[#allocation25_spill] sm:$0xff]  ;;  %v6853_v35 = vld [vmem:[#allocation26_spill] sm:$0xff] }
 0x172   :  { %1270 = vmatprep.subr.bf16.mxu0 %v4743_v38  ;;  %1311 = vmatprep.subr.bf16.mxu1 %v4747_v39  ;;  %v6854_v38 = vld [vmem:[#allocation27_spill] sm:$0xff]  ;;  %v6855_v39 = vld [vmem:[#allocation28_spill] sm:$0xff] }
 0x175   :  { %1271 = vmatpush1.bf16.msra.mxu0 %v4751_v41  ;;  %1312 = vmatpush1.bf16.msra.mxu1 %v4753_v42  ;;  %v6856_v41 = vld [vmem:[#allocation29_spill] sm:$0xff]  ;;  %v6857_v42 = vld [vmem:[#allocation30_spill] sm:$0xff] }
 0x176   :  { %1272 = vmatprep.subr.bf16.mxu0 %v4757_v43  ;;  %1313 = vmatprep.subr.bf16.mxu1 %v4761_v44  ;;  %v6858_v43 = vld [vmem:[#allocation31_spill] sm:$0xff]  ;;  %v6859_v44 = vld [vmem:[#allocation32_spill] sm:$0xff] }
 0x179   :  { %1273 = vmatpush1.bf16.msra.mxu0 %v4763_v45  ;;  %1314 = vmatpush1.bf16.msra.mxu1 %v4765_v46  ;;  %v6860_v45 = vld [vmem:[#allocation33_spill] sm:$0xff]  ;;  %v6861_v46 = vld [vmem:[#allocation34_spill] sm:$0xff] }
 0x17a   :  { %1274 = vmatprep.subr.bf16.mxu0 %v4775_v49  ;;  %1315 = vmatprep.subr.bf16.mxu1 %v4777_v50  ;;  %v6862_v49 = vld [vmem:[#allocation35_spill] sm:$0xff]  ;;  %v6863_v50 = vld [vmem:[#allocation36_spill] sm:$0xff] }
 0x17d   :  { %1275 = vmatpush1.bf16.msra.mxu0 %v4785_v51  ;;  %1316 = vmatpush1.bf16.msra.mxu1 %v4787_v52  ;;  %v6864_v51 = vld [vmem:[#allocation37_spill] sm:$0xff]  ;;  %v6865_v52 = vld [vmem:[#allocation38_spill] sm:$0xff] }
 0x17e   :  { %1276 = vmatprep.subr.bf16.mxu0 %v4789_v54  ;;  %1317 = vmatprep.subr.bf16.mxu1 %v4791_v55  ;;  %v448_v54 = vld [vmem:[%s6400_s6] sm:$0xf]  ;;  %v6866_v55 = vld [vmem:[#allocation69_spill] sm:$0xff] }
 0x17f   :  { %v6869_v7 = vsub.s32 1, %v6866_v55  ;;  %v6871_v53 = vsub.s32 3, %v6866_v55  ;;  %v6873_v4 = vsub.s32 2, %v6866_v55 }
 0x181   :  { %1277 = vmatpush1.bf16.msra.mxu0 %v4797_v56  ;;  %1318 = vmatpush1.bf16.msra.mxu1 %v4799_v57  ;;  %v6867_v56 = vsub.s32 0, %v6866_v55  ;;  %v5192_v48 = vrot.slane %v448_v54, %v6869_v7  ;;  %v5198_v17 = vrot.slane %v448_v54, %v6871_v53  ;;  %v5203_v40 = vrot.slane %v448_v54, %v6873_v4 }
 0x182   :  { %1349 = vmatprep.subr.bf16.mxu0 %v4815_v58  ;;  %1390 = vmatprep.subr.bf16.mxu1 %v4817_v59 }
 0x183   :  { %v5188_v57 = vrot.slane %v448_v54, %v6867_v56  ;;  %6870 = vst [vmem:[#allocation14_spill] sm:$0xff] %v5192_v48  ;;  %6872 = vst [vmem:[#allocation15_spill] sm:$0xff] %v5198_v17 }
 0x184   :  { %1295 = vmatmul.mubr.bf16.vlgmr.msra.gmra.mrb[24].mxu0 %v986_v10  ;;  %1336 = vmatmul.mubr.bf16.vlgmr.msra.gmra.mrb[24].mxu1 %v986_v10  ;;  %6874 = vst [vmem:[#allocation16_spill] sm:$0xff] %v5203_v40 }
 0x185   :  { %1350 = vmatpush1.bf16.msra.mxu0 %v4819_v60  ;;  %1391 = vmatpush1.bf16.msra.mxu1 %v4821_v61  ;;  %6868 = vst [vmem:[#allocation13_spill] sm:$0xff] %v5188_v57 }
 0x186   :  { %1351 = vmatprep.subr.bf16.mxu0 %v4827_v62  ;;  %1392 = vmatprep.subr.bf16.mxu1 %v4829_v63 }
 0x187   :  { %1381 = vmatprep.mubr.bf16.mxu0 %v6782_v26  ;;  %1422 = vmatprep.mubr.bf16.mxu1 %v6782_v26 }
 0x189   :  { %1352 = vmatpush1.bf16.msra.mxu0 %v4831_v1  ;;  %1393 = vmatpush1.bf16.msra.mxu1 %v4833_v2 }
 0x18a   :  { %1353 = vmatprep.subr.bf16.mxu0 %v6840_v19  ;;  %1394 = vmatprep.subr.bf16.mxu1 %v6841_v20 }
 0x18d   :  { %1354 = vmatpush1.bf16.msra.mxu0 %v6842_v21  ;;  %1395 = vmatpush1.bf16.msra.mxu1 %v6843_v22 }
 0x18e   :  { %1355 = vmatprep.subr.bf16.mxu0 %v6844_v23  ;;  %1396 = vmatprep.subr.bf16.mxu1 %v6845_v24 }
 0x191   :  { %1356 = vmatpush1.bf16.msra.mxu0 %v6846_v27  ;;  %1397 = vmatpush1.bf16.msra.mxu1 %v6847_v28 }
 0x192   :  { %1357 = vmatprep.subr.bf16.mxu0 %v6848_v30  ;;  %1398 = vmatprep.subr.bf16.mxu1 %v6849_v31 }
 0x195   :  { %1358 = vmatpush1.bf16.msra.mxu0 %v6850_v32  ;;  %1399 = vmatpush1.bf16.msra.mxu1 %v6851_v33 }
 0x196   :  { %1359 = vmatprep.subr.bf16.mxu0 %v6852_v34  ;;  %1400 = vmatprep.subr.bf16.mxu1 %v6853_v35 }
 0x199   :  { %1360 = vmatpush1.bf16.msra.mxu0 %v6854_v38  ;;  %1401 = vmatpush1.bf16.msra.mxu1 %v6855_v39 }
 0x19a   :  { %1361 = vmatprep.subr.bf16.mxu0 %v6856_v41  ;;  %1402 = vmatprep.subr.bf16.mxu1 %v6857_v42 }
 0x19d   :  { %1362 = vmatpush1.bf16.msra.mxu0 %v6858_v43  ;;  %1403 = vmatpush1.bf16.msra.mxu1 %v6859_v44 }
 0x19e   :  { %1363 = vmatprep.subr.bf16.mxu0 %v6860_v45  ;;  %1404 = vmatprep.subr.bf16.mxu1 %v6861_v46 }
 0x1a1   :  { %1364 = vmatpush1.bf16.msra.mxu0 %v6862_v49  ;;  %1405 = vmatpush1.bf16.msra.mxu1 %v6863_v50 }
 0x1a2   :  { %1456 = vmatprep.subr.bf16.mxu0 %v6864_v51  ;;  %1497 = vmatprep.subr.bf16.mxu1 %v6865_v52 }
 0x237   :  { %v1181_v12 = vpop.f32.mrb[20].mxu0  ;;  %v1222_v11 = vpop.f32.mrb[20].mxu1 }
 0x238   :  { %v3751_v47 = vadd.f32 %v1181_v12, %v5188_v57  ;;  %v1183_v25 = vpop.f32.mrb[21].mxu0  ;;  %v1224_v13 = vpop.f32.mrb[21].mxu1  ;;  %v3753_v5 = vadd.f32 %v1222_v11, %v5203_v40  ;;  %v6875_v11 = vld [vmem:[#allocation70_spill] sm:$0xff] }
 0x239   :  { %v3752_v29 = vadd.f32 %v1183_v25, %v5192_v48  ;;  %v1185_v16 = vpop.f32.mrb[22].mxu0  ;;  %v1226_v14 = vpop.f32.mrb[22].mxu1  ;;  %v3754_v8 = vadd.f32 %v1224_v13, %v5198_v17 }
 0x23a   :  { %v3664_v18 = vmul.f32 -1.442695, %v3751_v47  ;;  %v1186_v0 = vpop.f32.mrb[23].mxu0  ;;  %v1227_v15 = vpop.f32.mrb[23].mxu1 }
 0x23b   :  { %v3665_v6 = vmul.f32 -1.442695, %v3752_v29  ;;  %v3666_v37 = vmul.f32 -1.442695, %v3754_v8  ;;  %v6876_v0 = vld [vmem:[#allocation71_spill] sm:$0xff]  ;;  %v6877_v8 = vld [vmem:[#allocation72_spill] sm:$0xff] }
 0x23c   :  { %4029 = vpow2.f32 %v3664_v18 }
 0x23d   :  { %4031 = vpow2.f32 %v3665_v6 }
 0x23e   :  { %4033 = vpow2.f32 %v3666_v37  ;;  %v6878_v37 = vld [vmem:[#allocation73_spill] sm:$0xff] }
 0x23f   :  { %4035 = vtanh.f32 %v3753_v5 }
 0x246   :  { %v4030_v36 = vpop.eup %4029 }
 0x247   :  { %v4032_v9 = vpop.eup %4031  ;;  %v1236_v10 = vadd.f32 1.0, %v4030_v36 }
 0x248   :  { %v1242_v56 = vadd.f32 1.0, %v4032_v9  ;;  %v4034_v7 = vpop.eup %4033 }
 0x249   :  { %4037 = vrcp.f32 %v1236_v10  ;;  %v4036_v12 = vpop.eup %4035  ;;  %v1249_v29 = vadd.f32 1.0, %v4034_v7 }
 0x24a   :  { %4039 = vrcp.f32 %v1242_v56 }
 0x24b   :  { %4041 = vrcp.f32 %v1249_v29 }
 0x253   :  { %v4038_v47 = vpop.eup %4037 }
 0x254   :  { %v4040_v25 = vpop.eup %4039  ;;  %v1253_v13 = vmul.f32 %v4038_v47, %v4036_v12 }
 0x255   :  { %v1252_v55 = vmul.f32 0.0, %v4040_v25  ;;  %v4042_v47 = vpop.eup %4041 }
 0x257   :  { %v5206_v54 = vadd.f32 %v1253_v13, %v1252_v55  ;;  %v1296_v16 = vpop.f32.mrb[24].mxu0  ;;  %v1337_v14 = vpop.f32.mrb[24].mxu1 }
 0x258   :  { %v1344_v18 = vadd.f32 %v1296_v16, %v6875_v11  ;;  %v1346_v15 = vadd.f32 %v1337_v14, %v6876_v0  ;;  %v1298_v6 = vpop.f32.mrb[25].mxu0  ;;  %v1339_v53 = vpop.f32.mrb[25].mxu1 }
 0x259   :  { %4043 = vtanh.f32 %v5206_v54  ;;  %v1345_v4 = vadd.f32 %v1298_v6, %v6877_v8  ;;  %v1347_v5 = vadd.f32 %v1339_v53, %v6878_v37  ;;  %v1300_v36 = vpop.f32.mrb[26].mxu0  ;;  %v1341_v9 = vpop.f32.mrb[26].mxu1  ;;  %v6880_v6 = vld [vmem:[#allocation40_spill] sm:$0xff]  ;;  %v6881_v53 = vld [vmem:[#allocation41_spill] sm:$0xff]  ;;  %v6882_v8 = vld [vmem:[#allocation42_spill] sm:$0xff] }
 0x25a   :  { %v3667_v10 = vmul.f32 -1.442695, %v1344_v18  ;;  %v1301_v56 = vpop.f32.mrb[27].mxu0  ;;  %v1342_v7 = vpop.f32.mrb[27].mxu1  ;;  %v6879_v18 = vld [vmem:[#allocation39_spill] sm:$0xff]  ;;  %v6885_v37 = vld [vmem:[#allocation45_spill] sm:$0xff] }
 0x25b   :  { %v3668_v12 = vmul.f32 -1.442695, %v1345_v4  ;;  %v3669_v13 = vmul.f32 -1.442695, %v1347_v5  ;;  %v6883_v4 = vld [vmem:[#allocation43_spill] sm:$0xff]  ;;  %v6886_v5 = vld [vmem:[#allocation46_spill] sm:$0xff] }
 0x25c   :  { %4045 = vpow2.f32 %v3667_v10  ;;  %v6887_v9 = vld [vmem:[#allocation47_spill] sm:$0xff]  ;;  %v6888_v10 = vld [vmem:[#allocation48_spill] sm:$0xff]  ;;  %v6889_v7 = vld [vmem:[#allocation49_spill] sm:$0xff] }
 0x25d   :  { %4047 = vpow2.f32 %v3668_v12  ;;  %v6890_v12 = vld [vmem:[#allocation50_spill] sm:$0xff] }
 0x25e   :  { %4049 = vpow2.f32 %v3669_v13 }
 0x25f   :  { %4051 = vtanh.f32 %v1346_v15  ;;  %v6884_v15 = vld [vmem:[#allocation44_spill] sm:$0xff] }
 0x263   :  { %v4044_v25 = vpop.eup %4043 }
 0x264   :  { %v1256_v29 = vmul.f32 %v4044_v25, %v4042_v47 }
 0x266   :  { %v4046_v55 = vpop.eup %4045  ;;  %v1348_v16 = vpack.c.bf16 %v1256_v29, %v1256_v29 }
 0x267   :  { %v4048_v14 = vpop.eup %4047  ;;  %v1434_v11 = vadd.f32 1.0, %v4046_v55 }
 0x268   :  { %v1440_v0 = vadd.f32 1.0, %v4048_v14  ;;  %1382 = vmatmul.mubr.bf16.vlgmr.msra.gmra.mrb[28].mxu0 %v1348_v16  ;;  %1423 = vmatmul.mubr.bf16.vlgmr.msra.gmra.mrb[28].mxu1 %v1348_v16  ;;  %v4050_v36 = vpop.eup %4049  ;;  %v6891_v16 = vld [vmem:[#allocation51_spill] sm:$0xff]  ;;  %v6892_v14 = vld [vmem:[#allocation52_spill] sm:$0xff] }
 0x269   :  { %4053 = vrcp.f32 %v1434_v11  ;;  %1457 = vmatpush1.bf16.msra.mxu0 %v6879_v18  ;;  %1498 = vmatpush1.bf16.msra.mxu1 %v6880_v6  ;;  %v4052_v56 = vpop.eup %4051  ;;  %v1447_v29 = vadd.f32 1.0, %v4050_v36  ;;  %v6893_v11 = vld [vmem:[#allocation53_spill] sm:$0xff] }
 0x26a   :  { %4055 = vrcp.f32 %v1440_v0  ;;  %1458 = vmatprep.subr.bf16.mxu0 %v6881_v53  ;;  %1499 = vmatprep.subr.bf16.mxu1 %v6882_v8  ;;  %v6894_v0 = vld [vmem:[#allocation54_spill] sm:$0xff]  ;;  %v6897_v36 = vld [vmem:[#allocation57_spill] sm:$0xff] }
 0x26b   :  { %1488 = vmatprep.mubr.bf16.mxu0 %v6782_v26  ;;  %1529 = vmatprep.mubr.bf16.mxu1 %v6782_v26  ;;  %4057 = vrcp.f32 %v1447_v29  ;;  %v6904_v29 = vld [vmem:[#allocation64_spill] sm:$0xff] }
 0x26d   :  { %1459 = vmatpush1.bf16.msra.mxu0 %v6883_v4  ;;  %1500 = vmatpush1.bf16.msra.mxu1 %v6884_v15 }
 0x26e   :  { %1460 = vmatprep.subr.bf16.mxu0 %v6885_v37  ;;  %1501 = vmatprep.subr.bf16.mxu1 %v6886_v5 }
 0x271   :  { %1461 = vmatpush1.bf16.msra.mxu0 %v6887_v9  ;;  %1502 = vmatpush1.bf16.msra.mxu1 %v6888_v10 }
 0x272   :  { %1462 = vmatprep.subr.bf16.mxu0 %v6889_v7  ;;  %1503 = vmatprep.subr.bf16.mxu1 %v6890_v12  ;;  %v6895_v7 = vld [vmem:[#allocation55_spill] sm:$0xff]  ;;  %v6896_v12 = vld [vmem:[#allocation56_spill] sm:$0xff] }
 0x273   :  { %v4054_v47 = vpop.eup %4053 }
 0x274   :  { %v4056_v25 = vpop.eup %4055  ;;  %v1451_v13 = vmul.f32 %v4054_v47, %v4052_v56  ;;  %v6899_v56 = vld [vmem:[#allocation59_spill] sm:$0xff]  ;;  %v6900_v47 = vld [vmem:[#allocation60_spill] sm:$0xff] }
 0x275   :  { %v1450_v55 = vmul.f32 %v4056_v25, %v5112_v3  ;;  %1463 = vmatpush1.bf16.msra.mxu0 %v6891_v16  ;;  %1504 = vmatpush1.bf16.msra.mxu1 %v6892_v14  ;;  %v6898_v3 = vld [vmem:[#allocation58_spill] sm:$0xff]  ;;  %v6901_v25 = vld [vmem:[#allocation61_spill] sm:$0xff] }
 0x276   :  { %1464 = vmatprep.subr.bf16.mxu0 %v6893_v11  ;;  %1505 = vmatprep.subr.bf16.mxu1 %v6894_v0  ;;  %v6902_v0 = vld [vmem:[#allocation62_spill] sm:$0xff] }
 0x277   :  { %v5232_v10 = vadd.f32 %v1451_v13, %v1450_v55  ;;  %v6903_v13 = vld [vmem:[#allocation63_spill] sm:$0xff]  ;;  %v4058_v55 = vpop.eup %4057 }
 0x279   :  { %1465 = vmatpush1.bf16.msra.mxu0 %v6895_v7  ;;  %1506 = vmatpush1.bf16.msra.mxu1 %v6896_v12  ;;  %4059 = vtanh.f32 %v5232_v10  ;;  %v6905_v12 = vld [vmem:[#allocation65_spill] sm:$0xff]  ;;  %v6906_v7 = vld [vmem:[#allocation66_spill] sm:$0xff] }
 0x27a   :  { %1466 = vmatprep.subr.bf16.mxu0 %v6897_v36  ;;  %1507 = vmatprep.subr.bf16.mxu1 %v6898_v3  ;;  %v6907_v3 = vld [vmem:[#allocation67_spill] sm:$0xff] }
 0x27d   :  { %1467 = vmatpush1.bf16.msra.mxu0 %v6899_v56  ;;  %1508 = vmatpush1.bf16.msra.mxu1 %v6900_v47  ;;  %v6908_v56 = vld [vmem:[#allocation68_spill] sm:$0xff] }
 0x27e   :  { %1468 = vmatprep.subr.bf16.mxu0 %v6901_v25  ;;  %1509 = vmatprep.subr.bf16.mxu1 %v6902_v0  ;;  %v5251_v25 = vld [vmem:[#allocation3 + $0x4] ss:$16 sps:$4 sm:$0xff]  }
 0x27f   :  { %6909 = vst [vmem:[#allocation17_spill] sm:$0xff] %v5251_v25 }
 0x281   :  { %1469 = vmatpush1.bf16.msra.mxu0 %v6903_v13  ;;  %1510 = vmatpush1.bf16.msra.mxu1 %v6904_v29  ;;  %v5254_v13 = vld [vmem:[#allocation3 + $0xc] ss:$16 sps:$4 sm:$0xff]  }
 0x282   :  { %1470 = vmatprep.subr.bf16.mxu0 %v6905_v12  ;;  %1511 = vmatprep.subr.bf16.mxu1 %v6906_v7  ;;  %6910 = vst [vmem:[#allocation18_spill] sm:$0xff] %v5254_v13  ;;  %v5259_v7 = vld [vmem:[#allocation3] ss:$16 sps:$4 sm:$0xff]  }
 0x283   :  { %v4060_v36 = vpop.eup %4059  ;;  %6911 = vst [vmem:[#allocation19_spill] sm:$0xff] %v5259_v7 }
 0x284   :  { %v1454_v11 = vmul.f32 %v4060_v36, %v4058_v55  ;;  %v5262_v36 = vld [vmem:[#allocation3 + $0x8] ss:$16 sps:$4 sm:$0xff]   ;;  %v5268_v55 = vld [vmem:[#allocation3 + $0x2c] ss:$16 sps:$4 sm:$0xff]  }
 0x285   :  { %1471 = vmatpush1.bf16.msra.mxu0 %v6907_v3  ;;  %1512 = vmatpush1.bf16.msra.mxu1 %v6908_v56  ;;  %6912 = vst [vmem:[#allocation20_spill] sm:$0xff] %v5262_v36  ;;  %6914 = vst [vmem:[#allocation22_spill] sm:$0xff] %v5268_v55 }
 0x286   :  { %v5249_v47 = vpack.c.bf16 %v1454_v11, %v1454_v11  ;;  %1571 = vmatprep.subr.bf16.mxu0 %v5251_v25  ;;  %1612 = vmatprep.subr.bf16.mxu1 %v5254_v13  ;;  %v5265_v11 = vld [vmem:[#allocation3 + $0x24] ss:$16 sps:$4 sm:$0xff]   ;;  %v5273_v13 = vld [vmem:[#allocation3 + $0x20] ss:$16 sps:$4 sm:$0xff]   ;;  %v5288_v25 = vld [vmem:[#allocation3 + $0x48] ss:$16 sps:$4 sm:$0xff]  }
 0x287   :  { %6913 = vst [vmem:[#allocation21_spill] sm:$0xff] %v5265_v11  ;;  %6915 = vst [vmem:[#allocation23_spill] sm:$0xff] %v5273_v13 }
 0x288   :  { %1489 = vmatmul.mubr.bf16.vlgmr.msra.gmra.mrb[28].mxu0 %v5249_v47  ;;  %1530 = vmatmul.mubr.bf16.vlgmr.msra.gmra.mrb[28].mxu1 %v5249_v47  ;;  %6920 = vst [vmem:[#allocation28_spill] sm:$0xff] %v5288_v25 }
 0x289   :  { %1572 = vmatpush1.bf16.msra.mxu0 %v5259_v7  ;;  %1613 = vmatpush1.bf16.msra.mxu1 %v5262_v36  ;;  %v5276_v7 = vld [vmem:[#allocation3 + $0x28] ss:$16 sps:$4 sm:$0xff]   ;;  %v5279_v36 = vld [vmem:[#allocation3 + $0x44] ss:$16 sps:$4 sm:$0xff]  }
 0x28a   :  { %1573 = vmatprep.subr.bf16.mxu0 %v5265_v11  ;;  %1614 = vmatprep.subr.bf16.mxu1 %v5268_v55  ;;  %6916 = vst [vmem:[#allocation24_spill] sm:$0xff] %v5276_v7  ;;  %6917 = vst [vmem:[#allocation25_spill] sm:$0xff] %v5279_v36  ;;  %v5282_v11 = vld [vmem:[#allocation3 + $0x4c] ss:$16 sps:$4 sm:$0xff]   ;;  %v5285_v55 = vld [vmem:[#allocation3 + $0x40] ss:$16 sps:$4 sm:$0xff]  }
 0x28b   :  { %1603 = vmatprep.mubr.bf16.mxu0 %v6782_v26  ;;  %1644 = vmatprep.mubr.bf16.mxu1 %v6782_v26  ;;  %6918 = vst [vmem:[#allocation26_spill] sm:$0xff] %v5282_v11  ;;  %6919 = vst [vmem:[#allocation27_spill] sm:$0xff] %v5285_v55 }
 0x28d   :  { %1574 = vmatpush1.bf16.msra.mxu0 %v5273_v13  ;;  %1615 = vmatpush1.bf16.msra.mxu1 %v5276_v7  ;;  %v5291_v13 = vld [vmem:[#allocation3 + $0x64] ss:$16 sps:$4 sm:$0xff]   ;;  %v5294_v7 = vld [vmem:[#allocation3 + $0x6c] ss:$16 sps:$4 sm:$0xff]  }
 0x28e   :  { %1575 = vmatprep.subr.bf16.mxu0 %v5279_v36  ;;  %1616 = vmatprep.subr.bf16.mxu1 %v5282_v11  ;;  %6921 = vst [vmem:[#allocation29_spill] sm:$0xff] %v5291_v13  ;;  %6922 = vst [vmem:[#allocation30_spill] sm:$0xff] %v5294_v7  ;;  %v5297_v36 = vld [vmem:[#allocation3 + $0x60] ss:$16 sps:$4 sm:$0xff]   ;;  %v5300_v11 = vld [vmem:[#allocation3 + $0x68] ss:$16 sps:$4 sm:$0xff]  }
 0x28f   :  { %6923 = vst [vmem:[#allocation31_spill] sm:$0xff] %v5297_v36  ;;  %6924 = vst [vmem:[#allocation32_spill] sm:$0xff] %v5300_v11 }
 0x291   :  { %1576 = vmatpush1.bf16.msra.mxu0 %v5285_v55  ;;  %1617 = vmatpush1.bf16.msra.mxu1 %v5288_v25  ;;  %v5303_v55 = vld [vmem:[#allocation3 + $0x84] ss:$16 sps:$4 sm:$0xff]   ;;  %v5306_v25 = vld [vmem:[#allocation3 + $0x8c] ss:$16 sps:$4 sm:$0xff]  }
 0x292   :  { %1577 = vmatprep.subr.bf16.mxu0 %v5291_v13  ;;  %1618 = vmatprep.subr.bf16.mxu1 %v5294_v7  ;;  %6925 = vst [vmem:[#allocation33_spill] sm:$0xff] %v5303_v55  ;;  %6926 = vst [vmem:[#allocation34_spill] sm:$0xff] %v5306_v25  ;;  %v5309_v13 = vld [vmem:[#allocation3 + $0x80] ss:$16 sps:$4 sm:$0xff]   ;;  %v5312_v7 = vld [vmem:[#allocation3 + $0x88] ss:$16 sps:$4 sm:$0xff]  }
 0x293   :  { %6927 = vst [vmem:[#allocation35_spill] sm:$0xff] %v5309_v13  ;;  %6928 = vst [vmem:[#allocation36_spill] sm:$0xff] %v5312_v7 }
 0x295   :  { %1578 = vmatpush1.bf16.msra.mxu0 %v5297_v36  ;;  %1619 = vmatpush1.bf16.msra.mxu1 %v5300_v11  ;;  %v5315_v36 = vld [vmem:[#allocation3 + $0xa4] ss:$16 sps:$4 sm:$0xff]   ;;  %v5318_v11 = vld [vmem:[#allocation3 + $0xac] ss:$16 sps:$4 sm:$0xff]  }
 0x296   :  { %1579 = vmatprep.subr.bf16.mxu0 %v5303_v55  ;;  %1620 = vmatprep.subr.bf16.mxu1 %v5306_v25  ;;  %6929 = vst [vmem:[#allocation37_spill] sm:$0xff] %v5315_v36  ;;  %6930 = vst [vmem:[#allocation38_spill] sm:$0xff] %v5318_v11  ;;  %v5321_v55 = vld [vmem:[#allocation3 + $0xa0] ss:$16 sps:$4 sm:$0xff]   ;;  %v5324_v25 = vld [vmem:[#allocation3 + $0xa8] ss:$16 sps:$4 sm:$0xff]  }
 0x297   :  { %6931 = vst [vmem:[#allocation69_spill] sm:$0xff] %v5321_v55  ;;  %6932 = vst [vmem:[#allocation70_spill] sm:$0xff] %v5324_v25 }
 0x299   :  { %1580 = vmatpush1.bf16.msra.mxu0 %v5309_v13  ;;  %1621 = vmatpush1.bf16.msra.mxu1 %v5312_v7  ;;  %v5327_v13 = vld [vmem:[#allocation3 + $0xc4] ss:$16 sps:$4 sm:$0xff]   ;;  %v5330_v7 = vld [vmem:[#allocation3 + $0xcc] ss:$16 sps:$4 sm:$0xff]  }
 0x29a   :  { %1581 = vmatprep.subr.bf16.mxu0 %v5315_v36  ;;  %1622 = vmatprep.subr.bf16.mxu1 %v5318_v11  ;;  %6933 = vst [vmem:[#allocation71_spill] sm:$0xff] %v5327_v13  ;;  %6934 = vst [vmem:[#allocation72_spill] sm:$0xff] %v5330_v7  ;;  %v5333_v36 = vld [vmem:[#allocation3 + $0xc0] ss:$16 sps:$4 sm:$0xff]   ;;  %v5336_v11 = vld [vmem:[#allocation3 + $0xc8] ss:$16 sps:$4 sm:$0xff]  }
 0x29d   :  { %1582 = vmatpush1.bf16.msra.mxu0 %v5321_v55  ;;  %1623 = vmatpush1.bf16.msra.mxu1 %v5324_v25  ;;  %v5339_v55 = vld [vmem:[#allocation3 + $0xe4] ss:$16 sps:$4 sm:$0xff]   ;;  %v5342_v25 = vld [vmem:[#allocation3 + $0xec] ss:$16 sps:$4 sm:$0xff]  }
 0x29e   :  { %1583 = vmatprep.subr.bf16.mxu0 %v5327_v13  ;;  %1624 = vmatprep.subr.bf16.mxu1 %v5330_v7  ;;  %v5345_v13 = vld [vmem:[#allocation3 + $0xe0] ss:$16 sps:$4 sm:$0xff]   ;;  %v5348_v7 = vld [vmem:[#allocation3 + $0xe8] ss:$16 sps:$4 sm:$0xff]  }
 0x2a1   :  { %1584 = vmatpush1.bf16.msra.mxu0 %v5333_v36  ;;  %1625 = vmatpush1.bf16.msra.mxu1 %v5336_v11 }
 0x2a2   :  { %1585 = vmatprep.subr.bf16.mxu0 %v5339_v55  ;;  %1626 = vmatprep.subr.bf16.mxu1 %v5342_v25 }
 0x2a5   :  { %1586 = vmatpush1.bf16.msra.mxu0 %v5345_v13  ;;  %1627 = vmatpush1.bf16.msra.mxu1 %v5348_v7 }
 0x2a6   :  { %1658 = vmatprep.subr.bf16.mxu0 %v4815_v58  ;;  %1699 = vmatprep.subr.bf16.mxu1 %v4817_v59 }
 0x2a8   :  { %1604 = vmatmul.mubr.bf16.vlgmr.msra.gmra.mrb[32].mxu0 %v5249_v47  ;;  %1645 = vmatmul.mubr.bf16.vlgmr.msra.gmra.mrb[32].mxu1 %v5249_v47 }
 0x2a9   :  { %1659 = vmatpush1.bf16.msra.mxu0 %v4819_v60  ;;  %1700 = vmatpush1.bf16.msra.mxu1 %v4821_v61 }
 0x2aa   :  { %1660 = vmatprep.subr.bf16.mxu0 %v4827_v62  ;;  %1701 = vmatprep.subr.bf16.mxu1 %v4829_v63 }
 0x2ab   :  { %1690 = vmatprep.mubr.bf16.mxu0 %v6782_v26  ;;  %1731 = vmatprep.mubr.bf16.mxu1 %v6782_v26 }
 0x2ad   :  { %1661 = vmatpush1.bf16.msra.mxu0 %v4831_v1  ;;  %1702 = vmatpush1.bf16.msra.mxu1 %v4833_v2 }
 0x2ae   :  { %1662 = vmatprep.subr.bf16.mxu0 %v6840_v19  ;;  %1703 = vmatprep.subr.bf16.mxu1 %v6841_v20 }
 0x2b1   :  { %1663 = vmatpush1.bf16.msra.mxu0 %v6842_v21  ;;  %1704 = vmatpush1.bf16.msra.mxu1 %v6843_v22 }
 0x2b2   :  { %1664 = vmatprep.subr.bf16.mxu0 %v6844_v23  ;;  %1705 = vmatprep.subr.bf16.mxu1 %v6845_v24 }
 0x2b5   :  { %1665 = vmatpush1.bf16.msra.mxu0 %v6846_v27  ;;  %1706 = vmatpush1.bf16.msra.mxu1 %v6847_v28 }
 0x2b6   :  { %1666 = vmatprep.subr.bf16.mxu0 %v6848_v30  ;;  %1707 = vmatprep.subr.bf16.mxu1 %v6849_v31 }
 0x2b9   :  { %1667 = vmatpush1.bf16.msra.mxu0 %v6850_v32  ;;  %1708 = vmatpush1.bf16.msra.mxu1 %v6851_v33 }
 0x2ba   :  { %1668 = vmatprep.subr.bf16.mxu0 %v6852_v34  ;;  %1709 = vmatprep.subr.bf16.mxu1 %v6853_v35 }
 0x2bd   :  { %1669 = vmatpush1.bf16.msra.mxu0 %v6854_v38  ;;  %1710 = vmatpush1.bf16.msra.mxu1 %v6855_v39 }
 0x2be   :  { %1670 = vmatprep.subr.bf16.mxu0 %v6856_v41  ;;  %1711 = vmatprep.subr.bf16.mxu1 %v6857_v42 }
 0x2c1   :  { %1671 = vmatpush1.bf16.msra.mxu0 %v6858_v43  ;;  %1712 = vmatpush1.bf16.msra.mxu1 %v6859_v44 }
 0x2c2   :  { %1672 = vmatprep.subr.bf16.mxu0 %v6860_v45  ;;  %1713 = vmatprep.subr.bf16.mxu1 %v6861_v46  ;;  %v6935_v46 = vld [vmem:[#allocation74_spill] sm:$0xff] }
 0x2c5   :  { %1673 = vmatpush1.bf16.msra.mxu0 %v6862_v49  ;;  %1714 = vmatpush1.bf16.msra.mxu1 %v6863_v50  ;;  %v6936_v50 = vld [vmem:[#allocation75_spill] sm:$0xff] }
 0x2c6   :  { %1765 = vmatprep.subr.bf16.mxu0 %v6864_v51  ;;  %1806 = vmatprep.subr.bf16.mxu1 %v6865_v52 }
 0x35b   :  { %v1490_v58 = vpop.f32.mrb[28].mxu0  ;;  %v1531_v59 = vpop.f32.mrb[28].mxu1 }
 0x35c   :  { %v3755_v60 = vadd.f32 %v1490_v58, %v5188_v57  ;;  %v1492_v61 = vpop.f32.mrb[29].mxu0  ;;  %v1533_v62 = vpop.f32.mrb[29].mxu1  ;;  %v3757_v27 = vadd.f32 %v1531_v59, %v5203_v40  ;;  %v6937_v58 = vld [vmem:[#allocation76_spill] sm:$0xff] }
 0x35d   :  { %v3756_v63 = vadd.f32 %v1492_v61, %v5192_v48  ;;  %v1494_v1 = vpop.f32.mrb[30].mxu0  ;;  %v1535_v2 = vpop.f32.mrb[30].mxu1  ;;  %v3758_v23 = vadd.f32 %v1533_v62, %v5198_v17 }
 0x35e   :  { %v3670_v19 = vmul.f32 -1.442695, %v3755_v60  ;;  %v1495_v20 = vpop.f32.mrb[31].mxu0  ;;  %v1536_v21 = vpop.f32.mrb[31].mxu1  ;;  %v6938_v60 = vld [vmem:[#allocation77_spill] sm:$0xff] }
 0x35f   :  { %v3671_v22 = vmul.f32 -1.442695, %v3756_v63  ;;  %v3672_v24 = vmul.f32 -1.442695, %v3758_v23 }
 0x360   :  { %4061 = vpow2.f32 %v3670_v19 }
 0x361   :  { %4063 = vpow2.f32 %v3671_v22 }
 0x362   :  { %4065 = vpow2.f32 %v3672_v24 }
 0x363   :  { %4067 = vtanh.f32 %v3757_v27 }
 0x36a   :  { %v4062_v28 = vpop.eup %4061 }
 0x36b   :  { %v4064_v30 = vpop.eup %4063  ;;  %v1545_v31 = vadd.f32 1.0, %v4062_v28 }
 0x36c   :  { %v1551_v32 = vadd.f32 1.0, %v4064_v30  ;;  %v4066_v33 = vpop.eup %4065 }
 0x36d   :  { %4069 = vrcp.f32 %v1545_v31  ;;  %v4068_v34 = vpop.eup %4067  ;;  %v1558_v41 = vadd.f32 1.0, %v4066_v33 }
 0x36e   :  { %4071 = vrcp.f32 %v1551_v32  ;;  %v6940_v32 = vld [vmem:[#allocation49_spill] sm:$0xff] }
 0x36f   :  { %4073 = vrcp.f32 %v1558_v41  ;;  %v6946_v41 = vld [vmem:[#allocation57_spill] sm:$0xff] }
 0x377   :  { %v4070_v35 = vpop.eup %4069 }
 0x378   :  { %v4072_v38 = vpop.eup %4071  ;;  %v1562_v39 = vmul.f32 %v4070_v35, %v4068_v34 }
 0x379   :  { %v1561_v42 = vmul.f32 %v4072_v38, %v5206_v54  ;;  %v4074_v20 = vpop.eup %4073  ;;  %v6944_v38 = vld [vmem:[#allocation55_spill] sm:$0xff] }
 0x37b   :  { %v5394_v43 = vadd.f32 %v1562_v39, %v1561_v42  ;;  %v1605_v44 = vpop.f32.mrb[32].mxu0  ;;  %v1646_v45 = vpop.f32.mrb[32].mxu1  ;;  %v6945_v39 = vld [vmem:[#allocation56_spill] sm:$0xff]  ;;  %v6950_v42 = vld [vmem:[#allocation61_spill] sm:$0xff] }
 0x37c   :  { %v1653_v49 = vadd.f32 %v1605_v44, %v6935_v46  ;;  %v1655_v51 = vadd.f32 %v1646_v45, %v6936_v50  ;;  %v1607_v52 = vpop.f32.mrb[33].mxu0  ;;  %v1648_v47 = vpop.f32.mrb[33].mxu1  ;;  %v6951_v44 = vld [vmem:[#allocation63_spill] sm:$0xff]  ;;  %v6952_v46 = vld [vmem:[#allocation66_spill] sm:$0xff] }
 0x37d   :  { %v1654_v59 = vadd.f32 %v1607_v52, %v6937_v58  ;;  %v1656_v61 = vadd.f32 %v1648_v47, %v6938_v60  ;;  %v1609_v62 = vpop.f32.mrb[34].mxu0  ;;  %v1650_v63 = vpop.f32.mrb[34].mxu1  ;;  %4075 = vtanh.f32 %v5394_v43  ;;  %v6954_v52 = vld [vmem:[#allocation18_spill] sm:$0xff]  ;;  %v6955_v47 = vld [vmem:[#allocation19_spill] sm:$0xff] }
 0x37e   :  { %v3673_v54 = vmul.f32 -1.442695, %v1653_v49  ;;  %v1610_v1 = vpop.f32.mrb[35].mxu0  ;;  %v1651_v2 = vpop.f32.mrb[35].mxu1  ;;  %v6958_v58 = vld [vmem:[#allocation22_spill] sm:$0xff]  ;;  %v6964_v62 = vld [vmem:[#allocation28_spill] sm:$0xff] }
 0x37f   :  { %v3674_v19 = vmul.f32 -1.442695, %v1654_v59  ;;  %v3675_v22 = vmul.f32 -1.442695, %v1656_v61  ;;  %v6961_v59 = vld [vmem:[#allocation25_spill] sm:$0xff]  ;;  %v6962_v60 = vld [vmem:[#allocation26_spill] sm:$0xff] }
 0x380   :  { %4077 = vpow2.f32 %v3673_v54  ;;  %v6963_v61 = vld [vmem:[#allocation27_spill] sm:$0xff]  ;;  %v6965_v63 = vld [vmem:[#allocation29_spill] sm:$0xff]  ;;  %v6966_v54 = vld [vmem:[#allocation30_spill] sm:$0xff] }
 0x381   :  { %4079 = vpow2.f32 %v3674_v19  ;;  %v6967_v1 = vld [vmem:[#allocation31_spill] sm:$0xff]  ;;  %v6968_v2 = vld [vmem:[#allocation32_spill] sm:$0xff]  ;;  %v6969_v19 = vld [vmem:[#allocation33_spill] sm:$0xff] }
 0x382   :  { %4081 = vpow2.f32 %v3675_v22  ;;  %v6972_v22 = vld [vmem:[#allocation36_spill] sm:$0xff] }
 0x383   :  { %4083 = vtanh.f32 %v1655_v51  ;;  %v6953_v51 = vld [vmem:[#allocation17_spill] sm:$0xff] }
 0x387   :  { %v4076_v21 = vpop.eup %4075 }
 0x388   :  { %v1565_v23 = vmul.f32 %v4076_v21, %v4074_v20  ;;  %v6970_v20 = vld [vmem:[#allocation34_spill] sm:$0xff]  ;;  %v6971_v21 = vld [vmem:[#allocation35_spill] sm:$0xff] }
 0x38a   :  { %v4078_v24 = vpop.eup %4077  ;;  %v1657_v27 = vpack.c.bf16 %v1565_v23, %v1565_v23  ;;  %v6973_v23 = vld [vmem:[#allocation37_spill] sm:$0xff] }
 0x38b   :  { %v4080_v28 = vpop.eup %4079  ;;  %v1743_v30 = vadd.f32 1.0, %v4078_v24  ;;  %v6974_v24 = vld [vmem:[#allocation38_spill] sm:$0xff] }
 0x38c   :  { %v1749_v31 = vadd.f32 1.0, %v4080_v28  ;;  %1691 = vmatmul.mubr.bf16.vlgmr.msra.gmra.mrb[36].mxu0 %v1657_v27  ;;  %1732 = vmatmul.mubr.bf16.vlgmr.msra.gmra.mrb[36].mxu1 %v1657_v27  ;;  %v6975_v27 = vld [vmem:[#allocation69_spill] sm:$0xff]  ;;  %v6976_v28 = vld [vmem:[#allocation70_spill] sm:$0xff] }
 0x38d   :  { %4085 = vrcp.f32 %v1743_v30  ;;  %1766 = vmatpush1.bf16.msra.mxu0 %v6879_v18  ;;  %1807 = vmatpush1.bf16.msra.mxu1 %v6880_v6  ;;  %v4082_v18 = vpop.eup %4081  ;;  %v6939_v6 = vld [vmem:[#allocation48_spill] sm:$0xff]  ;;  %v6977_v30 = vld [vmem:[#allocation71_spill] sm:$0xff] }
 0x38e   :  { %4087 = vrcp.f32 %v1749_v31  ;;  %1767 = vmatprep.subr.bf16.mxu0 %v6881_v53  ;;  %1808 = vmatprep.subr.bf16.mxu1 %v6882_v8  ;;  %v4084_v53 = vpop.eup %4083  ;;  %v6941_v8 = vld [vmem:[#allocation50_spill] sm:$0xff]  ;;  %v6978_v31 = vld [vmem:[#allocation72_spill] sm:$0xff] }
 0x38f   :  { %1797 = vmatprep.mubr.bf16.mxu0 %v6782_v26  ;;  %1838 = vmatprep.mubr.bf16.mxu1 %v6782_v26 }
 0x391   :  { %1768 = vmatpush1.bf16.msra.mxu0 %v6883_v4  ;;  %1809 = vmatpush1.bf16.msra.mxu1 %v6884_v15  ;;  %v1756_v4 = vadd.f32 1.0, %v4082_v18  ;;  %v5471_v18 = vld [vmem:[#allocation8 + $0x4] ss:$16 sps:$4 sm:$0xff]  }
 0x392   :  { %1769 = vmatprep.subr.bf16.mxu0 %v6885_v37  ;;  %1810 = vmatprep.subr.bf16.mxu1 %v6886_v5  ;;  %v6942_v37 = vld [vmem:[#allocation53_spill] sm:$0xff]  ;;  %v6943_v5 = vld [vmem:[#allocation54_spill] sm:$0xff] }
 0x393   :  { %4089 = vrcp.f32 %v1756_v4  ;;  %v5497_v4 = vld [vmem:[#allocation8 + $0x44] ss:$16 sps:$4 sm:$0xff]  }
 0x394   :  { %6979 = vst [vmem:[#allocation73_spill] sm:$0xff] %v5497_v4 }
 0x395   :  { %1770 = vmatpush1.bf16.msra.mxu0 %v6887_v9  ;;  %1811 = vmatpush1.bf16.msra.mxu1 %v6939_v6  ;;  %v5474_v6 = vld [vmem:[#allocation8 + $0xc] ss:$16 sps:$4 sm:$0xff]  }
 0x396   :  { %1771 = vmatprep.subr.bf16.mxu0 %v6940_v32  ;;  %1812 = vmatprep.subr.bf16.mxu1 %v6941_v8  ;;  %v5480_v32 = vld [vmem:[#allocation8 + $0x8] ss:$16 sps:$4 sm:$0xff]   ;;  %v5483_v8 = vld [vmem:[#allocation8 + $0x24] ss:$16 sps:$4 sm:$0xff]  }
 0x397   :  { %v4086_v33 = vpop.eup %4085 }
 0x398   :  { %v4088_v34 = vpop.eup %4087  ;;  %v1760_v35 = vmul.f32 %v4086_v33, %v4084_v53  ;;  %v5477_v53 = vld [vmem:[#allocation8] ss:$16 sps:$4 sm:$0xff]   ;;  %v5486_v33 = vld [vmem:[#allocation8 + $0x2c] ss:$16 sps:$4 sm:$0xff]  }
 0x399   :  { %v1759_v15 = vmul.f32 %v4088_v34, %v5232_v10  ;;  %1772 = vmatpush1.bf16.msra.mxu0 %v6891_v16  ;;  %1813 = vmatpush1.bf16.msra.mxu1 %v6892_v14  ;;  %v6947_v10 = vld [vmem:[#allocation58_spill] sm:$0xff]  ;;  %v6948_v16 = vld [vmem:[#allocation59_spill] sm:$0xff]  ;;  %v6949_v14 = vld [vmem:[#allocation60_spill] sm:$0xff] }
 0x39a   :  { %1773 = vmatprep.subr.bf16.mxu0 %v6942_v37  ;;  %1814 = vmatprep.subr.bf16.mxu1 %v6943_v5  ;;  %v5491_v34 = vld [vmem:[#allocation8 + $0x20] ss:$16 sps:$4 sm:$0xff]   ;;  %v5506_v5 = vld [vmem:[#allocation8 + $0x48] ss:$16 sps:$4 sm:$0xff]  }
 0x39b   :  { %v5420_v9 = vadd.f32 %v1760_v35, %v1759_v15  ;;  %v5494_v35 = vld [vmem:[#allocation8 + $0x28] ss:$16 sps:$4 sm:$0xff]   ;;  %v5500_v15 = vld [vmem:[#allocation8 + $0x4c] ss:$16 sps:$4 sm:$0xff]   ;;  %v5503_v37 = vld [vmem:[#allocation8 + $0x40] ss:$16 sps:$4 sm:$0xff]  }
 0x39c   :  { %6980 = vst [vmem:[#allocation39_spill] sm:$0xff] %v5500_v15  ;;  %6981 = vst [vmem:[#allocation40_spill] sm:$0xff] %v5503_v37 }
 0x39d   :  { %1774 = vmatpush1.bf16.msra.mxu0 %v6944_v38  ;;  %1815 = vmatpush1.bf16.msra.mxu1 %v6945_v39  ;;  %4091 = vtanh.f32 %v5420_v9  ;;  %v4090_v45 = vpop.eup %4089  ;;  %6982 = vst [vmem:[#allocation41_spill] sm:$0xff] %v5506_v5  ;;  %v5509_v38 = vld [vmem:[#allocation8 + $0x64] ss:$16 sps:$4 sm:$0xff]   ;;  %v5512_v39 = vld [vmem:[#allocation8 + $0x6c] ss:$16 sps:$4 sm:$0xff]  }
 0x39e   :  { %1775 = vmatprep.subr.bf16.mxu0 %v6946_v41  ;;  %1816 = vmatprep.subr.bf16.mxu1 %v6947_v10  ;;  %6983 = vst [vmem:[#allocation42_spill] sm:$0xff] %v5509_v38  ;;  %6984 = vst [vmem:[#allocation43_spill] sm:$0xff] %v5512_v39  ;;  %v5515_v41 = vld [vmem:[#allocation8 + $0x60] ss:$16 sps:$4 sm:$0xff]   ;;  %v5518_v10 = vld [vmem:[#allocation8 + $0x68] ss:$16 sps:$4 sm:$0xff]  }
 0x39f   :  { %6985 = vst [vmem:[#allocation44_spill] sm:$0xff] %v5515_v41  ;;  %6986 = vst [vmem:[#allocation45_spill] sm:$0xff] %v5518_v10 }
 0x3a1   :  { %1776 = vmatpush1.bf16.msra.mxu0 %v6948_v16  ;;  %1817 = vmatpush1.bf16.msra.mxu1 %v6949_v14  ;;  %v5521_v16 = vld [vmem:[#allocation8 + $0x84] ss:$16 sps:$4 sm:$0xff]   ;;  %v5524_v14 = vld [vmem:[#allocation8 + $0x8c] ss:$16 sps:$4 sm:$0xff]  }
 0x3a2   :  { %1777 = vmatprep.subr.bf16.mxu0 %v6950_v42  ;;  %1818 = vmatprep.subr.bf16.mxu1 %v6902_v0  ;;  %6987 = vst [vmem:[#allocation46_spill] sm:$0xff] %v5521_v16  ;;  %6988 = vst [vmem:[#allocation47_spill] sm:$0xff] %v5524_v14  ;;  %v5527_v42 = vld [vmem:[#allocation8 + $0x80] ss:$16 sps:$4 sm:$0xff]  }
 0x3a3   :  { %6989 = vst [vmem:[#allocation51_spill] sm:$0xff] %v5527_v42 }
 0x3a5   :  { %1778 = vmatpush1.bf16.msra.mxu0 %v6951_v44  ;;  %1819 = vmatpush1.bf16.msra.mxu1 %v6904_v29  ;;  %v6956_v29 = vld [vmem:[#allocation20_spill] sm:$0xff]  ;;  %v5530_v44 = vld [vmem:[#allocation8 + $0x88] ss:$16 sps:$4 sm:$0xff]  }
 0x3a6   :  { %1779 = vmatprep.subr.bf16.mxu0 %v6905_v12  ;;  %1820 = vmatprep.subr.bf16.mxu1 %v6952_v46  ;;  %v6957_v12 = vld [vmem:[#allocation21_spill] sm:$0xff]  ;;  %6990 = vst [vmem:[#allocation52_spill] sm:$0xff] %v5530_v44 }
 0x3a7   :  { %v4092_v49 = vpop.eup %4091  ;;  %v5536_v46 = vld [vmem:[#allocation8 + $0xac] ss:$16 sps:$4 sm:$0xff]  }
 0x3a8   :  { %v1763_v50 = vmul.f32 %v4092_v49, %v4090_v45  ;;  %v5533_v45 = vld [vmem:[#allocation8 + $0xa4] ss:$16 sps:$4 sm:$0xff]   ;;  %6992 = vst [vmem:[#allocation64_spill] sm:$0xff] %v5536_v46  ;;  %v5539_v49 = vld [vmem:[#allocation8 + $0xa0] ss:$16 sps:$4 sm:$0xff]  }
 0x3a9   :  { %1780 = vmatpush1.bf16.msra.mxu0 %v6907_v3  ;;  %1821 = vmatpush1.bf16.msra.mxu1 %v6908_v56  ;;  %v6959_v3 = vld [vmem:[#allocation23_spill] sm:$0xff]  ;;  %v6960_v56 = vld [vmem:[#allocation24_spill] sm:$0xff]  ;;  %6991 = vst [vmem:[#allocation62_spill] sm:$0xff] %v5533_v45  ;;  %6993 = vst [vmem:[#allocation65_spill] sm:$0xff] %v5539_v49 }
 0x3aa   :  { %1880 = vmatprep.subr.bf16.mxu0 %v6953_v51  ;;  %1921 = vmatprep.subr.bf16.mxu1 %v6954_v52  ;;  %v1764_v0 = vpack.c.bf16 %v1763_v50, %v1763_v50  ;;  %v5542_v50 = vld [vmem:[#allocation8 + $0xa8] ss:$16 sps:$4 sm:$0xff]  }
 0x3ab   :  { %6994 = vst [vmem:[#allocation67_spill] sm:$0xff] %v5542_v50 }
 0x3ac   :  { %1798 = vmatmul.mubr.bf16.vlgmr.msra.gmra.mrb[36].mxu0 %v1764_v0  ;;  %1839 = vmatmul.mubr.bf16.vlgmr.msra.gmra.mrb[36].mxu1 %v1764_v0 }
 0x3ad   :  { %1881 = vmatpush1.bf16.msra.mxu0 %v6955_v47  ;;  %1922 = vmatpush1.bf16.msra.mxu1 %v6956_v29 }
 0x3ae   :  { %1882 = vmatprep.subr.bf16.mxu0 %v6957_v12  ;;  %1923 = vmatprep.subr.bf16.mxu1 %v6958_v58 }
 0x3af   :  { %1912 = vmatprep.mubr.bf16.mxu0 %v6782_v26  ;;  %1953 = vmatprep.mubr.bf16.mxu1 %v6782_v26 }
 0x3b1   :  { %1883 = vmatpush1.bf16.msra.mxu0 %v6959_v3  ;;  %1924 = vmatpush1.bf16.msra.mxu1 %v6960_v56 }
 0x3b2   :  { %1884 = vmatprep.subr.bf16.mxu0 %v6961_v59  ;;  %1925 = vmatprep.subr.bf16.mxu1 %v6962_v60 }
 0x3b5   :  { %1885 = vmatpush1.bf16.msra.mxu0 %v6963_v61  ;;  %1926 = vmatpush1.bf16.msra.mxu1 %v6964_v62 }
 0x3b6   :  { %1886 = vmatprep.subr.bf16.mxu0 %v6965_v63  ;;  %1927 = vmatprep.subr.bf16.mxu1 %v6966_v54 }
 0x3b9   :  { %1887 = vmatpush1.bf16.msra.mxu0 %v6967_v1  ;;  %1928 = vmatpush1.bf16.msra.mxu1 %v6968_v2 }
 0x3ba   :  { %1888 = vmatprep.subr.bf16.mxu0 %v6969_v19  ;;  %1929 = vmatprep.subr.bf16.mxu1 %v6970_v20 }
 0x3bd   :  { %1889 = vmatpush1.bf16.msra.mxu0 %v6971_v21  ;;  %1930 = vmatpush1.bf16.msra.mxu1 %v6972_v22 }
 0x3be   :  { %1890 = vmatprep.subr.bf16.mxu0 %v6973_v23  ;;  %1931 = vmatprep.subr.bf16.mxu1 %v6974_v24 }
 0x3c1   :  { %1891 = vmatpush1.bf16.msra.mxu0 %v6975_v27  ;;  %1932 = vmatpush1.bf16.msra.mxu1 %v6976_v28 }
 0x3c2   :  { %1892 = vmatprep.subr.bf16.mxu0 %v6977_v30  ;;  %1933 = vmatprep.subr.bf16.mxu1 %v6978_v31 }
 0x3c5   :  { %1893 = vmatpush1.bf16.msra.mxu0 %v5333_v36  ;;  %1934 = vmatpush1.bf16.msra.mxu1 %v5336_v11 }
 0x3c6   :  { %1894 = vmatprep.subr.bf16.mxu0 %v5339_v55  ;;  %1935 = vmatprep.subr.bf16.mxu1 %v5342_v25 }
 0x3c9   :  { %1895 = vmatpush1.bf16.msra.mxu0 %v5345_v13  ;;  %1936 = vmatpush1.bf16.msra.mxu1 %v5348_v7 }
 0x3ca   :  { %1967 = vmatprep.subr.bf16.mxu0 %v5471_v18  ;;  %2008 = vmatprep.subr.bf16.mxu1 %v5474_v6 }
 0x3cc   :  { %1913 = vmatmul.mubr.bf16.vlgmr.msra.gmra.mrb[40].mxu0 %v1764_v0  ;;  %1954 = vmatmul.mubr.bf16.vlgmr.msra.gmra.mrb[40].mxu1 %v1764_v0  ;;  %v5545_v0 = vld [vmem:[#allocation8 + $0xc4] ss:$16 sps:$4 sm:$0xff]  }
 0x3cd   :  { %1968 = vmatpush1.bf16.msra.mxu0 %v5477_v53  ;;  %2009 = vmatpush1.bf16.msra.mxu1 %v5480_v32  ;;  %6995 = vst [vmem:[#allocation68_spill] sm:$0xff] %v5545_v0 }
 0x3ce   :  { %1969 = vmatprep.subr.bf16.mxu0 %v5483_v8  ;;  %2010 = vmatprep.subr.bf16.mxu1 %v5486_v33 }
 0x3cf   :  { %1999 = vmatprep.mubr.bf16.mxu0 %v6782_v26  ;;  %2040 = vmatprep.mubr.bf16.mxu1 %v6782_v26 }
 0x3d1   :  { %1970 = vmatpush1.bf16.msra.mxu0 %v5491_v34  ;;  %2011 = vmatpush1.bf16.msra.mxu1 %v5494_v35 }
 0x3d2   :  { %1971 = vmatprep.subr.bf16.mxu0 %v5497_v4  ;;  %2012 = vmatprep.subr.bf16.mxu1 %v5500_v15 }
 0x3d5   :  { %1972 = vmatpush1.bf16.msra.mxu0 %v5503_v37  ;;  %2013 = vmatpush1.bf16.msra.mxu1 %v5506_v5 }
 0x3d6   :  { %1973 = vmatprep.subr.bf16.mxu0 %v5509_v38  ;;  %2014 = vmatprep.subr.bf16.mxu1 %v5512_v39 }
 0x3d9   :  { %1974 = vmatpush1.bf16.msra.mxu0 %v5515_v41  ;;  %2015 = vmatpush1.bf16.msra.mxu1 %v5518_v10 }
 0x3da   :  { %1975 = vmatprep.subr.bf16.mxu0 %v5521_v16  ;;  %2016 = vmatprep.subr.bf16.mxu1 %v5524_v14 }
 0x3dd   :  { %1976 = vmatpush1.bf16.msra.mxu0 %v5527_v42  ;;  %2017 = vmatpush1.bf16.msra.mxu1 %v5530_v44  ;;  %v5548_v44 = vld [vmem:[#allocation8 + $0xcc] ss:$16 sps:$4 sm:$0xff]  }
 0x3de   :  { %1977 = vmatprep.subr.bf16.mxu0 %v5533_v45  ;;  %2018 = vmatprep.subr.bf16.mxu1 %v5536_v46  ;;  %6996 = vst [vmem:[#allocation74_spill] sm:$0xff] %v5548_v44  ;;  %v5551_v45 = vld [vmem:[#allocation8 + $0xc0] ss:$16 sps:$4 sm:$0xff]   ;;  %v5554_v46 = vld [vmem:[#allocation8 + $0xc8] ss:$16 sps:$4 sm:$0xff]  }
 0x3df   :  { %6997 = vst [vmem:[#allocation75_spill] sm:$0xff] %v5551_v45  ;;  %6998 = vst [vmem:[#allocation76_spill] sm:$0xff] %v5554_v46 }
 0x3e1   :  { %1978 = vmatpush1.bf16.msra.mxu0 %v5539_v49  ;;  %2019 = vmatpush1.bf16.msra.mxu1 %v5542_v50  ;;  %v5557_v49 = vld [vmem:[#allocation8 + $0xe4] ss:$16 sps:$4 sm:$0xff]   ;;  %v5560_v50 = vld [vmem:[#allocation8 + $0xec] ss:$16 sps:$4 sm:$0xff]  }
 0x3e2   :  { %1979 = vmatprep.subr.bf16.mxu0 %v5545_v0  ;;  %2020 = vmatprep.subr.bf16.mxu1 %v5548_v44  ;;  %6999 = vst [vmem:[#allocation77_spill] sm:$0xff] %v5557_v49  ;;  %7000 = vst [vmem:[#allocation48_spill] sm:$0xff] %v5560_v50  ;;  %v5563_v0 = vld [vmem:[#allocation8 + $0xe0] ss:$16 sps:$4 sm:$0xff]   ;;  %v5566_v44 = vld [vmem:[#allocation8 + $0xe8] ss:$16 sps:$4 sm:$0xff]  }
 0x3e3   :  { %7001 = vst [vmem:[#allocation49_spill] sm:$0xff] %v5563_v0  ;;  %7002 = vst [vmem:[#allocation50_spill] sm:$0xff] %v5566_v44 }
 0x3e5   :  { %1980 = vmatpush1.bf16.msra.mxu0 %v5551_v45  ;;  %2021 = vmatpush1.bf16.msra.mxu1 %v5554_v46  ;;  %v5569_v45 = vld [vmem:[#allocation6 + $0x4] ss:$16 sps:$4 sm:$0xff]   ;;  %v5572_v46 = vld [vmem:[#allocation6 + $0xc] ss:$16 sps:$4 sm:$0xff]  }
 0x3e6   :  { %1981 = vmatprep.subr.bf16.mxu0 %v5557_v49  ;;  %2022 = vmatprep.subr.bf16.mxu1 %v5560_v50  ;;  %7003 = vst [vmem:[#allocation53_spill] sm:$0xff] %v5569_v45  ;;  %7004 = vst [vmem:[#allocation54_spill] sm:$0xff] %v5572_v46 }
 0x3e9   :  { %1982 = vmatpush1.bf16.msra.mxu0 %v5563_v0  ;;  %2023 = vmatpush1.bf16.msra.mxu1 %v5566_v44 }
 0x3ea   :  { %2074 = vmatprep.subr.bf16.mxu0 %v5569_v45  ;;  %2115 = vmatprep.subr.bf16.mxu1 %v5572_v46 }
 0x47f   :  { %v1799_v49 = vpop.f32.mrb[36].mxu0  ;;  %v1840_v42 = vpop.f32.mrb[36].mxu1 }
 0x480   :  { %v3759_v50 = vadd.f32 %v1799_v49, %v5188_v57  ;;  %v1801_v14 = vpop.f32.mrb[37].mxu0  ;;  %v1842_v16 = vpop.f32.mrb[37].mxu1  ;;  %v3761_v46 = vadd.f32 %v1840_v42, %v5203_v40  ;;  %v7008_v40 = vld [vmem:[#allocation81_spill] sm:$0xff] }
 0x481   :  { %v3760_v0 = vadd.f32 %v1801_v14, %v5192_v48  ;;  %v1803_v10 = vpop.f32.mrb[38].mxu0  ;;  %v1844_v41 = vpop.f32.mrb[38].mxu1  ;;  %v3762_v45 = vadd.f32 %v1842_v16, %v5198_v17 }
 0x482   :  { %v3676_v39 = vmul.f32 -1.442695, %v3759_v50  ;;  %v1804_v44 = vpop.f32.mrb[39].mxu0  ;;  %v1845_v38 = vpop.f32.mrb[39].mxu1  ;;  %v7005_v50 = vld [vmem:[#allocation78_spill] sm:$0xff] }
 0x483   :  { %v3677_v5 = vmul.f32 -1.442695, %v3760_v0  ;;  %v3678_v37 = vmul.f32 -1.442695, %v3762_v45 }
 0x484   :  { %4093 = vpow2.f32 %v3676_v39 }
 0x485   :  { %4095 = vpow2.f32 %v3677_v5 }
 0x486   :  { %4097 = vpow2.f32 %v3678_v37  ;;  %v7006_v37 = vld [vmem:[#allocation79_spill] sm:$0xff] }
 0x487   :  { %4099 = vtanh.f32 %v3761_v46 }
 0x48e   :  { %v4094_v15 = vpop.eup %4093 }
 0x48f   :  { %v4096_v4 = vpop.eup %4095  ;;  %v1854_v49 = vadd.f32 1.0, %v4094_v15 }
 0x490   :  { %v1860_v57 = vadd.f32 1.0, %v4096_v4  ;;  %v4098_v41 = vpop.eup %4097 }
 0x491   :  { %4101 = vrcp.f32 %v1854_v49  ;;  %v4100_v10 = vpop.eup %4099  ;;  %v1867_v39 = vadd.f32 1.0, %v4098_v41 }
 0x492   :  { %4103 = vrcp.f32 %v1860_v57  ;;  %v7007_v57 = vld [vmem:[#allocation80_spill] sm:$0xff] }
 0x493   :  { %4105 = vrcp.f32 %v1867_v39 }
 0x49b   :  { %v4102_v14 = vpop.eup %4101 }
 0x49c   :  { %v4104_v38 = vpop.eup %4103  ;;  %v1871_v44 = vmul.f32 %v4102_v14, %v4100_v10 }
 0x49d   :  { %v1870_v5 = vmul.f32 %v4104_v38, %v5394_v43 }
 0x49f   :  { %v5580_v16 = vadd.f32 %v1871_v44, %v1870_v5  ;;  %v1914_v45 = vpop.f32.mrb[40].mxu0  ;;  %v1955_v42 = vpop.f32.mrb[40].mxu1 }
 0x4a0   :  { %v1962_v15 = vadd.f32 %v1914_v45, %v7005_v50  ;;  %v1964_v46 = vadd.f32 %v1955_v42, %v7006_v37  ;;  %v1916_v4 = vpop.f32.mrb[41].mxu0  ;;  %v1957_v0 = vpop.f32.mrb[41].mxu1 }
 0x4a1   :  { %v1963_v49 = vadd.f32 %v1916_v4, %v7007_v57  ;;  %v1965_v17 = vadd.f32 %v1957_v0, %v7008_v40  ;;  %v1918_v48 = vpop.f32.mrb[42].mxu0  ;;  %v1959_v10 = vpop.f32.mrb[42].mxu1  ;;  %4107 = vtanh.f32 %v5580_v16  ;;  %v5587_v40 = vld [vmem:[#allocation6] ss:$16 sps:$4 sm:$0xff]   ;;  %v5596_v0 = vld [vmem:[#allocation6 + $0x2c] ss:$16 sps:$4 sm:$0xff]  }
 0x4a2   :  { %v3679_v43 = vmul.f32 -1.442695, %v1962_v15  ;;  %v1919_v41 = vpop.f32.mrb[43].mxu0  ;;  %v1960_v14 = vpop.f32.mrb[43].mxu1  ;;  %v5590_v15 = vld [vmem:[#allocation6 + $0x8] ss:$16 sps:$4 sm:$0xff]  }
 0x4a3   :  { %v3680_v38 = vmul.f32 -1.442695, %v1963_v49  ;;  %v4106_v44 = vpop.eup %4105  ;;  %v3681_v5 = vmul.f32 -1.442695, %v1965_v17  ;;  %v5593_v17 = vld [vmem:[#allocation6 + $0x24] ss:$16 sps:$4 sm:$0xff]  }
 0x4a4   :  { %4109 = vpow2.f32 %v3679_v43  ;;  %v5604_v57 = vld [vmem:[#allocation6 + $0x28] ss:$16 sps:$4 sm:$0xff]   ;;  %v5607_v49 = vld [vmem:[#allocation6 + $0x44] ss:$16 sps:$4 sm:$0xff]   ;;  %v5610_v10 = vld [vmem:[#allocation6 + $0x4c] ss:$16 sps:$4 sm:$0xff]  }
 0x4a5   :  { %4111 = vpow2.f32 %v3680_v38  ;;  %v5613_v41 = vld [vmem:[#allocation6 + $0x40] ss:$16 sps:$4 sm:$0xff]   ;;  %v5616_v14 = vld [vmem:[#allocation6 + $0x48] ss:$16 sps:$4 sm:$0xff]  }
 0x4a6   :  { %4113 = vpow2.f32 %v3681_v5  ;;  %7009 = vst [vmem:[#allocation55_spill] sm:$0xff] %v5616_v14 }
 0x4a7   :  { %4115 = vtanh.f32 %v1964_v46  ;;  %v5601_v46 = vld [vmem:[#allocation6 + $0x20] ss:$16 sps:$4 sm:$0xff]  }
 0x4ab   :  { %v4108_v39 = vpop.eup %4107 }
 0x4ac   :  { %v1874_v45 = vmul.f32 %v4108_v39, %v4106_v44  ;;  %v5619_v44 = vld [vmem:[#allocation6 + $0x64] ss:$16 sps:$4 sm:$0xff]   ;;  %v5622_v39 = vld [vmem:[#allocation6 + $0x6c] ss:$16 sps:$4 sm:$0xff]  }
 0x4ad   :  { %7010 = vst [vmem:[#allocation56_spill] sm:$0xff] %v5619_v44 }
 0x4ae   :  { %v4110_v42 = vpop.eup %4109  ;;  %v1966_v50 = vpack.c.bf16 %v1874_v45, %v1874_v45 }
 0x4af   :  { %v4112_v37 = vpop.eup %4111  ;;  %v2052_v4 = vadd.f32 1.0, %v4110_v42 }
 0x4b0   :  { %v2058_v48 = vadd.f32 1.0, %v4112_v37  ;;  %2000 = vmatmul.mubr.bf16.vlgmr.msra.gmra.mrb[44].mxu0 %v1966_v50  ;;  %2041 = vmatmul.mubr.bf16.vlgmr.msra.gmra.mrb[44].mxu1 %v1966_v50  ;;  %v4114_v43 = vpop.eup %4113 }
 0x4b1   :  { %4117 = vrcp.f32 %v2052_v4  ;;  %2075 = vmatpush1.bf16.msra.mxu0 %v5587_v40  ;;  %2116 = vmatpush1.bf16.msra.mxu1 %v5590_v15  ;;  %v4116_v38 = vpop.eup %4115  ;;  %v2065_v50 = vadd.f32 1.0, %v4114_v43  ;;  %v5626_v4 = vld [vmem:[#allocation6 + $0x60] ss:$16 sps:$4 sm:$0xff]   ;;  %v5643_v43 = vld [vmem:[#allocation6 + $0x88] ss:$16 sps:$4 sm:$0xff]  }
 0x4b2   :  { %4119 = vrcp.f32 %v2058_v48  ;;  %2076 = vmatprep.subr.bf16.mxu0 %v5593_v17  ;;  %2117 = vmatprep.subr.bf16.mxu1 %v5596_v0  ;;  %v5629_v48 = vld [vmem:[#allocation6 + $0x68] ss:$16 sps:$4 sm:$0xff]   ;;  %7013 = vst [vmem:[#allocation59_spill] sm:$0xff] %v5643_v43 }
 0x4b3   :  { %2106 = vmatprep.mubr.bf16.mxu0 %v6782_v26  ;;  %2147 = vmatprep.mubr.bf16.mxu1 %v6782_v26  ;;  %4121 = vrcp.f32 %v2065_v50  ;;  %v5656_v50 = vld [vmem:[#allocation6 + $0xa8] ss:$16 sps:$4 sm:$0xff]  }
 0x4b4   :  { %7017 = vst [vmem:[#allocation66_spill] sm:$0xff] %v5656_v50 }
 0x4b5   :  { %2077 = vmatpush1.bf16.msra.mxu0 %v5601_v46  ;;  %2118 = vmatpush1.bf16.msra.mxu1 %v5604_v57 }
 0x4b6   :  { %2078 = vmatprep.subr.bf16.mxu0 %v5607_v49  ;;  %2119 = vmatprep.subr.bf16.mxu1 %v5610_v10 }
 0x4b9   :  { %2079 = vmatpush1.bf16.msra.mxu0 %v5613_v41  ;;  %2120 = vmatpush1.bf16.msra.mxu1 %v5616_v14  ;;  %v5632_v14 = vld [vmem:[#allocation6 + $0x84] ss:$16 sps:$4 sm:$0xff]  }
 0x4ba   :  { %2080 = vmatprep.subr.bf16.mxu0 %v5619_v44  ;;  %2121 = vmatprep.subr.bf16.mxu1 %v5622_v39  ;;  %v5635_v44 = vld [vmem:[#allocation6 + $0x8c] ss:$16 sps:$4 sm:$0xff]  }
 0x4bb   :  { %v4118_v5 = vpop.eup %4117  ;;  %7011 = vst [vmem:[#allocation57_spill] sm:$0xff] %v5635_v44 }
 0x4bc   :  { %v4120_v45 = vpop.eup %4119  ;;  %v2069_v42 = vmul.f32 %v4118_v5, %v4116_v38  ;;  %v5647_v5 = vld [vmem:[#allocation6 + $0xa4] ss:$16 sps:$4 sm:$0xff]  }
 0x4bd   :  { %v2068_v37 = vmul.f32 %v4120_v45, %v5420_v9  ;;  %2081 = vmatpush1.bf16.msra.mxu0 %v5626_v4  ;;  %2122 = vmatpush1.bf16.msra.mxu1 %v5629_v48  ;;  %v5640_v9 = vld [vmem:[#allocation6 + $0x80] ss:$16 sps:$4 sm:$0xff]   ;;  %7014 = vst [vmem:[#allocation60_spill] sm:$0xff] %v5647_v5  ;;  %v5650_v45 = vld [vmem:[#allocation6 + $0xac] ss:$16 sps:$4 sm:$0xff]  }
 0x4be   :  { %2082 = vmatprep.subr.bf16.mxu0 %v5632_v14  ;;  %2123 = vmatprep.subr.bf16.mxu1 %v5635_v44  ;;  %7012 = vst [vmem:[#allocation58_spill] sm:$0xff] %v5640_v9  ;;  %7015 = vst [vmem:[#allocation61_spill] sm:$0xff] %v5650_v45 }
 0x4bf   :  { %v5638_v38 = vadd.f32 %v2069_v42, %v2068_v37  ;;  %v5653_v42 = vld [vmem:[#allocation6 + $0xa0] ss:$16 sps:$4 sm:$0xff]   ;;  %v5659_v37 = vld [vmem:[#allocation6 + $0xc4] ss:$16 sps:$4 sm:$0xff]  }
 0x4c0   :  { %7016 = vst [vmem:[#allocation63_spill] sm:$0xff] %v5653_v42  ;;  %7018 = vst [vmem:[#allocation17_spill] sm:$0xff] %v5659_v37 }
 0x4c1   :  { %2083 = vmatpush1.bf16.msra.mxu0 %v5640_v9  ;;  %2124 = vmatpush1.bf16.msra.mxu1 %v5643_v43  ;;  %4123 = vtanh.f32 %v5638_v38  ;;  %v5662_v43 = vld [vmem:[#allocation6 + $0xcc] ss:$16 sps:$4 sm:$0xff]   ;;  %v5671_v9 = vld [vmem:[#allocation6 + $0xe4] ss:$16 sps:$4 sm:$0xff]  }
 0x4c2   :  { %2084 = vmatprep.subr.bf16.mxu0 %v5647_v5  ;;  %2125 = vmatprep.subr.bf16.mxu1 %v5650_v45  ;;  %7019 = vst [vmem:[#allocation18_spill] sm:$0xff] %v5662_v43  ;;  %v5665_v5 = vld [vmem:[#allocation6 + $0xc0] ss:$16 sps:$4 sm:$0xff]   ;;  %v5668_v45 = vld [vmem:[#allocation6 + $0xc8] ss:$16 sps:$4 sm:$0xff]  }
 0x4c3   :  { %7020 = vst [vmem:[#allocation19_spill] sm:$0xff] %v5665_v5  ;;  %7021 = vst [vmem:[#allocation20_spill] sm:$0xff] %v5668_v45 }
 0x4c5   :  { %2085 = vmatpush1.bf16.msra.mxu0 %v5653_v42  ;;  %2126 = vmatpush1.bf16.msra.mxu1 %v5656_v50  ;;  %v4122_v42 = vpop.eup %4121  ;;  %v5674_v50 = vld [vmem:[#allocation6 + $0xec] ss:$16 sps:$4 sm:$0xff]  }
 0x4c6   :  { %2086 = vmatprep.subr.bf16.mxu0 %v5659_v37  ;;  %2127 = vmatprep.subr.bf16.mxu1 %v5662_v43  ;;  %v5677_v43 = vld [vmem:[#allocation6 + $0xe0] ss:$16 sps:$4 sm:$0xff]  }
 0x4c9   :  { %2087 = vmatpush1.bf16.msra.mxu0 %v5665_v5  ;;  %2128 = vmatpush1.bf16.msra.mxu1 %v5668_v45  ;;  %v5680_v5 = vld [vmem:[#allocation6 + $0xe8] ss:$16 sps:$4 sm:$0xff]  }
 0x4ca   :  { %2088 = vmatprep.subr.bf16.mxu0 %v5671_v9  ;;  %2129 = vmatprep.subr.bf16.mxu1 %v5674_v50 }
 0x4cb   :  { %v4124_v37 = vpop.eup %4123 }
 0x4cc   :  { %v2072_v44 = vmul.f32 %v4124_v37, %v4122_v42 }
 0x4cd   :  { %2089 = vmatpush1.bf16.msra.mxu0 %v5677_v43  ;;  %2130 = vmatpush1.bf16.msra.mxu1 %v5680_v5 }
 0x4ce   :  { %v2073_v45 = vpack.c.bf16 %v2072_v44, %v2072_v44  ;;  %2189 = vmatprep.subr.bf16.mxu0 %v6953_v51  ;;  %2230 = vmatprep.subr.bf16.mxu1 %v6954_v52  ;;  %v7028_v51 = vld [vmem:[#allocation44_spill] sm:$0xff]  ;;  %v7029_v52 = vld [vmem:[#allocation45_spill] sm:$0xff]  ;;  %v7049_v44 = vld [vmem:[#allocation14_spill] sm:$0xff] }
 0x4d0   :  { %2107 = vmatmul.mubr.bf16.vlgmr.msra.gmra.mrb[44].mxu0 %v2073_v45  ;;  %2148 = vmatmul.mubr.bf16.vlgmr.msra.gmra.mrb[44].mxu1 %v2073_v45 }
 0x4d1   :  { %2190 = vmatpush1.bf16.msra.mxu0 %v6955_v47  ;;  %2231 = vmatpush1.bf16.msra.mxu1 %v6956_v29  ;;  %v7030_v47 = vld [vmem:[#allocation46_spill] sm:$0xff]  ;;  %v7031_v29 = vld [vmem:[#allocation47_spill] sm:$0xff] }
 0x4d2   :  { %2191 = vmatprep.subr.bf16.mxu0 %v6957_v12  ;;  %2232 = vmatprep.subr.bf16.mxu1 %v6958_v58  ;;  %v7032_v12 = vld [vmem:[#allocation51_spill] sm:$0xff]  ;;  %v7033_v58 = vld [vmem:[#allocation52_spill] sm:$0xff] }
 0x4d3   :  { %2221 = vmatprep.mubr.bf16.mxu0 %v6782_v26  ;;  %2262 = vmatprep.mubr.bf16.mxu1 %v6782_v26 }
 0x4d5   :  { %2192 = vmatpush1.bf16.msra.mxu0 %v6959_v3  ;;  %2233 = vmatpush1.bf16.msra.mxu1 %v6960_v56  ;;  %v7034_v3 = vld [vmem:[#allocation62_spill] sm:$0xff]  ;;  %v7035_v56 = vld [vmem:[#allocation64_spill] sm:$0xff] }
 0x4d6   :  { %2193 = vmatprep.subr.bf16.mxu0 %v6961_v59  ;;  %2234 = vmatprep.subr.bf16.mxu1 %v6962_v60  ;;  %v7036_v59 = vld [vmem:[#allocation65_spill] sm:$0xff]  ;;  %v7037_v60 = vld [vmem:[#allocation67_spill] sm:$0xff] }
 0x4d9   :  { %2194 = vmatpush1.bf16.msra.mxu0 %v6963_v61  ;;  %2235 = vmatpush1.bf16.msra.mxu1 %v6964_v62  ;;  %v7038_v61 = vld [vmem:[#allocation68_spill] sm:$0xff]  ;;  %v7039_v62 = vld [vmem:[#allocation74_spill] sm:$0xff] }
 0x4da   :  { %2195 = vmatprep.subr.bf16.mxu0 %v6965_v63  ;;  %2236 = vmatprep.subr.bf16.mxu1 %v6966_v54  ;;  %v7040_v63 = vld [vmem:[#allocation75_spill] sm:$0xff]  ;;  %v7041_v54 = vld [vmem:[#allocation76_spill] sm:$0xff] }
 0x4dd   :  { %2196 = vmatpush1.bf16.msra.mxu0 %v6967_v1  ;;  %2237 = vmatpush1.bf16.msra.mxu1 %v6968_v2  ;;  %v7042_v1 = vld [vmem:[#allocation77_spill] sm:$0xff]  ;;  %v7043_v2 = vld [vmem:[#allocation48_spill] sm:$0xff] }
 0x4de   :  { %2197 = vmatprep.subr.bf16.mxu0 %v6969_v19  ;;  %2238 = vmatprep.subr.bf16.mxu1 %v6970_v20  ;;  %v7044_v19 = vld [vmem:[#allocation49_spill] sm:$0xff]  ;;  %v7045_v20 = vld [vmem:[#allocation50_spill] sm:$0xff] }
 0x4e1   :  { %2198 = vmatpush1.bf16.msra.mxu0 %v6971_v21  ;;  %2239 = vmatpush1.bf16.msra.mxu1 %v6972_v22  ;;  %v7046_v21 = vld [vmem:[#allocation53_spill] sm:$0xff]  ;;  %v7047_v22 = vld [vmem:[#allocation54_spill] sm:$0xff] }
 0x4e2   :  { %2199 = vmatprep.subr.bf16.mxu0 %v6973_v23  ;;  %2240 = vmatprep.subr.bf16.mxu1 %v6974_v24 }
 0x4e5   :  { %2200 = vmatpush1.bf16.msra.mxu0 %v6975_v27  ;;  %2241 = vmatpush1.bf16.msra.mxu1 %v6976_v28  ;;  %v7048_v27 = vld [vmem:[#allocation13_spill] sm:$0xff] }
 0x4e6   :  { %2201 = vmatprep.subr.bf16.mxu0 %v6977_v30  ;;  %2242 = vmatprep.subr.bf16.mxu1 %v6978_v31 }
 0x4e9   :  { %2202 = vmatpush1.bf16.msra.mxu0 %v5333_v36  ;;  %2243 = vmatpush1.bf16.msra.mxu1 %v5336_v11  ;;  %v7025_v36 = vld [vmem:[#allocation41_spill] sm:$0xff]  ;;  %v7026_v11 = vld [vmem:[#allocation42_spill] sm:$0xff] }
 0x4ea   :  { %2203 = vmatprep.subr.bf16.mxu0 %v5339_v55  ;;  %2244 = vmatprep.subr.bf16.mxu1 %v5342_v25  ;;  %v7023_v25 = vld [vmem:[#allocation39_spill] sm:$0xff] }
 0x4eb   :  { %v7027_v55 = vld [vmem:[#allocation43_spill] sm:$0xff] }
 0x4ed   :  { %2204 = vmatpush1.bf16.msra.mxu0 %v5345_v13  ;;  %2245 = vmatpush1.bf16.msra.mxu1 %v5348_v7  ;;  %v7022_v7 = vld [vmem:[#allocation73_spill] sm:$0xff]  ;;  %v7024_v13 = vld [vmem:[#allocation40_spill] sm:$0xff] }
 0x4ee   :  { %2276 = vmatprep.subr.bf16.mxu0 %v5471_v18  ;;  %2317 = vmatprep.subr.bf16.mxu1 %v5474_v6 }
 0x4f0   :  { %2222 = vmatmul.mubr.bf16.vlgmr.msra.gmra.mrb[48].mxu0 %v2073_v45  ;;  %2263 = vmatmul.mubr.bf16.vlgmr.msra.gmra.mrb[48].mxu1 %v2073_v45 }
 0x4f1   :  { %2277 = vmatpush1.bf16.msra.mxu0 %v5477_v53  ;;  %2318 = vmatpush1.bf16.msra.mxu1 %v5480_v32 }
 0x4f2   :  { %2278 = vmatprep.subr.bf16.mxu0 %v5483_v8  ;;  %2319 = vmatprep.subr.bf16.mxu1 %v5486_v33 }
 0x4f3   :  { %2308 = vmatprep.mubr.bf16.mxu0 %v6782_v26  ;;  %2349 = vmatprep.mubr.bf16.mxu1 %v6782_v26 }
 0x4f5   :  { %2279 = vmatpush1.bf16.msra.mxu0 %v5491_v34  ;;  %2320 = vmatpush1.bf16.msra.mxu1 %v5494_v35 }
 0x4f6   :  { %2280 = vmatprep.subr.bf16.mxu0 %v7022_v7  ;;  %2321 = vmatprep.subr.bf16.mxu1 %v7023_v25 }
 0x4f9   :  { %2281 = vmatpush1.bf16.msra.mxu0 %v7024_v13  ;;  %2322 = vmatpush1.bf16.msra.mxu1 %v7025_v36 }
 0x4fa   :  { %2282 = vmatprep.subr.bf16.mxu0 %v7026_v11  ;;  %2323 = vmatprep.subr.bf16.mxu1 %v7027_v55 }
 0x4fd   :  { %2283 = vmatpush1.bf16.msra.mxu0 %v7028_v51  ;;  %2324 = vmatpush1.bf16.msra.mxu1 %v7029_v52 }
 0x4fe   :  { %2284 = vmatprep.subr.bf16.mxu0 %v7030_v47  ;;  %2325 = vmatprep.subr.bf16.mxu1 %v7031_v29 }
 0x501   :  { %2285 = vmatpush1.bf16.msra.mxu0 %v7032_v12  ;;  %2326 = vmatpush1.bf16.msra.mxu1 %v7033_v58 }
 0x502   :  { %2286 = vmatprep.subr.bf16.mxu0 %v7034_v3  ;;  %2327 = vmatprep.subr.bf16.mxu1 %v7035_v56 }
 0x505   :  { %2287 = vmatpush1.bf16.msra.mxu0 %v7036_v59  ;;  %2328 = vmatpush1.bf16.msra.mxu1 %v7037_v60 }
 0x506   :  { %2288 = vmatprep.subr.bf16.mxu0 %v7038_v61  ;;  %2329 = vmatprep.subr.bf16.mxu1 %v7039_v62 }
 0x509   :  { %2289 = vmatpush1.bf16.msra.mxu0 %v7040_v63  ;;  %2330 = vmatpush1.bf16.msra.mxu1 %v7041_v54 }
 0x50a   :  { %2290 = vmatprep.subr.bf16.mxu0 %v7042_v1  ;;  %2331 = vmatprep.subr.bf16.mxu1 %v7043_v2 }
 0x50d   :  { %2291 = vmatpush1.bf16.msra.mxu0 %v7044_v19  ;;  %2332 = vmatpush1.bf16.msra.mxu1 %v7045_v20  ;;  %v7050_v20 = vld [vmem:[#allocation15_spill] sm:$0xff] }
 0x50e   :  { %2383 = vmatprep.subr.bf16.mxu0 %v7046_v21  ;;  %2424 = vmatprep.subr.bf16.mxu1 %v7047_v22  ;;  %v7051_v22 = vld [vmem:[#allocation16_spill] sm:$0xff] }
 0x5a3   :  { %v2108_v23 = vpop.f32.mrb[44].mxu0  ;;  %v2149_v24 = vpop.f32.mrb[44].mxu1 }
 0x5a4   :  { %v3763_v28 = vadd.f32 %v2108_v23, %v7048_v27  ;;  %v2110_v30 = vpop.f32.mrb[45].mxu0  ;;  %v2151_v31 = vpop.f32.mrb[45].mxu1  ;;  %v3765_v62 = vadd.f32 %v2149_v24, %v7051_v22  ;;  %v7055_v22 = vld [vmem:[#allocation85_spill] sm:$0xff] }
 0x5a5   :  { %v3764_v45 = vadd.f32 %v2110_v30, %v7049_v44  ;;  %v2112_v42 = vpop.f32.mrb[46].mxu0  ;;  %v2153_v37 = vpop.f32.mrb[46].mxu1  ;;  %v3766_v21 = vadd.f32 %v2151_v31, %v7050_v20 }
 0x5a6   :  { %v3682_v1 = vmul.f32 -1.442695, %v3763_v28  ;;  %v2113_v2 = vpop.f32.mrb[47].mxu0  ;;  %v2154_v54 = vpop.f32.mrb[47].mxu1  ;;  %v7052_v42 = vld [vmem:[#allocation82_spill] sm:$0xff] }
 0x5a7   :  { %v3683_v19 = vmul.f32 -1.442695, %v3764_v45  ;;  %v3684_v63 = vmul.f32 -1.442695, %v3766_v21 }
 0x5a8   :  { %4125 = vpow2.f32 %v3682_v1 }
 0x5a9   :  { %4127 = vpow2.f32 %v3683_v19 }
 0x5aa   :  { %4129 = vpow2.f32 %v3684_v63  ;;  %v7053_v63 = vld [vmem:[#allocation83_spill] sm:$0xff] }
 0x5ab   :  { %4131 = vtanh.f32 %v3765_v62 }
 0x5b2   :  { %v4126_v61 = vpop.eup %4125 }
 0x5b3   :  { %v4128_v60 = vpop.eup %4127  ;;  %v2163_v23 = vadd.f32 1.0, %v4126_v61 }
 0x5b4   :  { %v2169_v27 = vadd.f32 1.0, %v4128_v60  ;;  %v4130_v30 = vpop.eup %4129 }
 0x5b5   :  { %4133 = vrcp.f32 %v2163_v23  ;;  %v4132_v28 = vpop.eup %4131  ;;  %v2176_v1 = vadd.f32 1.0, %v4130_v30 }
 0x5b6   :  { %4135 = vrcp.f32 %v2169_v27  ;;  %v7054_v27 = vld [vmem:[#allocation84_spill] sm:$0xff] }
 0x5b7   :  { %4137 = vrcp.f32 %v2176_v1 }
 0x5bf   :  { %v4134_v2 = vpop.eup %4133 }
 0x5c0   :  { %v4136_v54 = vpop.eup %4135  ;;  %v2180_v45 = vmul.f32 %v4134_v2, %v4132_v28 }
 0x5c1   :  { %v2179_v19 = vmul.f32 %v4136_v54, %v5580_v16 }
 0x5c3   :  { %v5758_v31 = vadd.f32 %v2180_v45, %v2179_v19  ;;  %v2223_v21 = vpop.f32.mrb[48].mxu0  ;;  %v2264_v24 = vpop.f32.mrb[48].mxu1 }
 0x5c4   :  { %v2271_v61 = vadd.f32 %v2223_v21, %v7052_v42  ;;  %v2273_v62 = vadd.f32 %v2264_v24, %v7053_v63  ;;  %v2225_v60 = vpop.f32.mrb[49].mxu0  ;;  %v2266_v37 = vpop.f32.mrb[49].mxu1 }
 0x5c5   :  { %v2272_v23 = vadd.f32 %v2225_v60, %v7054_v27  ;;  %v2274_v20 = vadd.f32 %v2266_v37, %v7055_v22  ;;  %v2227_v44 = vpop.f32.mrb[50].mxu0  ;;  %v2268_v28 = vpop.f32.mrb[50].mxu1  ;;  %4139 = vtanh.f32 %v5758_v31 }
 0x5c6   :  { %v3685_v16 = vmul.f32 -1.442695, %v2271_v61  ;;  %v2228_v30 = vpop.f32.mrb[51].mxu0  ;;  %v2269_v2 = vpop.f32.mrb[51].mxu1  ;;  %v7056_v44 = vld [vmem:[#allocation55_spill] sm:$0xff] }
 0x5c7   :  { %v3686_v54 = vmul.f32 -1.442695, %v2272_v23  ;;  %v4138_v45 = vpop.eup %4137  ;;  %v3687_v19 = vmul.f32 -1.442695, %v2274_v20  ;;  %v7058_v30 = vld [vmem:[#allocation57_spill] sm:$0xff] }
 0x5c8   :  { %4141 = vpow2.f32 %v3685_v16 }
 0x5c9   :  { %4143 = vpow2.f32 %v3686_v54  ;;  %v7059_v54 = vld [vmem:[#allocation58_spill] sm:$0xff] }
 0x5ca   :  { %4145 = vpow2.f32 %v3687_v19  ;;  %v7063_v19 = vld [vmem:[#allocation63_spill] sm:$0xff] }
 0x5cb   :  { %4147 = vtanh.f32 %v2273_v62  ;;  %v7057_v62 = vld [vmem:[#allocation56_spill] sm:$0xff] }
 0x5cf   :  { %v4140_v1 = vpop.eup %4139 }
 0x5d0   :  { %v2183_v21 = vmul.f32 %v4140_v1, %v4138_v45  ;;  %v7060_v45 = vld [vmem:[#allocation59_spill] sm:$0xff]  ;;  %v7061_v1 = vld [vmem:[#allocation60_spill] sm:$0xff] }
 0x5d2   :  { %v4142_v24 = vpop.eup %4141  ;;  %v2275_v42 = vpack.c.bf16 %v2183_v21, %v2183_v21  ;;  %v7064_v21 = vld [vmem:[#allocation66_spill] sm:$0xff] }
 0x5d3   :  { %v4144_v63 = vpop.eup %4143  ;;  %v2361_v60 = vadd.f32 1.0, %v4142_v24  ;;  %v7065_v24 = vld [vmem:[#allocation17_spill] sm:$0xff] }
 0x5d4   :  { %v2367_v22 = vadd.f32 1.0, %v4144_v63  ;;  %2309 = vmatmul.mubr.bf16.vlgmr.msra.gmra.mrb[52].mxu0 %v2275_v42  ;;  %2350 = vmatmul.mubr.bf16.vlgmr.msra.gmra.mrb[52].mxu1 %v2275_v42  ;;  %v4146_v20 = vpop.eup %4145  ;;  %v7066_v42 = vld [vmem:[#allocation18_spill] sm:$0xff]  ;;  %v7067_v63 = vld [vmem:[#allocation19_spill] sm:$0xff] }
 0x5d5   :  { %4149 = vrcp.f32 %v2361_v60  ;;  %2384 = vmatpush1.bf16.msra.mxu0 %v5587_v40  ;;  %2425 = vmatpush1.bf16.msra.mxu1 %v5590_v15  ;;  %v4148_v61 = vpop.eup %4147  ;;  %v2374_v28 = vadd.f32 1.0, %v4146_v20  ;;  %v7068_v60 = vld [vmem:[#allocation20_spill] sm:$0xff] }
 0x5d6   :  { %4151 = vrcp.f32 %v2367_v22  ;;  %2385 = vmatprep.subr.bf16.mxu0 %v5593_v17  ;;  %2426 = vmatprep.subr.bf16.mxu1 %v5596_v0 }
 0x5d7   :  { %2415 = vmatprep.mubr.bf16.mxu0 %v6782_v26  ;;  %2456 = vmatprep.mubr.bf16.mxu1 %v6782_v26  ;;  %4153 = vrcp.f32 %v2374_v28  ;;  %v5811_v28 = vld [vmem:[#allocation3] ss:$16 sps:$4 sm:$0xff]  }
 0x5d8   :  { %7070 = vst [vmem:[#allocation22_spill] sm:$0xff] %v5811_v28 }
 0x5d9   :  { %2386 = vmatpush1.bf16.msra.mxu0 %v5601_v46  ;;  %2427 = vmatpush1.bf16.msra.mxu1 %v5604_v57 }
 0x5da   :  { %2387 = vmatprep.subr.bf16.mxu0 %v5607_v49  ;;  %2428 = vmatprep.subr.bf16.mxu1 %v5610_v10 }
 0x5dd   :  { %2388 = vmatpush1.bf16.msra.mxu0 %v5613_v41  ;;  %2429 = vmatpush1.bf16.msra.mxu1 %v7056_v44 }
 0x5de   :  { %2389 = vmatprep.subr.bf16.mxu0 %v7057_v62  ;;  %2430 = vmatprep.subr.bf16.mxu1 %v5622_v39 }
 0x5df   :  { %v4150_v37 = vpop.eup %4149 }
 0x5e0   :  { %v4152_v27 = vpop.eup %4151  ;;  %v2378_v23 = vmul.f32 %v4150_v37, %v4148_v61  ;;  %v5801_v37 = vld [vmem:[#allocation3 + $0x4] ss:$16 sps:$4 sm:$0xff]  }
 0x5e1   :  { %v2377_v16 = vmul.f32 %v4152_v27, %v5638_v38  ;;  %2390 = vmatpush1.bf16.msra.mxu0 %v5626_v4  ;;  %2431 = vmatpush1.bf16.msra.mxu1 %v5629_v48  ;;  %v7062_v38 = vld [vmem:[#allocation61_spill] sm:$0xff]  ;;  %v4154_v22 = vpop.eup %4153 }
 0x5e2   :  { %2391 = vmatprep.subr.bf16.mxu0 %v5632_v14  ;;  %2432 = vmatprep.subr.bf16.mxu1 %v7058_v30  ;;  %v5804_v27 = vld [vmem:[#allocation3 + $0xc] ss:$16 sps:$4 sm:$0xff]  }
 0x5e3   :  { %v5784_v2 = vadd.f32 %v2378_v23, %v2377_v16  ;;  %7069 = vst [vmem:[#allocation21_spill] sm:$0xff] %v5804_v27  ;;  %v5814_v16 = vld [vmem:[#allocation3 + $0x8] ss:$16 sps:$4 sm:$0xff]  }
 0x5e4   :  { %7071 = vst [vmem:[#allocation23_spill] sm:$0xff] %v5814_v16 }
 0x5e5   :  { %2392 = vmatpush1.bf16.msra.mxu0 %v7059_v54  ;;  %2433 = vmatpush1.bf16.msra.mxu1 %v7060_v45  ;;  %4155 = vtanh.f32 %v5784_v2 }
 0x5e6   :  { %2393 = vmatprep.subr.bf16.mxu0 %v7061_v1  ;;  %2434 = vmatprep.subr.bf16.mxu1 %v7062_v38 }
 0x5e9   :  { %2394 = vmatpush1.bf16.msra.mxu0 %v7063_v19  ;;  %2435 = vmatpush1.bf16.msra.mxu1 %v7064_v21 }
 0x5ea   :  { %2395 = vmatprep.subr.bf16.mxu0 %v7065_v24  ;;  %2436 = vmatprep.subr.bf16.mxu1 %v7066_v42 }
 0x5ed   :  { %2396 = vmatpush1.bf16.msra.mxu0 %v7067_v63  ;;  %2437 = vmatpush1.bf16.msra.mxu1 %v7068_v60 }
 0x5ee   :  { %2397 = vmatprep.subr.bf16.mxu0 %v5671_v9  ;;  %2438 = vmatprep.subr.bf16.mxu1 %v5674_v50 }
 0x5ef   :  { %v4156_v20 = vpop.eup %4155 }
 0x5f0   :  { %v2381_v61 = vmul.f32 %v4156_v20, %v4154_v22  ;;  %v5817_v22 = vld [vmem:[#allocation3 + $0x24] ss:$16 sps:$4 sm:$0xff]   ;;  %v5820_v20 = vld [vmem:[#allocation3 + $0x2c] ss:$16 sps:$4 sm:$0xff]  }
 0x5f1   :  { %2398 = vmatpush1.bf16.msra.mxu0 %v5677_v43  ;;  %2439 = vmatpush1.bf16.msra.mxu1 %v5680_v5  ;;  %7072 = vst [vmem:[#allocation24_spill] sm:$0xff] %v5817_v22  ;;  %7073 = vst [vmem:[#allocation25_spill] sm:$0xff] %v5820_v20 }
 0x5f2   :  { %2498 = vmatprep.subr.bf16.mxu0 %v5801_v37  ;;  %2539 = vmatprep.subr.bf16.mxu1 %v5804_v27  ;;  %v5807_v23 = vpack.c.bf16 %v2381_v61, %v2381_v61  ;;  %v5825_v61 = vld [vmem:[#allocation3 + $0x20] ss:$16 sps:$4 sm:$0xff]   ;;  %v5840_v27 = vld [vmem:[#allocation3 + $0x48] ss:$16 sps:$4 sm:$0xff]  }
 0x5f3   :  { %7074 = vst [vmem:[#allocation26_spill] sm:$0xff] %v5825_v61  ;;  %7079 = vst [vmem:[#allocation31_spill] sm:$0xff] %v5840_v27 }
 0x5f4   :  { %2416 = vmatmul.mubr.bf16.vlgmr.msra.gmra.mrb[52].mxu0 %v5807_v23  ;;  %2457 = vmatmul.mubr.bf16.vlgmr.msra.gmra.mrb[52].mxu1 %v5807_v23 }
 0x5f5   :  { %2499 = vmatpush1.bf16.msra.mxu0 %v5811_v28  ;;  %2540 = vmatpush1.bf16.msra.mxu1 %v5814_v16  ;;  %v5828_v28 = vld [vmem:[#allocation3 + $0x28] ss:$16 sps:$4 sm:$0xff]   ;;  %v5831_v16 = vld [vmem:[#allocation3 + $0x44] ss:$16 sps:$4 sm:$0xff]  }
 0x5f6   :  { %2500 = vmatprep.subr.bf16.mxu0 %v5817_v22  ;;  %2541 = vmatprep.subr.bf16.mxu1 %v5820_v20  ;;  %7075 = vst [vmem:[#allocation27_spill] sm:$0xff] %v5828_v28  ;;  %7076 = vst [vmem:[#allocation28_spill] sm:$0xff] %v5831_v16  ;;  %v5834_v22 = vld [vmem:[#allocation3 + $0x4c] ss:$16 sps:$4 sm:$0xff]   ;;  %v5837_v20 = vld [vmem:[#allocation3 + $0x40] ss:$16 sps:$4 sm:$0xff]  }
 0x5f7   :  { %2530 = vmatprep.mubr.bf16.mxu0 %v6782_v26  ;;  %2571 = vmatprep.mubr.bf16.mxu1 %v6782_v26  ;;  %7077 = vst [vmem:[#allocation29_spill] sm:$0xff] %v5834_v22  ;;  %7078 = vst [vmem:[#allocation30_spill] sm:$0xff] %v5837_v20 }
 0x5f9   :  { %2501 = vmatpush1.bf16.msra.mxu0 %v5825_v61  ;;  %2542 = vmatpush1.bf16.msra.mxu1 %v5828_v28  ;;  %v5843_v61 = vld [vmem:[#allocation3 + $0x64] ss:$16 sps:$4 sm:$0xff]   ;;  %v5846_v28 = vld [vmem:[#allocation3 + $0x6c] ss:$16 sps:$4 sm:$0xff]  }
 0x5fa   :  { %2502 = vmatprep.subr.bf16.mxu0 %v5831_v16  ;;  %2543 = vmatprep.subr.bf16.mxu1 %v5834_v22  ;;  %7080 = vst [vmem:[#allocation32_spill] sm:$0xff] %v5843_v61  ;;  %7081 = vst [vmem:[#allocation33_spill] sm:$0xff] %v5846_v28  ;;  %v5849_v16 = vld [vmem:[#allocation3 + $0x60] ss:$16 sps:$4 sm:$0xff]   ;;  %v5852_v22 = vld [vmem:[#allocation3 + $0x68] ss:$16 sps:$4 sm:$0xff]  }
 0x5fb   :  { %7082 = vst [vmem:[#allocation34_spill] sm:$0xff] %v5849_v16  ;;  %7083 = vst [vmem:[#allocation35_spill] sm:$0xff] %v5852_v22 }
 0x5fd   :  { %2503 = vmatpush1.bf16.msra.mxu0 %v5837_v20  ;;  %2544 = vmatpush1.bf16.msra.mxu1 %v5840_v27  ;;  %v5855_v20 = vld [vmem:[#allocation3 + $0x84] ss:$16 sps:$4 sm:$0xff]   ;;  %v5858_v27 = vld [vmem:[#allocation3 + $0x8c] ss:$16 sps:$4 sm:$0xff]  }
 0x5fe   :  { %2504 = vmatprep.subr.bf16.mxu0 %v5843_v61  ;;  %2545 = vmatprep.subr.bf16.mxu1 %v5846_v28  ;;  %7084 = vst [vmem:[#allocation36_spill] sm:$0xff] %v5855_v20  ;;  %7085 = vst [vmem:[#allocation37_spill] sm:$0xff] %v5858_v27  ;;  %v5861_v61 = vld [vmem:[#allocation3 + $0x80] ss:$16 sps:$4 sm:$0xff]   ;;  %v5864_v28 = vld [vmem:[#allocation3 + $0x88] ss:$16 sps:$4 sm:$0xff]  }
 0x5ff   :  { %7086 = vst [vmem:[#allocation38_spill] sm:$0xff] %v5861_v61  ;;  %7087 = vst [vmem:[#allocation69_spill] sm:$0xff] %v5864_v28 }
 0x601   :  { %2505 = vmatpush1.bf16.msra.mxu0 %v5849_v16  ;;  %2546 = vmatpush1.bf16.msra.mxu1 %v5852_v22  ;;  %v5867_v16 = vld [vmem:[#allocation3 + $0xa4] ss:$16 sps:$4 sm:$0xff]   ;;  %v5870_v22 = vld [vmem:[#allocation3 + $0xac] ss:$16 sps:$4 sm:$0xff]  }
 0x602   :  { %2506 = vmatprep.subr.bf16.mxu0 %v5855_v20  ;;  %2547 = vmatprep.subr.bf16.mxu1 %v5858_v27  ;;  %7088 = vst [vmem:[#allocation70_spill] sm:$0xff] %v5867_v16  ;;  %7089 = vst [vmem:[#allocation71_spill] sm:$0xff] %v5870_v22  ;;  %v5873_v20 = vld [vmem:[#allocation3 + $0xa0] ss:$16 sps:$4 sm:$0xff]   ;;  %v5876_v27 = vld [vmem:[#allocation3 + $0xa8] ss:$16 sps:$4 sm:$0xff]  }
 0x603   :  { %7090 = vst [vmem:[#allocation72_spill] sm:$0xff] %v5873_v20  ;;  %7091 = vst [vmem:[#allocation78_spill] sm:$0xff] %v5876_v27 }
 0x605   :  { %2507 = vmatpush1.bf16.msra.mxu0 %v5861_v61  ;;  %2548 = vmatpush1.bf16.msra.mxu1 %v5864_v28  ;;  %v5879_v61 = vld [vmem:[#allocation3 + $0xc4] ss:$16 sps:$4 sm:$0xff]   ;;  %v5882_v28 = vld [vmem:[#allocation3 + $0xcc] ss:$16 sps:$4 sm:$0xff]  }
 0x606   :  { %2508 = vmatprep.subr.bf16.mxu0 %v5867_v16  ;;  %2549 = vmatprep.subr.bf16.mxu1 %v5870_v22  ;;  %7092 = vst [vmem:[#allocation79_spill] sm:$0xff] %v5879_v61  ;;  %7093 = vst [vmem:[#allocation80_spill] sm:$0xff] %v5882_v28  ;;  %v5885_v16 = vld [vmem:[#allocation3 + $0xc0] ss:$16 sps:$4 sm:$0xff]   ;;  %v5888_v22 = vld [vmem:[#allocation3 + $0xc8] ss:$16 sps:$4 sm:$0xff]  }
 0x609   :  { %2509 = vmatpush1.bf16.msra.mxu0 %v5873_v20  ;;  %2550 = vmatpush1.bf16.msra.mxu1 %v5876_v27  ;;  %v5891_v20 = vld [vmem:[#allocation3 + $0xe4] ss:$16 sps:$4 sm:$0xff]   ;;  %v5894_v27 = vld [vmem:[#allocation3 + $0xec] ss:$16 sps:$4 sm:$0xff]  }
 0x60a   :  { %2510 = vmatprep.subr.bf16.mxu0 %v5879_v61  ;;  %2551 = vmatprep.subr.bf16.mxu1 %v5882_v28  ;;  %v5897_v61 = vld [vmem:[#allocation3 + $0xe0] ss:$16 sps:$4 sm:$0xff]   ;;  %v5900_v28 = vld [vmem:[#allocation3 + $0xe8] ss:$16 sps:$4 sm:$0xff]  }
 0x60d   :  { %2511 = vmatpush1.bf16.msra.mxu0 %v5885_v16  ;;  %2552 = vmatpush1.bf16.msra.mxu1 %v5888_v22 }
 0x60e   :  { %2512 = vmatprep.subr.bf16.mxu0 %v5891_v20  ;;  %2553 = vmatprep.subr.bf16.mxu1 %v5894_v27 }
 0x611   :  { %2513 = vmatpush1.bf16.msra.mxu0 %v5897_v61  ;;  %2554 = vmatpush1.bf16.msra.mxu1 %v5900_v28 }
 0x612   :  { %2585 = vmatprep.subr.bf16.mxu0 %v5471_v18  ;;  %2626 = vmatprep.subr.bf16.mxu1 %v5474_v6  ;;  %v7094_v18 = vld [vmem:[#allocation67_spill] sm:$0xff]  ;;  %v7095_v6 = vld [vmem:[#allocation68_spill] sm:$0xff] }
 0x614   :  { %2531 = vmatmul.mubr.bf16.vlgmr.msra.gmra.mrb[56].mxu0 %v5807_v23  ;;  %2572 = vmatmul.mubr.bf16.vlgmr.msra.gmra.mrb[56].mxu1 %v5807_v23 }
 0x615   :  { %2586 = vmatpush1.bf16.msra.mxu0 %v5477_v53  ;;  %2627 = vmatpush1.bf16.msra.mxu1 %v5480_v32  ;;  %v7096_v53 = vld [vmem:[#allocation74_spill] sm:$0xff]  ;;  %v7097_v32 = vld [vmem:[#allocation75_spill] sm:$0xff] }
 0x616   :  { %2587 = vmatprep.subr.bf16.mxu0 %v5483_v8  ;;  %2628 = vmatprep.subr.bf16.mxu1 %v5486_v33  ;;  %v7098_v8 = vld [vmem:[#allocation76_spill] sm:$0xff]  ;;  %v7099_v33 = vld [vmem:[#allocation77_spill] sm:$0xff] }
 0x617   :  { %2617 = vmatprep.mubr.bf16.mxu0 %v6782_v26  ;;  %2658 = vmatprep.mubr.bf16.mxu1 %v6782_v26 }
 0x619   :  { %2588 = vmatpush1.bf16.msra.mxu0 %v5491_v34  ;;  %2629 = vmatpush1.bf16.msra.mxu1 %v5494_v35  ;;  %v7100_v34 = vld [vmem:[#allocation48_spill] sm:$0xff]  ;;  %v7101_v35 = vld [vmem:[#allocation49_spill] sm:$0xff] }
 0x61a   :  { %2589 = vmatprep.subr.bf16.mxu0 %v7022_v7  ;;  %2630 = vmatprep.subr.bf16.mxu1 %v7023_v25  ;;  %v7102_v7 = vld [vmem:[#allocation50_spill] sm:$0xff]  ;;  %v7103_v25 = vld [vmem:[#allocation53_spill] sm:$0xff] }
 0x61d   :  { %2590 = vmatpush1.bf16.msra.mxu0 %v7024_v13  ;;  %2631 = vmatpush1.bf16.msra.mxu1 %v7025_v36  ;;  %v7104_v13 = vld [vmem:[#allocation54_spill] sm:$0xff] }
 0x61e   :  { %2591 = vmatprep.subr.bf16.mxu0 %v7026_v11  ;;  %2632 = vmatprep.subr.bf16.mxu1 %v7027_v55  ;;  %v7105_v55 = vld [vmem:[#allocation13_spill] sm:$0xff] }
 0x621   :  { %2592 = vmatpush1.bf16.msra.mxu0 %v7028_v51  ;;  %2633 = vmatpush1.bf16.msra.mxu1 %v7029_v52 }
 0x622   :  { %2593 = vmatprep.subr.bf16.mxu0 %v7030_v47  ;;  %2634 = vmatprep.subr.bf16.mxu1 %v7031_v29  ;;  %v7106_v29 = vld [vmem:[#allocation14_spill] sm:$0xff] }
 0x625   :  { %2594 = vmatpush1.bf16.msra.mxu0 %v7032_v12  ;;  %2635 = vmatpush1.bf16.msra.mxu1 %v7033_v58 }
 0x626   :  { %2595 = vmatprep.subr.bf16.mxu0 %v7034_v3  ;;  %2636 = vmatprep.subr.bf16.mxu1 %v7035_v56 }
 0x629   :  { %2596 = vmatpush1.bf16.msra.mxu0 %v7036_v59  ;;  %2637 = vmatpush1.bf16.msra.mxu1 %v7094_v18 }
 0x62a   :  { %2597 = vmatprep.subr.bf16.mxu0 %v7095_v6  ;;  %2638 = vmatprep.subr.bf16.mxu1 %v7096_v53  ;;  %v7107_v6 = vld [vmem:[#allocation15_spill] sm:$0xff] }
 0x62d   :  { %2598 = vmatpush1.bf16.msra.mxu0 %v7097_v32  ;;  %2639 = vmatpush1.bf16.msra.mxu1 %v7098_v8  ;;  %v7108_v8 = vld [vmem:[#allocation16_spill] sm:$0xff] }
 0x62e   :  { %2599 = vmatprep.subr.bf16.mxu0 %v7099_v33  ;;  %2640 = vmatprep.subr.bf16.mxu1 %v7100_v34 }
 0x631   :  { %2600 = vmatpush1.bf16.msra.mxu0 %v7101_v35  ;;  %2641 = vmatpush1.bf16.msra.mxu1 %v7102_v7 }
 0x632   :  { %2692 = vmatprep.subr.bf16.mxu0 %v7103_v25  ;;  %2733 = vmatprep.subr.bf16.mxu1 %v7104_v13 }
 0x6c7   :  { %v2417_v36 = vpop.f32.mrb[52].mxu0  ;;  %v2458_v11 = vpop.f32.mrb[52].mxu1 }
 0x6c8   :  { %v3767_v51 = vadd.f32 %v2417_v36, %v7105_v55  ;;  %v2419_v52 = vpop.f32.mrb[53].mxu0  ;;  %v2460_v47 = vpop.f32.mrb[53].mxu1  ;;  %v3769_v33 = vadd.f32 %v2458_v11, %v7108_v8 }
 0x6c9   :  { %v3768_v12 = vadd.f32 %v2419_v52, %v7106_v29  ;;  %v2421_v58 = vpop.f32.mrb[54].mxu0  ;;  %v2462_v3 = vpop.f32.mrb[54].mxu1  ;;  %v3770_v53 = vadd.f32 %v2460_v47, %v7107_v6 }
 0x6ca   :  { %v3688_v56 = vmul.f32 -1.442695, %v3767_v51  ;;  %v2422_v59 = vpop.f32.mrb[55].mxu0  ;;  %v2463_v23 = vpop.f32.mrb[55].mxu1 }
 0x6cb   :  { %v3689_v18 = vmul.f32 -1.442695, %v3768_v12  ;;  %v3690_v32 = vmul.f32 -1.442695, %v3770_v53  ;;  %v7109_v59 = vld [vmem:[#allocation86_spill] sm:$0xff] }
 0x6cc   :  { %4157 = vpow2.f32 %v3688_v56 }
 0x6cd   :  { %4159 = vpow2.f32 %v3689_v18  ;;  %v7110_v18 = vld [vmem:[#allocation87_spill] sm:$0xff] }
 0x6ce   :  { %4161 = vpow2.f32 %v3690_v32 }
 0x6cf   :  { %4163 = vtanh.f32 %v3769_v33 }
 0x6d6   :  { %v4158_v34 = vpop.eup %4157 }
 0x6d7   :  { %v4160_v35 = vpop.eup %4159  ;;  %v2472_v7 = vadd.f32 1.0, %v4158_v34  ;;  %v7111_v34 = vld [vmem:[#allocation88_spill] sm:$0xff] }
 0x6d8   :  { %v2478_v25 = vadd.f32 1.0, %v4160_v35  ;;  %v4162_v13 = vpop.eup %4161 }
 0x6d9   :  { %4165 = vrcp.f32 %v2472_v7  ;;  %v4164_v36 = vpop.eup %4163  ;;  %v2485_v58 = vadd.f32 1.0, %v4162_v13  ;;  %v7112_v7 = vld [vmem:[#allocation89_spill] sm:$0xff] }
 0x6da   :  { %4167 = vrcp.f32 %v2478_v25 }
 0x6db   :  { %4169 = vrcp.f32 %v2485_v58 }
 0x6e3   :  { %v4166_v51 = vpop.eup %4165 }
 0x6e4   :  { %v4168_v52 = vpop.eup %4167  ;;  %v2489_v12 = vmul.f32 %v4166_v51, %v4164_v36 }
 0x6e5   :  { %v2488_v3 = vmul.f32 %v4168_v52, %v5758_v31 }
 0x6e7   :  { %v5946_v47 = vadd.f32 %v2489_v12, %v2488_v3  ;;  %v2532_v56 = vpop.f32.mrb[56].mxu0  ;;  %v2573_v11 = vpop.f32.mrb[56].mxu1 }
 0x6e8   :  { %v2580_v23 = vadd.f32 %v2532_v56, %v7109_v59  ;;  %v2582_v53 = vadd.f32 %v2573_v11, %v7110_v18  ;;  %v2534_v32 = vpop.f32.mrb[57].mxu0  ;;  %v2575_v33 = vpop.f32.mrb[57].mxu1 }
 0x6e9   :  { %v2581_v35 = vadd.f32 %v2534_v32, %v7111_v34  ;;  %v2583_v25 = vadd.f32 %v2575_v33, %v7112_v7  ;;  %v2536_v8 = vpop.f32.mrb[58].mxu0  ;;  %v2577_v36 = vpop.f32.mrb[58].mxu1  ;;  %4171 = vtanh.f32 %v5946_v47  ;;  %v7134_v33 = vld [vmem:[#allocation72_spill] sm:$0xff]  ;;  %v7135_v34 = vld [vmem:[#allocation78_spill] sm:$0xff] }
 0x6ea   :  { %v3691_v31 = vmul.f32 -1.442695, %v2580_v23  ;;  %v2537_v13 = vpop.f32.mrb[59].mxu0  ;;  %v2578_v51 = vpop.f32.mrb[59].mxu1  ;;  %v7137_v7 = vld [vmem:[#allocation80_spill] sm:$0xff] }
 0x6eb   :  { %v3692_v52 = vmul.f32 -1.442695, %v2581_v35  ;;  %v4170_v12 = vpop.eup %4169  ;;  %v3693_v3 = vmul.f32 -1.442695, %v2583_v25  ;;  %v7136_v35 = vld [vmem:[#allocation79_spill] sm:$0xff] }
 0x6ec   :  { %4173 = vpow2.f32 %v3691_v31  ;;  %v6023_v25 = vld [vmem:[#allocation8 + $0x4] ss:$16 sps:$4 sm:$0xff]   ;;  %v6026_v36 = vld [vmem:[#allocation8 + $0xc] ss:$16 sps:$4 sm:$0xff]   ;;  %v6029_v31 = vld [vmem:[#allocation8] ss:$16 sps:$4 sm:$0xff]  }
 0x6ed   :  { %4175 = vpow2.f32 %v3692_v52  ;;  %v6032_v13 = vld [vmem:[#allocation8 + $0x8] ss:$16 sps:$4 sm:$0xff]   ;;  %v6035_v51 = vld [vmem:[#allocation8 + $0x24] ss:$16 sps:$4 sm:$0xff]   ;;  %v6038_v52 = vld [vmem:[#allocation8 + $0x2c] ss:$16 sps:$4 sm:$0xff]  }
 0x6ee   :  { %4177 = vpow2.f32 %v3693_v3  ;;  %v6049_v3 = vld [vmem:[#allocation8 + $0x44] ss:$16 sps:$4 sm:$0xff]  }
 0x6ef   :  { %4179 = vtanh.f32 %v2582_v53  ;;  %v7133_v53 = vld [vmem:[#allocation71_spill] sm:$0xff]  ;;  %7138 = vst [vmem:[#allocation81_spill] sm:$0xff] %v6049_v3 }
 0x6f3   :  { %v4172_v58 = vpop.eup %4171 }
 0x6f4   :  { %v2492_v56 = vmul.f32 %v4172_v58, %v4170_v12  ;;  %v6043_v12 = vld [vmem:[#allocation8 + $0x20] ss:$16 sps:$4 sm:$0xff]   ;;  %v6046_v58 = vld [vmem:[#allocation8 + $0x28] ss:$16 sps:$4 sm:$0xff]  }
 0x6f6   :  { %v4174_v11 = vpop.eup %4173  ;;  %v2584_v59 = vpack.c.bf16 %v2492_v56, %v2492_v56  ;;  %v6052_v56 = vld [vmem:[#allocation8 + $0x4c] ss:$16 sps:$4 sm:$0xff]  }
 0x6f7   :  { %v4176_v18 = vpop.eup %4175  ;;  %v2670_v32 = vadd.f32 1.0, %v4174_v11  ;;  %7139 = vst [vmem:[#allocation73_spill] sm:$0xff] %v6052_v56  ;;  %v6055_v11 = vld [vmem:[#allocation8 + $0x40] ss:$16 sps:$4 sm:$0xff]  }
 0x6f8   :  { %v2676_v8 = vadd.f32 1.0, %v4176_v18  ;;  %2618 = vmatmul.mubr.bf16.vlgmr.msra.gmra.mrb[60].mxu0 %v2584_v59  ;;  %2659 = vmatmul.mubr.bf16.vlgmr.msra.gmra.mrb[60].mxu1 %v2584_v59  ;;  %7140 = vst [vmem:[#allocation39_spill] sm:$0xff] %v6055_v11  ;;  %v6058_v59 = vld [vmem:[#allocation8 + $0x48] ss:$16 sps:$4 sm:$0xff]   ;;  %v6061_v18 = vld [vmem:[#allocation8 + $0x64] ss:$16 sps:$4 sm:$0xff]  }
 0x6f9   :  { %4181 = vrcp.f32 %v2670_v32  ;;  %2693 = vmatpush1.bf16.msra.mxu0 %v5587_v40  ;;  %2734 = vmatpush1.bf16.msra.mxu1 %v5590_v15  ;;  %v4178_v40 = vpop.eup %4177  ;;  %7141 = vst [vmem:[#allocation40_spill] sm:$0xff] %v6058_v59  ;;  %7142 = vst [vmem:[#allocation41_spill] sm:$0xff] %v6061_v18  ;;  %v6064_v32 = vld [vmem:[#allocation8 + $0x6c] ss:$16 sps:$4 sm:$0xff]  }
 0x6fa   :  { %4183 = vrcp.f32 %v2676_v8  ;;  %2694 = vmatprep.subr.bf16.mxu0 %v5593_v17  ;;  %2735 = vmatprep.subr.bf16.mxu1 %v5596_v0  ;;  %v4180_v15 = vpop.eup %4179  ;;  %7143 = vst [vmem:[#allocation42_spill] sm:$0xff] %v6064_v32  ;;  %v6067_v8 = vld [vmem:[#allocation8 + $0x60] ss:$16 sps:$4 sm:$0xff]  }
 0x6fb   :  { %2724 = vmatprep.mubr.bf16.mxu0 %v6782_v26  ;;  %2765 = vmatprep.mubr.bf16.mxu1 %v6782_v26  ;;  %7144 = vst [vmem:[#allocation43_spill] sm:$0xff] %v6067_v8 }
 0x6fd   :  { %2695 = vmatpush1.bf16.msra.mxu0 %v5601_v46  ;;  %2736 = vmatpush1.bf16.msra.mxu1 %v5604_v57  ;;  %v2683_v46 = vadd.f32 1.0, %v4178_v40  ;;  %v6070_v40 = vld [vmem:[#allocation8 + $0x68] ss:$16 sps:$4 sm:$0xff]  }
 0x6fe   :  { %2696 = vmatprep.subr.bf16.mxu0 %v5607_v49  ;;  %2737 = vmatprep.subr.bf16.mxu1 %v5610_v10  ;;  %7145 = vst [vmem:[#allocation44_spill] sm:$0xff] %v6070_v40 }
 0x6ff   :  { %4185 = vrcp.f32 %v2683_v46  ;;  %v6085_v46 = vld [vmem:[#allocation8 + $0xa4] ss:$16 sps:$4 sm:$0xff]  }
 0x700   :  { %7150 = vst [vmem:[#allocation52_spill] sm:$0xff] %v6085_v46 }
 0x701   :  { %2697 = vmatpush1.bf16.msra.mxu0 %v5613_v41  ;;  %2738 = vmatpush1.bf16.msra.mxu1 %v7056_v44  ;;  %v7115_v44 = vld [vmem:[#allocation23_spill] sm:$0xff] }
 0x702   :  { %2698 = vmatprep.subr.bf16.mxu0 %v7057_v62  ;;  %2739 = vmatprep.subr.bf16.mxu1 %v5622_v39  ;;  %v7120_v62 = vld [vmem:[#allocation28_spill] sm:$0xff] }
 0x703   :  { %v4182_v17 = vpop.eup %4181 }
 0x704   :  { %v4184_v0 = vpop.eup %4183  ;;  %v2687_v23 = vmul.f32 %v4182_v17, %v4180_v15  ;;  %v6073_v15 = vld [vmem:[#allocation8 + $0x84] ss:$16 sps:$4 sm:$0xff]   ;;  %v6076_v17 = vld [vmem:[#allocation8 + $0x8c] ss:$16 sps:$4 sm:$0xff]  }
 0x705   :  { %v2686_v57 = vmul.f32 %v4184_v0, %v5784_v2  ;;  %2699 = vmatpush1.bf16.msra.mxu0 %v5626_v4  ;;  %2740 = vmatpush1.bf16.msra.mxu1 %v5629_v48  ;;  %v7113_v4 = vld [vmem:[#allocation21_spill] sm:$0xff]  ;;  %v7114_v48 = vld [vmem:[#allocation22_spill] sm:$0xff]  ;;  %7146 = vst [vmem:[#allocation45_spill] sm:$0xff] %v6073_v15  ;;  %7147 = vst [vmem:[#allocation46_spill] sm:$0xff] %v6076_v17 }
 0x706   :  { %2700 = vmatprep.subr.bf16.mxu0 %v5632_v14  ;;  %2741 = vmatprep.subr.bf16.mxu1 %v7058_v30  ;;  %v7121_v30 = vld [vmem:[#allocation29_spill] sm:$0xff]  ;;  %v7122_v2 = vld [vmem:[#allocation30_spill] sm:$0xff] }
 0x707   :  { %v5972_v49 = vadd.f32 %v2687_v23, %v2686_v57  ;;  %v6079_v0 = vld [vmem:[#allocation8 + $0x80] ss:$16 sps:$4 sm:$0xff]   ;;  %v6082_v23 = vld [vmem:[#allocation8 + $0x88] ss:$16 sps:$4 sm:$0xff]   ;;  %v6088_v57 = vld [vmem:[#allocation8 + $0xac] ss:$16 sps:$4 sm:$0xff]  }
 0x708   :  { %7148 = vst [vmem:[#allocation47_spill] sm:$0xff] %v6079_v0  ;;  %7149 = vst [vmem:[#allocation51_spill] sm:$0xff] %v6082_v23 }
 0x709   :  { %2701 = vmatpush1.bf16.msra.mxu0 %v7059_v54  ;;  %2742 = vmatpush1.bf16.msra.mxu1 %v7060_v45  ;;  %4187 = vtanh.f32 %v5972_v49  ;;  %v4186_v10 = vpop.eup %4185  ;;  %v7123_v54 = vld [vmem:[#allocation31_spill] sm:$0xff]  ;;  %v7124_v45 = vld [vmem:[#allocation32_spill] sm:$0xff]  ;;  %7151 = vst [vmem:[#allocation62_spill] sm:$0xff] %v6088_v57 }
 0x70a   :  { %2702 = vmatprep.subr.bf16.mxu0 %v7061_v1  ;;  %2743 = vmatprep.subr.bf16.mxu1 %v7062_v38  ;;  %v7125_v1 = vld [vmem:[#allocation33_spill] sm:$0xff]  ;;  %v7126_v38 = vld [vmem:[#allocation34_spill] sm:$0xff] }
 0x70d   :  { %2703 = vmatpush1.bf16.msra.mxu0 %v7063_v19  ;;  %2744 = vmatpush1.bf16.msra.mxu1 %v7064_v21  ;;  %v7127_v19 = vld [vmem:[#allocation35_spill] sm:$0xff]  ;;  %v7128_v21 = vld [vmem:[#allocation36_spill] sm:$0xff] }
 0x70e   :  { %2704 = vmatprep.subr.bf16.mxu0 %v7065_v24  ;;  %2745 = vmatprep.subr.bf16.mxu1 %v7066_v42  ;;  %v7129_v24 = vld [vmem:[#allocation37_spill] sm:$0xff]  ;;  %v7130_v42 = vld [vmem:[#allocation38_spill] sm:$0xff] }
 0x711   :  { %2705 = vmatpush1.bf16.msra.mxu0 %v7067_v63  ;;  %2746 = vmatpush1.bf16.msra.mxu1 %v7068_v60  ;;  %v7131_v63 = vld [vmem:[#allocation69_spill] sm:$0xff]  ;;  %v7132_v60 = vld [vmem:[#allocation70_spill] sm:$0xff] }
 0x712   :  { %2706 = vmatprep.subr.bf16.mxu0 %v5671_v9  ;;  %2747 = vmatprep.subr.bf16.mxu1 %v5674_v50  ;;  %v7116_v9 = vld [vmem:[#allocation24_spill] sm:$0xff]  ;;  %v7117_v50 = vld [vmem:[#allocation25_spill] sm:$0xff] }
 0x713   :  { %v4188_v41 = vpop.eup %4187 }
 0x714   :  { %v2690_v14 = vmul.f32 %v4188_v41, %v4186_v10  ;;  %v6091_v10 = vld [vmem:[#allocation8 + $0xa0] ss:$16 sps:$4 sm:$0xff]   ;;  %v6094_v41 = vld [vmem:[#allocation8 + $0xa8] ss:$16 sps:$4 sm:$0xff]  }
 0x715   :  { %2707 = vmatpush1.bf16.msra.mxu0 %v5677_v43  ;;  %2748 = vmatpush1.bf16.msra.mxu1 %v5680_v5  ;;  %v7118_v43 = vld [vmem:[#allocation26_spill] sm:$0xff]  ;;  %v7119_v5 = vld [vmem:[#allocation27_spill] sm:$0xff]  ;;  %7152 = vst [vmem:[#allocation64_spill] sm:$0xff] %v6091_v10  ;;  %7153 = vst [vmem:[#allocation65_spill] sm:$0xff] %v6094_v41 }
 0x716   :  { %v2691_v39 = vpack.c.bf16 %v2690_v14, %v2690_v14  ;;  %2807 = vmatprep.subr.bf16.mxu0 %v5801_v37  ;;  %2848 = vmatprep.subr.bf16.mxu1 %v7113_v4  ;;  %v6097_v14 = vld [vmem:[#allocation8 + $0xc4] ss:$16 sps:$4 sm:$0xff]  }
 0x717   :  { %7154 = vst [vmem:[#allocation82_spill] sm:$0xff] %v6097_v14 }
 0x718   :  { %2725 = vmatmul.mubr.bf16.vlgmr.msra.gmra.mrb[60].mxu0 %v2691_v39  ;;  %2766 = vmatmul.mubr.bf16.vlgmr.msra.gmra.mrb[60].mxu1 %v2691_v39 }
 0x719   :  { %2808 = vmatpush1.bf16.msra.mxu0 %v7114_v48  ;;  %2849 = vmatpush1.bf16.msra.mxu1 %v7115_v44 }
 0x71a   :  { %2809 = vmatprep.subr.bf16.mxu0 %v7116_v9  ;;  %2850 = vmatprep.subr.bf16.mxu1 %v7117_v50 }
 0x71b   :  { %2839 = vmatprep.mubr.bf16.mxu0 %v6782_v26  ;;  %2880 = vmatprep.mubr.bf16.mxu1 %v6782_v26 }
 0x71d   :  { %2810 = vmatpush1.bf16.msra.mxu0 %v7118_v43  ;;  %2851 = vmatpush1.bf16.msra.mxu1 %v7119_v5 }
 0x71e   :  { %2811 = vmatprep.subr.bf16.mxu0 %v7120_v62  ;;  %2852 = vmatprep.subr.bf16.mxu1 %v7121_v30 }
 0x721   :  { %2812 = vmatpush1.bf16.msra.mxu0 %v7122_v2  ;;  %2853 = vmatpush1.bf16.msra.mxu1 %v7123_v54 }
 0x722   :  { %2813 = vmatprep.subr.bf16.mxu0 %v7124_v45  ;;  %2854 = vmatprep.subr.bf16.mxu1 %v7125_v1 }
 0x725   :  { %2814 = vmatpush1.bf16.msra.mxu0 %v7126_v38  ;;  %2855 = vmatpush1.bf16.msra.mxu1 %v7127_v19 }
 0x726   :  { %2815 = vmatprep.subr.bf16.mxu0 %v7128_v21  ;;  %2856 = vmatprep.subr.bf16.mxu1 %v7129_v24 }
 0x729   :  { %2816 = vmatpush1.bf16.msra.mxu0 %v7130_v42  ;;  %2857 = vmatpush1.bf16.msra.mxu1 %v7131_v63 }
 0x72a   :  { %2817 = vmatprep.subr.bf16.mxu0 %v7132_v60  ;;  %2858 = vmatprep.subr.bf16.mxu1 %v7133_v53 }
 0x72d   :  { %2818 = vmatpush1.bf16.msra.mxu0 %v7134_v33  ;;  %2859 = vmatpush1.bf16.msra.mxu1 %v7135_v34 }
 0x72e   :  { %2819 = vmatprep.subr.bf16.mxu0 %v7136_v35  ;;  %2860 = vmatprep.subr.bf16.mxu1 %v7137_v7 }
 0x731   :  { %2820 = vmatpush1.bf16.msra.mxu0 %v5885_v16  ;;  %2861 = vmatpush1.bf16.msra.mxu1 %v5888_v22 }
 0x732   :  { %2821 = vmatprep.subr.bf16.mxu0 %v5891_v20  ;;  %2862 = vmatprep.subr.bf16.mxu1 %v5894_v27 }
 0x735   :  { %2822 = vmatpush1.bf16.msra.mxu0 %v5897_v61  ;;  %2863 = vmatpush1.bf16.msra.mxu1 %v5900_v28 }
 0x736   :  { %2894 = vmatprep.subr.bf16.mxu0 %v6023_v25  ;;  %2935 = vmatprep.subr.bf16.mxu1 %v6026_v36 }
 0x738   :  { %2840 = vmatmul.mubr.bf16.vlgmr.msra.gmra.mrb[64].mxu0 %v2691_v39  ;;  %2881 = vmatmul.mubr.bf16.vlgmr.msra.gmra.mrb[64].mxu1 %v2691_v39  ;;  %v6100_v39 = vld [vmem:[#allocation8 + $0xcc] ss:$16 sps:$4 sm:$0xff]  }
 0x739   :  { %2895 = vmatpush1.bf16.msra.mxu0 %v6029_v31  ;;  %2936 = vmatpush1.bf16.msra.mxu1 %v6032_v13  ;;  %7155 = vst [vmem:[#allocation83_spill] sm:$0xff] %v6100_v39 }
 0x73a   :  { %2896 = vmatprep.subr.bf16.mxu0 %v6035_v51  ;;  %2937 = vmatprep.subr.bf16.mxu1 %v6038_v52 }
 0x73b   :  { %2926 = vmatprep.mubr.bf16.mxu0 %v6782_v26  ;;  %2967 = vmatprep.mubr.bf16.mxu1 %v6782_v26 }
 0x73d   :  { %2897 = vmatpush1.bf16.msra.mxu0 %v6043_v12  ;;  %2938 = vmatpush1.bf16.msra.mxu1 %v6046_v58 }
 0x73e   :  { %2898 = vmatprep.subr.bf16.mxu0 %v6049_v3  ;;  %2939 = vmatprep.subr.bf16.mxu1 %v6052_v56 }
 0x741   :  { %2899 = vmatpush1.bf16.msra.mxu0 %v6055_v11  ;;  %2940 = vmatpush1.bf16.msra.mxu1 %v6058_v59 }
 0x742   :  { %2900 = vmatprep.subr.bf16.mxu0 %v6061_v18  ;;  %2941 = vmatprep.subr.bf16.mxu1 %v6064_v32 }
 0x745   :  { %2901 = vmatpush1.bf16.msra.mxu0 %v6067_v8  ;;  %2942 = vmatpush1.bf16.msra.mxu1 %v6070_v40 }
 0x746   :  { %2902 = vmatprep.subr.bf16.mxu0 %v6073_v15  ;;  %2943 = vmatprep.subr.bf16.mxu1 %v6076_v17 }
 0x749   :  { %2903 = vmatpush1.bf16.msra.mxu0 %v6079_v0  ;;  %2944 = vmatpush1.bf16.msra.mxu1 %v6082_v23 }
 0x74a   :  { %2904 = vmatprep.subr.bf16.mxu0 %v6085_v46  ;;  %2945 = vmatprep.subr.bf16.mxu1 %v6088_v57  ;;  %v6103_v46 = vld [vmem:[#allocation8 + $0xc0] ss:$16 sps:$4 sm:$0xff]   ;;  %v6106_v57 = vld [vmem:[#allocation8 + $0xc8] ss:$16 sps:$4 sm:$0xff]  }
 0x74b   :  { %7156 = vst [vmem:[#allocation84_spill] sm:$0xff] %v6103_v46  ;;  %7157 = vst [vmem:[#allocation85_spill] sm:$0xff] %v6106_v57 }
 0x74d   :  { %2905 = vmatpush1.bf16.msra.mxu0 %v6091_v10  ;;  %2946 = vmatpush1.bf16.msra.mxu1 %v6094_v41  ;;  %v6109_v10 = vld [vmem:[#allocation8 + $0xe4] ss:$16 sps:$4 sm:$0xff]   ;;  %v6112_v41 = vld [vmem:[#allocation8 + $0xec] ss:$16 sps:$4 sm:$0xff]  }
 0x74e   :  { %2906 = vmatprep.subr.bf16.mxu0 %v6097_v14  ;;  %2947 = vmatprep.subr.bf16.mxu1 %v6100_v39  ;;  %7158 = vst [vmem:[#allocation55_spill] sm:$0xff] %v6109_v10  ;;  %7159 = vst [vmem:[#allocation56_spill] sm:$0xff] %v6112_v41  ;;  %v6115_v14 = vld [vmem:[#allocation8 + $0xe0] ss:$16 sps:$4 sm:$0xff]   ;;  %v6118_v39 = vld [vmem:[#allocation8 + $0xe8] ss:$16 sps:$4 sm:$0xff]  }
 0x74f   :  { %7160 = vst [vmem:[#allocation57_spill] sm:$0xff] %v6115_v14  ;;  %7161 = vst [vmem:[#allocation58_spill] sm:$0xff] %v6118_v39 }
 0x751   :  { %2907 = vmatpush1.bf16.msra.mxu0 %v6103_v46  ;;  %2948 = vmatpush1.bf16.msra.mxu1 %v6106_v57  ;;  %v6121_v46 = vld [vmem:[#allocation6 + $0x4] ss:$16 sps:$4 sm:$0xff]   ;;  %v6124_v57 = vld [vmem:[#allocation6 + $0xc] ss:$16 sps:$4 sm:$0xff]  }
 0x752   :  { %2908 = vmatprep.subr.bf16.mxu0 %v6109_v10  ;;  %2949 = vmatprep.subr.bf16.mxu1 %v6112_v41  ;;  %7162 = vst [vmem:[#allocation59_spill] sm:$0xff] %v6121_v46  ;;  %7163 = vst [vmem:[#allocation60_spill] sm:$0xff] %v6124_v57 }
 0x755   :  { %2909 = vmatpush1.bf16.msra.mxu0 %v6115_v14  ;;  %2950 = vmatpush1.bf16.msra.mxu1 %v6118_v39 }
 0x756   :  { %3001 = vmatprep.subr.bf16.mxu0 %v6121_v46  ;;  %3042 = vmatprep.subr.bf16.mxu1 %v6124_v57  ;;  %v7164_v57 = vld [vmem:[#allocation16_spill] sm:$0xff] }
 0x7eb   :  { %v2726_v10 = vpop.f32.mrb[60].mxu0  ;;  %v2767_v23 = vpop.f32.mrb[60].mxu1 }
 0x7ec   :  { %v3771_v41 = vadd.f32 %v2726_v10, %v7105_v55  ;;  %v2728_v0 = vpop.f32.mrb[61].mxu0  ;;  %v2769_v17 = vpop.f32.mrb[61].mxu1  ;;  %v3773_v11 = vadd.f32 %v2767_v23, %v7164_v57  ;;  %v7168_v57 = vld [vmem:[#allocation93_spill] sm:$0xff] }
 0x7ed   :  { %v3772_v14 = vadd.f32 %v2728_v0, %v7106_v29  ;;  %v2730_v15 = vpop.f32.mrb[62].mxu0  ;;  %v2771_v40 = vpop.f32.mrb[62].mxu1  ;;  %v3774_v46 = vadd.f32 %v2769_v17, %v7107_v6 }
 0x7ee   :  { %v3694_v8 = vmul.f32 -1.442695, %v3771_v41  ;;  %v2731_v39 = vpop.f32.mrb[63].mxu0  ;;  %v2772_v32 = vpop.f32.mrb[63].mxu1 }
 0x7ef   :  { %v3695_v18 = vmul.f32 -1.442695, %v3772_v14  ;;  %v3696_v59 = vmul.f32 -1.442695, %v3774_v46  ;;  %v7165_v14 = vld [vmem:[#allocation90_spill] sm:$0xff] }
 0x7f0   :  { %4189 = vpow2.f32 %v3694_v8 }
 0x7f1   :  { %4191 = vpow2.f32 %v3695_v18 }
 0x7f2   :  { %4193 = vpow2.f32 %v3696_v59  ;;  %v7166_v59 = vld [vmem:[#allocation91_spill] sm:$0xff] }
 0x7f3   :  { %4195 = vtanh.f32 %v3773_v11 }
 0x7fa   :  { %v4190_v56 = vpop.eup %4189 }
 0x7fb   :  { %v4192_v3 = vpop.eup %4191  ;;  %v2781_v10 = vadd.f32 1.0, %v4190_v56 }
 0x7fc   :  { %v2787_v55 = vadd.f32 1.0, %v4192_v3  ;;  %v4194_v40 = vpop.eup %4193 }
 0x7fd   :  { %4197 = vrcp.f32 %v2781_v10  ;;  %v4196_v15 = vpop.eup %4195  ;;  %v2794_v8 = vadd.f32 1.0, %v4194_v40 }
 0x7fe   :  { %4199 = vrcp.f32 %v2787_v55  ;;  %v7167_v55 = vld [vmem:[#allocation92_spill] sm:$0xff] }
 0x7ff   :  { %4201 = vrcp.f32 %v2794_v8 }
 0x807   :  { %v4198_v0 = vpop.eup %4197 }
 0x808   :  { %v4200_v32 = vpop.eup %4199  ;;  %v2798_v41 = vmul.f32 %v4198_v0, %v4196_v15 }
 0x809   :  { %v2797_v18 = vmul.f32 %v4200_v32, %v5946_v47 }
 0x80b   :  { %v6132_v17 = vadd.f32 %v2798_v41, %v2797_v18  ;;  %v2841_v46 = vpop.f32.mrb[64].mxu0  ;;  %v2882_v23 = vpop.f32.mrb[64].mxu1 }
 0x80c   :  { %v2889_v56 = vadd.f32 %v2841_v46, %v7165_v14  ;;  %v2891_v11 = vadd.f32 %v2882_v23, %v7166_v59  ;;  %v2843_v3 = vpop.f32.mrb[65].mxu0  ;;  %v2884_v39 = vpop.f32.mrb[65].mxu1 }
 0x80d   :  { %v2890_v10 = vadd.f32 %v2843_v3, %v7167_v55  ;;  %v2892_v6 = vadd.f32 %v2884_v39, %v7168_v57  ;;  %v2845_v29 = vpop.f32.mrb[66].mxu0  ;;  %v2886_v15 = vpop.f32.mrb[66].mxu1  ;;  %4203 = vtanh.f32 %v6132_v17  ;;  %v6139_v57 = vld [vmem:[#allocation6] ss:$16 sps:$4 sm:$0xff]   ;;  %v6148_v39 = vld [vmem:[#allocation6 + $0x2c] ss:$16 sps:$4 sm:$0xff]  }
 0x80e   :  { %v3697_v47 = vmul.f32 -1.442695, %v2889_v56  ;;  %v2846_v40 = vpop.f32.mrb[67].mxu0  ;;  %v2887_v0 = vpop.f32.mrb[67].mxu1  ;;  %v6142_v56 = vld [vmem:[#allocation6 + $0x8] ss:$16 sps:$4 sm:$0xff]  }
 0x80f   :  { %v3698_v32 = vmul.f32 -1.442695, %v2890_v10  ;;  %v4202_v41 = vpop.eup %4201  ;;  %v3699_v18 = vmul.f32 -1.442695, %v2892_v6  ;;  %v6145_v6 = vld [vmem:[#allocation6 + $0x24] ss:$16 sps:$4 sm:$0xff]  }
 0x810   :  { %4205 = vpow2.f32 %v3697_v47  ;;  %v6156_v55 = vld [vmem:[#allocation6 + $0x28] ss:$16 sps:$4 sm:$0xff]   ;;  %v6159_v10 = vld [vmem:[#allocation6 + $0x44] ss:$16 sps:$4 sm:$0xff]   ;;  %v6162_v15 = vld [vmem:[#allocation6 + $0x4c] ss:$16 sps:$4 sm:$0xff]  }
 0x811   :  { %4207 = vpow2.f32 %v3698_v32  ;;  %v6165_v40 = vld [vmem:[#allocation6 + $0x40] ss:$16 sps:$4 sm:$0xff]   ;;  %v6168_v0 = vld [vmem:[#allocation6 + $0x48] ss:$16 sps:$4 sm:$0xff]  }
 0x812   :  { %4209 = vpow2.f32 %v3699_v18  ;;  %7169 = vst [vmem:[#allocation61_spill] sm:$0xff] %v6168_v0 }
 0x813   :  { %4211 = vtanh.f32 %v2891_v11  ;;  %v6153_v11 = vld [vmem:[#allocation6 + $0x20] ss:$16 sps:$4 sm:$0xff]  }
 0x817   :  { %v4204_v8 = vpop.eup %4203 }
 0x818   :  { %v2801_v46 = vmul.f32 %v4204_v8, %v4202_v41  ;;  %v6171_v41 = vld [vmem:[#allocation6 + $0x64] ss:$16 sps:$4 sm:$0xff]   ;;  %v6174_v8 = vld [vmem:[#allocation6 + $0x6c] ss:$16 sps:$4 sm:$0xff]  }
 0x819   :  { %7170 = vst [vmem:[#allocation63_spill] sm:$0xff] %v6171_v41 }
 0x81a   :  { %v4206_v23 = vpop.eup %4205  ;;  %v2893_v14 = vpack.c.bf16 %v2801_v46, %v2801_v46 }
 0x81b   :  { %v4208_v59 = vpop.eup %4207  ;;  %v2979_v3 = vadd.f32 1.0, %v4206_v23 }
 0x81c   :  { %v2985_v29 = vadd.f32 1.0, %v4208_v59  ;;  %2927 = vmatmul.mubr.bf16.vlgmr.msra.gmra.mrb[68].mxu0 %v2893_v14  ;;  %2968 = vmatmul.mubr.bf16.vlgmr.msra.gmra.mrb[68].mxu1 %v2893_v14  ;;  %v4210_v47 = vpop.eup %4209 }
 0x81d   :  { %4213 = vrcp.f32 %v2979_v3  ;;  %3002 = vmatpush1.bf16.msra.mxu0 %v6139_v57  ;;  %3043 = vmatpush1.bf16.msra.mxu1 %v6142_v56  ;;  %v4212_v32 = vpop.eup %4211  ;;  %v2992_v14 = vadd.f32 1.0, %v4210_v47  ;;  %v6178_v3 = vld [vmem:[#allocation6 + $0x60] ss:$16 sps:$4 sm:$0xff]   ;;  %v6195_v47 = vld [vmem:[#allocation6 + $0x88] ss:$16 sps:$4 sm:$0xff]  }
 0x81e   :  { %4215 = vrcp.f32 %v2985_v29  ;;  %3003 = vmatprep.subr.bf16.mxu0 %v6145_v6  ;;  %3044 = vmatprep.subr.bf16.mxu1 %v6148_v39  ;;  %v6181_v29 = vld [vmem:[#allocation6 + $0x68] ss:$16 sps:$4 sm:$0xff]   ;;  %7173 = vst [vmem:[#allocation18_spill] sm:$0xff] %v6195_v47 }
 0x81f   :  { %3033 = vmatprep.mubr.bf16.mxu0 %v6782_v26  ;;  %3074 = vmatprep.mubr.bf16.mxu1 %v6782_v26  ;;  %4217 = vrcp.f32 %v2992_v14  ;;  %v6208_v14 = vld [vmem:[#allocation6 + $0xa8] ss:$16 sps:$4 sm:$0xff]  }
 0x820   :  { %7177 = vst [vmem:[#allocation68_spill] sm:$0xff] %v6208_v14 }
 0x821   :  { %3004 = vmatpush1.bf16.msra.mxu0 %v6153_v11  ;;  %3045 = vmatpush1.bf16.msra.mxu1 %v6156_v55 }
 0x822   :  { %3005 = vmatprep.subr.bf16.mxu0 %v6159_v10  ;;  %3046 = vmatprep.subr.bf16.mxu1 %v6162_v15 }
 0x825   :  { %3006 = vmatpush1.bf16.msra.mxu0 %v6165_v40  ;;  %3047 = vmatpush1.bf16.msra.mxu1 %v6168_v0  ;;  %v6184_v0 = vld [vmem:[#allocation6 + $0x84] ss:$16 sps:$4 sm:$0xff]  }
 0x826   :  { %3007 = vmatprep.subr.bf16.mxu0 %v6171_v41  ;;  %3048 = vmatprep.subr.bf16.mxu1 %v6174_v8  ;;  %v6187_v41 = vld [vmem:[#allocation6 + $0x8c] ss:$16 sps:$4 sm:$0xff]  }
 0x827   :  { %v4214_v18 = vpop.eup %4213  ;;  %7171 = vst [vmem:[#allocation66_spill] sm:$0xff] %v6187_v41 }
 0x828   :  { %v4216_v46 = vpop.eup %4215  ;;  %v2996_v23 = vmul.f32 %v4214_v18, %v4212_v32  ;;  %v6199_v18 = vld [vmem:[#allocation6 + $0xa4] ss:$16 sps:$4 sm:$0xff]  }
 0x829   :  { %v2995_v59 = vmul.f32 %v4216_v46, %v5972_v49  ;;  %3008 = vmatpush1.bf16.msra.mxu0 %v6178_v3  ;;  %3049 = vmatpush1.bf16.msra.mxu1 %v6181_v29  ;;  %v6192_v49 = vld [vmem:[#allocation6 + $0x80] ss:$16 sps:$4 sm:$0xff]   ;;  %7174 = vst [vmem:[#allocation19_spill] sm:$0xff] %v6199_v18  ;;  %v6202_v46 = vld [vmem:[#allocation6 + $0xac] ss:$16 sps:$4 sm:$0xff]  }
 0x82a   :  { %3009 = vmatprep.subr.bf16.mxu0 %v6184_v0  ;;  %3050 = vmatprep.subr.bf16.mxu1 %v6187_v41  ;;  %7172 = vst [vmem:[#allocation17_spill] sm:$0xff] %v6192_v49  ;;  %7175 = vst [vmem:[#allocation20_spill] sm:$0xff] %v6202_v46 }
 0x82b   :  { %v6190_v32 = vadd.f32 %v2996_v23, %v2995_v59  ;;  %v6205_v23 = vld [vmem:[#allocation6 + $0xa0] ss:$16 sps:$4 sm:$0xff]   ;;  %v6211_v59 = vld [vmem:[#allocation6 + $0xc4] ss:$16 sps:$4 sm:$0xff]  }
 0x82c   :  { %7176 = vst [vmem:[#allocation67_spill] sm:$0xff] %v6205_v23  ;;  %7178 = vst [vmem:[#allocation74_spill] sm:$0xff] %v6211_v59 }
 0x82d   :  { %3010 = vmatpush1.bf16.msra.mxu0 %v6192_v49  ;;  %3051 = vmatpush1.bf16.msra.mxu1 %v6195_v47  ;;  %4219 = vtanh.f32 %v6190_v32  ;;  %v6214_v47 = vld [vmem:[#allocation6 + $0xcc] ss:$16 sps:$4 sm:$0xff]   ;;  %v6223_v49 = vld [vmem:[#allocation6 + $0xe4] ss:$16 sps:$4 sm:$0xff]  }
 0x82e   :  { %3011 = vmatprep.subr.bf16.mxu0 %v6199_v18  ;;  %3052 = vmatprep.subr.bf16.mxu1 %v6202_v46  ;;  %7179 = vst [vmem:[#allocation75_spill] sm:$0xff] %v6214_v47  ;;  %v6217_v18 = vld [vmem:[#allocation6 + $0xc0] ss:$16 sps:$4 sm:$0xff]   ;;  %v6220_v46 = vld [vmem:[#allocation6 + $0xc8] ss:$16 sps:$4 sm:$0xff]  }
 0x82f   :  { %7180 = vst [vmem:[#allocation76_spill] sm:$0xff] %v6217_v18  ;;  %7181 = vst [vmem:[#allocation77_spill] sm:$0xff] %v6220_v46 }
 0x831   :  { %3012 = vmatpush1.bf16.msra.mxu0 %v6205_v23  ;;  %3053 = vmatpush1.bf16.msra.mxu1 %v6208_v14  ;;  %v4218_v23 = vpop.eup %4217  ;;  %v6226_v14 = vld [vmem:[#allocation6 + $0xec] ss:$16 sps:$4 sm:$0xff]  }
 0x832   :  { %3013 = vmatprep.subr.bf16.mxu0 %v6211_v59  ;;  %3054 = vmatprep.subr.bf16.mxu1 %v6214_v47  ;;  %v6229_v47 = vld [vmem:[#allocation6 + $0xe0] ss:$16 sps:$4 sm:$0xff]  }
 0x835   :  { %3014 = vmatpush1.bf16.msra.mxu0 %v6217_v18  ;;  %3055 = vmatpush1.bf16.msra.mxu1 %v6220_v46  ;;  %v6232_v18 = vld [vmem:[#allocation6 + $0xe8] ss:$16 sps:$4 sm:$0xff]  }
 0x836   :  { %3015 = vmatprep.subr.bf16.mxu0 %v6223_v49  ;;  %3056 = vmatprep.subr.bf16.mxu1 %v6226_v14 }
 0x837   :  { %v4220_v59 = vpop.eup %4219 }
 0x838   :  { %v2999_v41 = vmul.f32 %v4220_v59, %v4218_v23  ;;  %v7211_v59 = vld [vmem:[#allocation16_spill] sm:$0xff] }
 0x839   :  { %3016 = vmatpush1.bf16.msra.mxu0 %v6229_v47  ;;  %3057 = vmatpush1.bf16.msra.mxu1 %v6232_v18 }
 0x83a   :  { %3116 = vmatprep.subr.bf16.mxu0 %v5801_v37  ;;  %3157 = vmatprep.subr.bf16.mxu1 %v7113_v4  ;;  %v3000_v46 = vpack.c.bf16 %v2999_v41, %v2999_v41  ;;  %v7182_v37 = vld [vmem:[#allocation81_spill] sm:$0xff]  ;;  %v7189_v4 = vld [vmem:[#allocation44_spill] sm:$0xff]  ;;  %v7210_v41 = vld [vmem:[#allocation15_spill] sm:$0xff] }
 0x83c   :  { %3034 = vmatmul.mubr.bf16.vlgmr.msra.gmra.mrb[68].mxu0 %v3000_v46  ;;  %3075 = vmatmul.mubr.bf16.vlgmr.msra.gmra.mrb[68].mxu1 %v3000_v46 }
 0x83d   :  { %3117 = vmatpush1.bf16.msra.mxu0 %v7114_v48  ;;  %3158 = vmatpush1.bf16.msra.mxu1 %v7115_v44  ;;  %v7190_v48 = vld [vmem:[#allocation45_spill] sm:$0xff]  ;;  %v7191_v44 = vld [vmem:[#allocation46_spill] sm:$0xff] }
 0x83e   :  { %3118 = vmatprep.subr.bf16.mxu0 %v7116_v9  ;;  %3159 = vmatprep.subr.bf16.mxu1 %v7117_v50  ;;  %v7192_v9 = vld [vmem:[#allocation47_spill] sm:$0xff] }
 0x83f   :  { %3148 = vmatprep.mubr.bf16.mxu0 %v6782_v26  ;;  %3189 = vmatprep.mubr.bf16.mxu1 %v6782_v26  ;;  %v7193_v50 = vld [vmem:[#allocation51_spill] sm:$0xff] }
 0x841   :  { %3119 = vmatpush1.bf16.msra.mxu0 %v7118_v43  ;;  %3160 = vmatpush1.bf16.msra.mxu1 %v7119_v5  ;;  %v7194_v43 = vld [vmem:[#allocation52_spill] sm:$0xff]  ;;  %v7195_v5 = vld [vmem:[#allocation62_spill] sm:$0xff] }
 0x842   :  { %3120 = vmatprep.subr.bf16.mxu0 %v7120_v62  ;;  %3161 = vmatprep.subr.bf16.mxu1 %v7121_v30  ;;  %v7196_v62 = vld [vmem:[#allocation64_spill] sm:$0xff]  ;;  %v7197_v30 = vld [vmem:[#allocation65_spill] sm:$0xff] }
 0x845   :  { %3121 = vmatpush1.bf16.msra.mxu0 %v7122_v2  ;;  %3162 = vmatpush1.bf16.msra.mxu1 %v7123_v54  ;;  %v7198_v2 = vld [vmem:[#allocation82_spill] sm:$0xff]  ;;  %v7199_v54 = vld [vmem:[#allocation83_spill] sm:$0xff] }
 0x846   :  { %3122 = vmatprep.subr.bf16.mxu0 %v7124_v45  ;;  %3163 = vmatprep.subr.bf16.mxu1 %v7125_v1  ;;  %v7200_v45 = vld [vmem:[#allocation84_spill] sm:$0xff]  ;;  %v7201_v1 = vld [vmem:[#allocation85_spill] sm:$0xff] }
 0x849   :  { %3123 = vmatpush1.bf16.msra.mxu0 %v7126_v38  ;;  %3164 = vmatpush1.bf16.msra.mxu1 %v7127_v19  ;;  %v7202_v38 = vld [vmem:[#allocation55_spill] sm:$0xff]  ;;  %v7203_v19 = vld [vmem:[#allocation56_spill] sm:$0xff] }
 0x84a   :  { %3124 = vmatprep.subr.bf16.mxu0 %v7128_v21  ;;  %3165 = vmatprep.subr.bf16.mxu1 %v7129_v24  ;;  %v7204_v21 = vld [vmem:[#allocation57_spill] sm:$0xff]  ;;  %v7205_v24 = vld [vmem:[#allocation58_spill] sm:$0xff] }
 0x84d   :  { %3125 = vmatpush1.bf16.msra.mxu0 %v7130_v42  ;;  %3166 = vmatpush1.bf16.msra.mxu1 %v7131_v63  ;;  %v7206_v42 = vld [vmem:[#allocation59_spill] sm:$0xff]  ;;  %v7207_v63 = vld [vmem:[#allocation60_spill] sm:$0xff] }
 0x84e   :  { %3126 = vmatprep.subr.bf16.mxu0 %v7132_v60  ;;  %3167 = vmatprep.subr.bf16.mxu1 %v7133_v53 }
 0x851   :  { %3127 = vmatpush1.bf16.msra.mxu0 %v7134_v33  ;;  %3168 = vmatpush1.bf16.msra.mxu1 %v7135_v34  ;;  %v7208_v33 = vld [vmem:[#allocation13_spill] sm:$0xff] }
 0x852   :  { %3128 = vmatprep.subr.bf16.mxu0 %v7136_v35  ;;  %3169 = vmatprep.subr.bf16.mxu1 %v7137_v7 }
 0x855   :  { %3129 = vmatpush1.bf16.msra.mxu0 %v5885_v16  ;;  %3170 = vmatpush1.bf16.msra.mxu1 %v5888_v22  ;;  %v7185_v16 = vld [vmem:[#allocation40_spill] sm:$0xff]  ;;  %v7186_v22 = vld [vmem:[#allocation41_spill] sm:$0xff] }
 0x856   :  { %3130 = vmatprep.subr.bf16.mxu0 %v5891_v20  ;;  %3171 = vmatprep.subr.bf16.mxu1 %v5894_v27  ;;  %v7183_v27 = vld [vmem:[#allocation73_spill] sm:$0xff]  ;;  %v7187_v20 = vld [vmem:[#allocation42_spill] sm:$0xff] }
 0x859   :  { %3131 = vmatpush1.bf16.msra.mxu0 %v5897_v61  ;;  %3172 = vmatpush1.bf16.msra.mxu1 %v5900_v28  ;;  %v7184_v28 = vld [vmem:[#allocation39_spill] sm:$0xff] }
 0x85a   :  { %3203 = vmatprep.subr.bf16.mxu0 %v6023_v25  ;;  %3244 = vmatprep.subr.bf16.mxu1 %v6026_v36  ;;  %v7188_v61 = vld [vmem:[#allocation43_spill] sm:$0xff]  ;;  %v7209_v25 = vld [vmem:[#allocation14_spill] sm:$0xff] }
 0x85c   :  { %3149 = vmatmul.mubr.bf16.vlgmr.msra.gmra.mrb[72].mxu0 %v3000_v46  ;;  %3190 = vmatmul.mubr.bf16.vlgmr.msra.gmra.mrb[72].mxu1 %v3000_v46 }
 0x85d   :  { %3204 = vmatpush1.bf16.msra.mxu0 %v6029_v31  ;;  %3245 = vmatpush1.bf16.msra.mxu1 %v6032_v13 }
 0x85e   :  { %3205 = vmatprep.subr.bf16.mxu0 %v6035_v51  ;;  %3246 = vmatprep.subr.bf16.mxu1 %v6038_v52 }
 0x85f   :  { %3235 = vmatprep.mubr.bf16.mxu0 %v6782_v26  ;;  %3276 = vmatprep.mubr.bf16.mxu1 %v6782_v26 }
 0x861   :  { %3206 = vmatpush1.bf16.msra.mxu0 %v6043_v12  ;;  %3247 = vmatpush1.bf16.msra.mxu1 %v6046_v58 }
 0x862   :  { %3207 = vmatprep.subr.bf16.mxu0 %v7182_v37  ;;  %3248 = vmatprep.subr.bf16.mxu1 %v7183_v27 }
 0x865   :  { %3208 = vmatpush1.bf16.msra.mxu0 %v7184_v28  ;;  %3249 = vmatpush1.bf16.msra.mxu1 %v7185_v16 }
 0x866   :  { %3209 = vmatprep.subr.bf16.mxu0 %v7186_v22  ;;  %3250 = vmatprep.subr.bf16.mxu1 %v7187_v20 }
 0x869   :  { %3210 = vmatpush1.bf16.msra.mxu0 %v7188_v61  ;;  %3251 = vmatpush1.bf16.msra.mxu1 %v7189_v4 }
 0x86a   :  { %3211 = vmatprep.subr.bf16.mxu0 %v7190_v48  ;;  %3252 = vmatprep.subr.bf16.mxu1 %v7191_v44 }
 0x86d   :  { %3212 = vmatpush1.bf16.msra.mxu0 %v7192_v9  ;;  %3253 = vmatpush1.bf16.msra.mxu1 %v7193_v50 }
 0x86e   :  { %3213 = vmatprep.subr.bf16.mxu0 %v7194_v43  ;;  %3254 = vmatprep.subr.bf16.mxu1 %v7195_v5 }
 0x871   :  { %3214 = vmatpush1.bf16.msra.mxu0 %v7196_v62  ;;  %3255 = vmatpush1.bf16.msra.mxu1 %v7197_v30  ;;  %v7212_v30 = vld [vmem:[#allocation94_spill] sm:$0xff] }
 0x872   :  { %3215 = vmatprep.subr.bf16.mxu0 %v7198_v2  ;;  %3256 = vmatprep.subr.bf16.mxu1 %v7199_v54  ;;  %v7213_v54 = vld [vmem:[#allocation95_spill] sm:$0xff] }
 0x875   :  { %3216 = vmatpush1.bf16.msra.mxu0 %v7200_v45  ;;  %3257 = vmatpush1.bf16.msra.mxu1 %v7201_v1 }
 0x876   :  { %3217 = vmatprep.subr.bf16.mxu0 %v7202_v38  ;;  %3258 = vmatprep.subr.bf16.mxu1 %v7203_v19  ;;  %v7214_v19 = vld [vmem:[#allocation96_spill] sm:$0xff] }
 0x879   :  { %3218 = vmatpush1.bf16.msra.mxu0 %v7204_v21  ;;  %3259 = vmatpush1.bf16.msra.mxu1 %v7205_v24  ;;  %v7215_v24 = vld [vmem:[#allocation97_spill] sm:$0xff] }
 0x87a   :  { %3310 = vmatprep.subr.bf16.mxu0 %v7206_v42  ;;  %3351 = vmatprep.subr.bf16.mxu1 %v7207_v63 }
 0x90f   :  { %v3035_v60 = vpop.f32.mrb[68].mxu0  ;;  %v3076_v53 = vpop.f32.mrb[68].mxu1 }
 0x910   :  { %v3775_v34 = vadd.f32 %v3035_v60, %v7208_v33  ;;  %v3037_v35 = vpop.f32.mrb[69].mxu0  ;;  %v3078_v7 = vpop.f32.mrb[69].mxu1  ;;  %v3777_v37 = vadd.f32 %v3076_v53, %v7211_v59 }
 0x911   :  { %v3776_v36 = vadd.f32 %v3037_v35, %v7209_v25  ;;  %v3039_v31 = vpop.f32.mrb[70].mxu0  ;;  %v3080_v13 = vpop.f32.mrb[70].mxu1  ;;  %v3778_v46 = vadd.f32 %v3078_v7, %v7210_v41 }
 0x912   :  { %v3700_v51 = vmul.f32 -1.442695, %v3775_v34  ;;  %v3040_v52 = vpop.f32.mrb[71].mxu0  ;;  %v3081_v12 = vpop.f32.mrb[71].mxu1 }
 0x913   :  { %v3701_v58 = vmul.f32 -1.442695, %v3776_v36  ;;  %v3702_v23 = vmul.f32 -1.442695, %v3778_v46 }
 0x914   :  { %4221 = vpow2.f32 %v3700_v51 }
 0x915   :  { %4223 = vpow2.f32 %v3701_v58 }
 0x916   :  { %4225 = vpow2.f32 %v3702_v23  ;;  %v7217_v23 = vld [vmem:[#allocation63_spill] sm:$0xff] }
 0x917   :  { %4227 = vtanh.f32 %v3777_v37 }
 0x91e   :  { %v4222_v27 = vpop.eup %4221 }
 0x91f   :  { %v4224_v28 = vpop.eup %4223  ;;  %v3090_v16 = vadd.f32 1.0, %v4222_v27  ;;  %v7221_v27 = vld [vmem:[#allocation19_spill] sm:$0xff] }
 0x920   :  { %v3096_v22 = vadd.f32 1.0, %v4224_v28  ;;  %v4226_v20 = vpop.eup %4225  ;;  %v7222_v28 = vld [vmem:[#allocation20_spill] sm:$0xff] }
 0x921   :  { %4229 = vrcp.f32 %v3090_v16  ;;  %v4228_v61 = vpop.eup %4227  ;;  %v3103_v9 = vadd.f32 1.0, %v4226_v20  ;;  %v7227_v16 = vld [vmem:[#allocation76_spill] sm:$0xff] }
 0x922   :  { %4231 = vrcp.f32 %v3096_v22  ;;  %v7228_v22 = vld [vmem:[#allocation77_spill] sm:$0xff] }
 0x923   :  { %4233 = vrcp.f32 %v3103_v9  ;;  %v4562_v9 = vmov 0.0  }
 0x92b   :  { %v4230_v4 = vpop.eup %4229 }
 0x92c   :  { %v4232_v48 = vpop.eup %4231  ;;  %v3107_v44 = vmul.f32 %v4230_v4, %v4228_v61 }
 0x92d   :  { %v3106_v50 = vmul.f32 %v4232_v48, %v6132_v17  ;;  %v4234_v7 = vpop.eup %4233 }
 0x92f   :  { %v6310_v43 = vadd.f32 %v3107_v44, %v3106_v50  ;;  %v3150_v5 = vpop.f32.mrb[72].mxu0  ;;  %v3191_v62 = vpop.f32.mrb[72].mxu1  ;;  %v4005_v44 = vld [vmem:[%s6401_s7] sm:$0xff]   ;;  %v4010_v50 = vld [vmem:[%s6401_s7 + $0x28] sm:$0xff]  }
 0x930   :  { %v3198_v2 = vadd.f32 %v3150_v5, %v7212_v30  ;;  %v3200_v45 = vadd.f32 %v3191_v62, %v7213_v54  ;;  %v3152_v1 = vpop.f32.mrb[73].mxu0  ;;  %v3193_v38 = vpop.f32.mrb[73].mxu1  ;;  %v4011_v5 = vld [vmem:[%s6401_s7 + $0x30] sm:$0xff]   ;;  %v4012_v62 = vld [vmem:[%s6401_s7 + $0x38] sm:$0xff]  }
 0x931   :  { %v3199_v21 = vadd.f32 %v3152_v1, %v7214_v19  ;;  %v3201_v42 = vadd.f32 %v3193_v38, %v7215_v24  ;;  %v3154_v63 = vpop.f32.mrb[74].mxu0  ;;  %v3195_v60 = vpop.f32.mrb[74].mxu1  ;;  %4235 = vtanh.f32 %v6310_v43 }
 0x932   :  { %v3703_v17 = vmul.f32 -1.442695, %v3198_v2  ;;  %v3155_v53 = vpop.f32.mrb[75].mxu0  ;;  %v3196_v34 = vpop.f32.mrb[75].mxu1 }
 0x933   :  { %v3704_v35 = vmul.f32 -1.442695, %v3199_v21  ;;  %v3705_v31 = vmul.f32 -1.442695, %v3201_v42 }
 0x934   :  { %4237 = vpow2.f32 %v3703_v17 }
 0x935   :  { %4239 = vpow2.f32 %v3704_v35 }
 0x936   :  { %4241 = vpow2.f32 %v3705_v31 }
 0x937   :  { %4243 = vtanh.f32 %v3200_v45 }
 0x93b   :  { %v4236_v36 = vpop.eup %4235 }
 0x93c   :  { %v3110_v13 = vmul.f32 %v4236_v36, %v4234_v7 }
 0x93e   :  { %v4238_v51 = vpop.eup %4237  ;;  %v3202_v52 = vpack.c.bf16 %v3110_v13, %v3110_v13 }
 0x93f   :  { %v4240_v12 = vpop.eup %4239  ;;  %v3288_v58 = vadd.f32 1.0, %v4238_v51 }
 0x940   :  { %v3294_v46 = vadd.f32 1.0, %v4240_v12  ;;  %3236 = vmatmul.mubr.bf16.vlgmr.msra.gmra.mrb[76].mxu0 %v3202_v52  ;;  %3277 = vmatmul.mubr.bf16.vlgmr.msra.gmra.mrb[76].mxu1 %v3202_v52 }
 0x941   :  { %4245 = vrcp.f32 %v3288_v58  ;;  %3311 = vmatpush1.bf16.msra.mxu0 %v6139_v57  ;;  %3352 = vmatpush1.bf16.msra.mxu1 %v6142_v56  ;;  %v4242_v57 = vpop.eup %4241  ;;  %v7216_v56 = vld [vmem:[#allocation61_spill] sm:$0xff] }
 0x942   :  { %4247 = vrcp.f32 %v3294_v46  ;;  %3312 = vmatprep.subr.bf16.mxu0 %v6145_v6  ;;  %3353 = vmatprep.subr.bf16.mxu1 %v6148_v39  ;;  %v4244_v6 = vpop.eup %4243 }
 0x943   :  { %3342 = vmatprep.mubr.bf16.mxu0 %v6782_v26  ;;  %3383 = vmatprep.mubr.bf16.mxu1 %v6782_v26 }
 0x945   :  { %3313 = vmatpush1.bf16.msra.mxu0 %v6153_v11  ;;  %3354 = vmatpush1.bf16.msra.mxu1 %v6156_v55  ;;  %v3301_v11 = vadd.f32 1.0, %v4242_v57 }
 0x946   :  { %3314 = vmatprep.subr.bf16.mxu0 %v6159_v10  ;;  %3355 = vmatprep.subr.bf16.mxu1 %v6162_v15  ;;  %v7218_v10 = vld [vmem:[#allocation66_spill] sm:$0xff] }
 0x947   :  { %4249 = vrcp.f32 %v3301_v11 }
 0x949   :  { %3315 = vmatpush1.bf16.msra.mxu0 %v6165_v40  ;;  %3356 = vmatpush1.bf16.msra.mxu1 %v7216_v56  ;;  %v7219_v40 = vld [vmem:[#allocation17_spill] sm:$0xff] }
 0x94a   :  { %3316 = vmatprep.subr.bf16.mxu0 %v7217_v23  ;;  %3357 = vmatprep.subr.bf16.mxu1 %v6174_v8  ;;  %v7220_v8 = vld [vmem:[#allocation18_spill] sm:$0xff] }
 0x94b   :  { %v4246_v39 = vpop.eup %4245 }
 0x94c   :  { %v4248_v26 = vpop.eup %4247  ;;  %v3305_v37 = vmul.f32 %v4246_v39, %v4244_v6  ;;  %v3709_v6 = vld [vmem:[%s6402_s8] ss:$0 sm:$0xff] }
 0x94d   :  { %v3304_v55 = vmul.f32 %v4248_v26, %v6190_v32  ;;  %3317 = vmatpush1.bf16.msra.mxu0 %v6178_v3  ;;  %3358 = vmatpush1.bf16.msra.mxu1 %v6181_v29  ;;  %v7223_v32 = vld [vmem:[#allocation67_spill] sm:$0xff]  ;;  %v7224_v3 = vld [vmem:[#allocation68_spill] sm:$0xff]  ;;  %v7225_v29 = vld [vmem:[#allocation74_spill] sm:$0xff] }
 0x94e   :  { %3318 = vmatprep.subr.bf16.mxu0 %v6184_v0  ;;  %3359 = vmatprep.subr.bf16.mxu1 %v7218_v10  ;;  %v7226_v0 = vld [vmem:[#allocation75_spill] sm:$0xff] }
 0x94f   :  { %v3306_v15 = vadd.f32 %v3305_v37, %v3304_v55 }
 0x951   :  { %4251 = vtanh.f32 %v3306_v15  ;;  %3319 = vmatpush1.bf16.msra.mxu0 %v7219_v40  ;;  %3360 = vmatpush1.bf16.msra.mxu1 %v7220_v8  ;;  %v4250_v20 = vpop.eup %4249 }
 0x952   :  { %3320 = vmatprep.subr.bf16.mxu0 %v7221_v27  ;;  %3361 = vmatprep.subr.bf16.mxu1 %v7222_v28 }
 0x955   :  { %3321 = vmatpush1.bf16.msra.mxu0 %v7223_v32  ;;  %3362 = vmatpush1.bf16.msra.mxu1 %v7224_v3 }
 0x956   :  { %3322 = vmatprep.subr.bf16.mxu0 %v7225_v29  ;;  %3363 = vmatprep.subr.bf16.mxu1 %v7226_v0 }
 0x959   :  { %3323 = vmatpush1.bf16.msra.mxu0 %v7227_v16  ;;  %3364 = vmatpush1.bf16.msra.mxu1 %v7228_v22 }
 0x95a   :  { %3324 = vmatprep.subr.bf16.mxu0 %v6223_v49  ;;  %3365 = vmatprep.subr.bf16.mxu1 %v6226_v14  ;;  %v4006_v49 = vld [vmem:[%s6401_s7 + $0x8] sm:$0xff]   ;;  %v4009_v14 = vld [vmem:[%s6401_s7 + $0x20] sm:$0xff]  }
 0x95b   :  { %v4252_v61 = vpop.eup %4251 }
 0x95c   :  { %v3308_v4 = vmul.f32 %v4252_v61, %v4250_v20 }
 0x95d   :  { %3325 = vmatpush1.bf16.msra.mxu0 %v6229_v47  ;;  %3366 = vmatpush1.bf16.msra.mxu1 %v6232_v18  ;;  %v4007_v47 = vld [vmem:[%s6401_s7 + $0x10] sm:$0xff]   ;;  %v4008_v18 = vld [vmem:[%s6401_s7 + $0x18] sm:$0xff]  }
 0x95e   :  { %v3309_v48 = vpack.c.bf16 %v3308_v4, %v3308_v4  ;;  %3731 = vmatprep.subr.bf16.mxu0 %v4562_v9 }
 0x960   :  { %3343 = vmatmul.mubr.bf16.vlgmr.msra.gmra.mrb[76].mxu0 %v3309_v48  ;;  %3384 = vmatmul.mubr.bf16.vlgmr.msra.gmra.mrb[76].mxu1 %v3309_v48 }
 0x961   :  { %3732 = vmatpush3.bf16.msra.mxu0 %v4005_v44  ;;  %3747 = vmatprep.mubr.msk.bf16.mxu0 %vm4563_vm3, %v4562_v9 }
 0x962   :  { %3733 = vmatprep.subr.bf16.mxu0 %v4562_v9 }
 0x965   :  { %3734 = vmatpush3.bf16.msra.mxu0 %v4006_v49 }
 0x966   :  { %3735 = vmatprep.subr.bf16.mxu0 %v4562_v9 }
 0x969   :  { %3736 = vmatpush3.bf16.msra.mxu0 %v4007_v47 }
 0x96a   :  { %3737 = vmatprep.subr.bf16.mxu0 %v4562_v9 }
 0x96d   :  { %3738 = vmatpush3.bf16.msra.mxu0 %v4008_v18 }
 0x96e   :  { %3739 = vmatprep.subr.bf16.mxu0 %v4562_v9 }
 0x971   :  { %3740 = vmatpush3.bf16.msra.mxu0 %v4009_v14 }
 0x972   :  { %3741 = vmatprep.subr.bf16.mxu0 %v4562_v9 }
 0x975   :  { %3742 = vmatpush3.bf16.msra.mxu0 %v4010_v50 }
 0x976   :  { %3743 = vmatprep.subr.bf16.mxu0 %v4562_v9 }
 0x979   :  { %3744 = vmatpush3.bf16.msra.mxu0 %v4011_v5 }
 0x97a   :  { %3745 = vmatprep.subr.bf16.mxu0 %v4562_v9 }
 0x97d   :  { %3746 = vmatpush3.bf16.msra.mxu0 %v4012_v62 }
 0xa33   :  { %v3344_v30 = vpop.f32.mrb[76].mxu0  ;;  %v3385_v2 = vpop.f32.mrb[76].mxu1 }
 0xa34   :  { %v3779_v54 = vadd.f32 %v3344_v30, %v7208_v33  ;;  %v3346_v45 = vpop.f32.mrb[77].mxu0  ;;  %v3387_v1 = vpop.f32.mrb[77].mxu1  ;;  %v3781_v34 = vadd.f32 %v3385_v2, %v7211_v59 }
 0xa35   :  { %v3780_v38 = vadd.f32 %v3346_v45, %v7209_v25  ;;  %v3348_v19 = vpop.f32.mrb[78].mxu0  ;;  %v3389_v21 = vpop.f32.mrb[78].mxu1  ;;  %v3782_v17 = vadd.f32 %v3387_v1, %v7210_v41 }
 0xa36   :  { %v3706_v24 = vmul.f32 -1.442695, %v3779_v54  ;;  %v3349_v42 = vpop.f32.mrb[79].mxu0  ;;  %v3390_v63 = vpop.f32.mrb[79].mxu1 }
 0xa37   :  { %v3707_v60 = vmul.f32 -1.442695, %v3780_v38  ;;  %v3708_v53 = vmul.f32 -1.442695, %v3782_v17 }
 0xa38   :  { %4253 = vpow2.f32 %v3706_v24 }
 0xa39   :  { %4255 = vpow2.f32 %v3707_v60 }
 0xa3a   :  { %4257 = vpow2.f32 %v3708_v53 }
 0xa3b   :  { %4259 = vtanh.f32 %v3781_v34 }
 0xa42   :  { %v4254_v35 = vpop.eup %4253 }
 0xa43   :  { %v4256_v7 = vpop.eup %4255  ;;  %v3399_v33 = vadd.f32 1.0, %v4254_v35 }
 0xa44   :  { %v3405_v36 = vadd.f32 1.0, %v4256_v7  ;;  %v4258_v25 = vpop.eup %4257 }
 0xa45   :  { %4261 = vrcp.f32 %v3399_v33  ;;  %v4260_v31 = vpop.eup %4259  ;;  %v3412_v12 = vadd.f32 1.0, %v4258_v25 }
 0xa46   :  { %4263 = vrcp.f32 %v3405_v36 }
 0xa47   :  { %4265 = vrcp.f32 %v3412_v12 }
 0xa4f   :  { %v4262_v13 = vpop.eup %4261 }
 0xa50   :  { %v4264_v51 = vpop.eup %4263  ;;  %v3416_v52 = vmul.f32 %v4262_v13, %v4260_v31 }
 0xa51   :  { %v3415_v58 = vmul.f32 %v4264_v51, %v6310_v43  ;;  %v4266_v59 = vpop.eup %4265 }
 0xa53   :  { %v3417_v41 = vadd.f32 %v3416_v52, %v3415_v58 }
 0xa55   :  { %4267 = vtanh.f32 %v3417_v41 }
 0xa5f   :  { %v4268_v46 = vpop.eup %4267 }
 0xa60   :  { %v3419_v57 = vmul.f32 %v4268_v46, %v4266_v59 }
 0xa62   :  { %v3420_v56 = vpack.c.bf16 %v3419_v57, %v3419_v57 }
 0xa64   :  { %3748 = vmatmul.mubr.bf16.vlgmr.msra.gmra.mrb[80].mxu0 %v3420_v56 }
 0xb37   :  { %v3526_v23 = vpop.f32.mrb[80].mxu0 }
 0xb38   :  { %v3527_v39 = vadd.f32 %v3709_v6, %v3526_v23  ;;  %v3749_v26 = vpop.f32.mrb[81].mxu0 }
 0xb39   :  { %v3529_v37 = vpop.f32.mrb[82].mxu0 }
 0xb3a   :  { %3532 = vst [vmem:[#allocation9] sm:$0xff] %v3527_v39  ;;  %v3750_v43 = vpop.f32.mrb[83].mxu0 }
 0xb3b   :  { %4538 = shalt.err (!%p4535_p0)
}
 0xb3c   :  { %s4539_s8 = scalar_lea.hbm %s6403_s9, 128 }
 0xb3d   :  { %p4540_p1 = scmp.ne.s32.totalorder %s6403_s9, %s4539_s8  ;;  %p4543_p2 = scmp.lt.u32.totalorder %s4539_s8, %s6403_s9 }
 0xb3f   :  { %p4545_p3 = pnand %p4543_p2, %p4540_p1 }
 0xb41   :  { %4548 = shalt.err (!%p4545_p3)
}
 0xb42   :  { %3542 = dma.vmem_to_hbm [thread:$0]  %s3540_s15, 128, %s6403_s9, [#allocation5]  }
 0xb43   :  { %4553 = dma.done.wait [#allocation5], 128  }
 0xb44   :  { %4554 = vsyncadd [#allocation5], 4294967168 }
 0xb45   :  { %3546 = vsyncpa [#allocation4], 1 }
 0xb46   :  { %3547 = vsyncpa [#allocation7], 1 }
 0xb47   :  { %3548 = vsyncpa [#allocation5], 1 }

</bundles_post_ra>
